<compile_context>
chip_gen: v5e
topology: v5e:2x2
jax: 0.10.0
libtpu: 0.0.40
codegen_flags: <defaults>
</compile_context>

<pallas_src>
import jax
import jax.numpy as jnp
import numpy as np
from jax.experimental import pallas as pl
from jax.experimental.pallas import tpu as pltpu

# Shapes from the PyTorch spec (kept small).
H = 128    # hidden_size
F = 88     # output_size (decoder input feature dim == output dim)
T = 8      # sequence length
NL = 2     # num_layers
FP = 128   # feature dim padded to one full lane width (sliced back to F outside)

BF16 = jnp.bfloat16


def decoder_kernel(x_ref, h_in_ref, c_in_ref,
                   w_ih0_ref, w_hh0_ref, b0_ref,
                   w1a_ref, w1b_ref, b1_ref,
                   w_fc_ref, b_fc_ref,
                   pred_ref, h_out_ref, c_out_ref):
    # Layer-0 input-side gates for all timesteps in one batched bf16 MXU matmul
    # (f32 accumulation); bias added in f32.
    gx = jnp.dot(x_ref[...], w_ih0_ref[...],
                 preferred_element_type=jnp.float32) + b0_ref[...]

    w_hh0 = w_hh0_ref[...]   # bf16 (H, 4H)
    w1a = w1a_ref[...]       # bf16 (H, 4H)  layer-1 input weights
    w1b = w1b_ref[...]       # bf16 (H, 4H)  layer-1 hidden weights
    b1 = b1_ref[...]         # f32  (1, 4H)

    def lstm_cell(gates, c_prev):
        # g-gate columns were pre-scaled by 2 in the wrapper, so
        # tanh(g_orig) == 2*sigmoid(gates_g) - 1: a single lane-dense sigmoid
        # over the whole 4H row + one tanh for c_new.  All elementwise math f32.
        s = jax.nn.sigmoid(gates)
        i = s[:, 0 * H:1 * H]
        f = s[:, 1 * H:2 * H]
        g = 2.0 * s[:, 2 * H:3 * H] - 1.0
        o = s[:, 3 * H:4 * H]
        c_new = f * c_prev + i * g
        h_new = o * jnp.tanh(c_new)
        return h_new, c_new

    # Recurrent state lives in vregs (plain loop-carried f32 values).
    h0 = h_in_ref[0:1, :]
    c0 = c_in_ref[0:1, :]
    h1 = h_in_ref[1:2, :]
    c1 = c_in_ref[1:2, :]

    # T is tiny and static: fully unroll so every slice index is static and the
    # scheduler can overlap layer-0(t+1) MXU latency with layer-1(t) cell math.
    h1_rows = []
    for t in range(T):
        # ---- layer 0 ----  (bf16 MXU inputs, f32 accumulation)
        g0 = gx[t:t + 1, :] + jnp.dot(h0.astype(BF16), w_hh0,
                                      preferred_element_type=jnp.float32)
        h0, c0 = lstm_cell(g0, c0)
        # ---- layer 1: two MXU pushes summed in f32 (no lane concat) ----
        g1 = (jnp.dot(h0.astype(BF16), w1a, preferred_element_type=jnp.float32)
              + jnp.dot(h1.astype(BF16), w1b, preferred_element_type=jnp.float32)
              + b1)
        h1, c1 = lstm_cell(g1, c1)
        # Keep the layer-1 output in vregs; no VMEM scratch round trip.
        h1_rows.append(h1)

    # ---- fc_out + sigmoid: one (T,H)@(H,FP) bf16 matmul, lane-dense store ----
    h1_hist = jnp.concatenate(h1_rows, axis=0)              # (T, H) f32, 1 vreg
    logits = jnp.dot(h1_hist.astype(BF16), w_fc_ref[...],
                     preferred_element_type=jnp.float32) + b_fc_ref[...]
    pred_ref[...] = jax.nn.sigmoid(logits)

    h_out_ref[...] = jnp.concatenate([h0, h1], axis=0)
    c_out_ref[...] = jnp.concatenate([c0, c1], axis=0)


def prepare_params(w_ih0, w_hh0, b0, w_ih1, w_hh1, b1, w_fc, b_fc):
    """Wrapper-side weight rewrites: g-gate x2 prescale (exact), lane padding,
    bf16 cast of all matmul operands.  Biases stay f32 (added post-accumulate)."""
    def scale_g(w):  # double the g-gate columns (PyTorch gate order [i,f,g,o])
        return w.at[..., 2 * H:3 * H].multiply(2.0)

    w_ih0p = (jnp.zeros((FP, 4 * H), jnp.float32)
              .at[:F, :].set(scale_g(w_ih0))).astype(BF16)      # (128, 4H)
    w_hh0p = scale_g(w_hh0).astype(BF16)                        # (H, 4H)
    b0p = scale_g(b0)                                           # (1, 4H) f32
    w1a = scale_g(w_ih1).astype(BF16)                           # (H, 4H)
    w1b = scale_g(w_hh1).astype(BF16)                           # (H, 4H)
    b1p = scale_g(b1)                                           # (1, 4H) f32
    w_fcp = (jnp.zeros((H, FP), jnp.float32)
             .at[:, :F].set(w_fc)).astype(BF16)                 # (H, 128)
    b_fcp = jnp.zeros((1, FP), jnp.float32).at[:, :F].set(b_fc)
    return (w_ih0p, w_hh0p, b0p, w1a, w1b, b1p, w_fcp, b_fcp)


def decoder_forward(x, h_in, c_in, params):
    # Pad the input to a full 128-lane tile and cast to bf16 (matching zero
    # rows were appended to w_ih0), so the x DMA / matmul LHS is lane-dense.
    x_pad = (jnp.zeros((T, FP), jnp.float32).at[:, :F].set(x)).astype(BF16)

    vmem = pl.BlockSpec(memory_space=pltpu.MemorySpace.VMEM)
    out_shapes = (
        jax.ShapeDtypeStruct((T, FP), jnp.float32),   # padded prediction
        jax.ShapeDtypeStruct((NL, H), jnp.float32),   # hidden
        jax.ShapeDtypeStruct((NL, H), jnp.float32),   # cell
    )
    pred_pad, h_out, c_out = pl.pallas_call(
        decoder_kernel,
        out_shape=out_shapes,
        in_specs=[vmem] * 11,
        out_specs=(vmem, vmem, vmem),
    )(x_pad, h_in, c_in, *params)
    return pred_pad[:, :F], h_out, c_out


def reference_f32(x, h0, c0, w_ih0, w_hh0, b0, w_ih1, w_hh1, b1, w_fc, b_fc):
    """Pure-JAX f32 reference of the PyTorch forward (original weights)."""
    h = [h0[0:1], h0[1:2]]
    c = [c0[0:1], c0[1:2]]
    preds = []

    def cell(g, c_prev):
        i = jax.nn.sigmoid(g[:, 0 * H:1 * H])
        f = jax.nn.sigmoid(g[:, 1 * H:2 * H])
        gg = jnp.tanh(g[:, 2 * H:3 * H])
        o = jax.nn.sigmoid(g[:, 3 * H:4 * H])
        c_new = f * c_prev + i * gg
        return o * jnp.tanh(c_new), c_new

    for t in range(T):
        xt = x[t:t + 1]
        g0 = xt @ w_ih0 + b0 + h[0] @ w_hh0
        h[0], c[0] = cell(g0, c[0])
        g1 = h[0] @ w_ih1 + b1 + h[1] @ w_hh1
        h[1], c[1] = cell(g1, c[1])
        preds.append(jax.nn.sigmoid(h[1] @ w_fc + b_fc))
    return (jnp.concatenate(preds, axis=0),
            jnp.concatenate(h, axis=0),
            jnp.concatenate(c, axis=0))


def reference_bf16(x, h0, c0, w_ih0, w_hh0, b0, w_ih1, w_hh1, b1, w_fc, b_fc):
    """Same math with bf16 matmul operands + f32 accumulation (the kernel's
    intended precision policy), but WITHOUT the g-gate/fusion/padding tricks —
    validates those transforms are exact."""
    def mm(a, w):
        return jnp.dot(a.astype(BF16), w.astype(BF16),
                       preferred_element_type=jnp.float32)

    h = [h0[0:1], h0[1:2]]
    c = [c0[0:1], c0[1:2]]

    def cell(g, c_prev):
        i = jax.nn.sigmoid(g[:, 0 * H:1 * H])
        f = jax.nn.sigmoid(g[:, 1 * H:2 * H])
        gg = jnp.tanh(g[:, 2 * H:3 * H])
        o = jax.nn.sigmoid(g[:, 3 * H:4 * H])
        c_new = f * c_prev + i * gg
        return o * jnp.tanh(c_new), c_new

    gx = mm(x, w_ih0) + b0
    h1s = []
    for t in range(T):
        g0 = gx[t:t + 1] + mm(h[0], w_hh0)
        h[0], c[0] = cell(g0, c[0])
        g1 = mm(h[0], w_ih1) + mm(h[1], w_hh1) + b1
        h[1], c[1] = cell(g1, c[1])
        h1s.append(h[1])
    pred = jax.nn.sigmoid(mm(jnp.concatenate(h1s, axis=0), w_fc) + b_fc)
    return pred, jnp.concatenate(h, axis=0), jnp.concatenate(c, axis=0)


if __name__ == "__main__":
    key = jax.random.PRNGKey(0)
    keys = jax.random.split(key, 16)
    k = 1.0 / np.sqrt(H)

    def u(kk, shape):
        return jax.random.uniform(kk, shape, jnp.float32, minval=-k, maxval=k)

    # nn.LSTM / nn.Linear-shaped params, pre-transposed to (in, out) layout.
    w_ih0 = u(keys[0], (F, 4 * H))
    w_hh0 = u(keys[1], (H, 4 * H))
    b0 = u(keys[2], (1, 4 * H))          # b_ih_l0 + b_hh_l0 combined
    w_ih1 = u(keys[3], (H, 4 * H))
    w_hh1 = u(keys[4], (H, 4 * H))
    b1 = u(keys[5], (1, 4 * H))          # b_ih_l1 + b_hh_l1 combined
    w_fc = u(keys[6], (H, F))
    b_fc = u(keys[7], (1, F))

    # Inputs: inpt (T, F); hidden/cell (NL, H) (PyTorch batch dim squeezed).
    x = jax.random.normal(keys[8], (T, F), jnp.float32)
    h0 = jax.random.normal(keys[9], (NL, H), jnp.float32)
    c0 = jax.random.normal(keys[10], (NL, H), jnp.float32)

    params = prepare_params(w_ih0, w_hh0, b0, w_ih1, w_hh1, b1, w_fc, b_fc)
    pred, h_out, c_out = decoder_forward(x, h0, c0, params)
    jax.block_until_ready((pred, h_out, c_out))

    # Tight check vs a reference using the same bf16-matmul / f32-accumulate
    # precision policy (proves the in-kernel transforms are exact).
    pred_b, h_b, c_b = reference_bf16(x, h0, c0, w_ih0, w_hh0, b0,
                                      w_ih1, w_hh1, b1, w_fc, b_fc)
    np.testing.assert_allclose(np.asarray(pred), np.asarray(pred_b), rtol=1e-3, atol=1e-3)
    np.testing.assert_allclose(np.asarray(h_out), np.asarray(h_b), rtol=1e-3, atol=1e-3)
    np.testing.assert_allclose(np.asarray(c_out), np.asarray(c_b), rtol=1e-3, atol=1e-3)

    # Loose sanity check vs the full-f32 reference (bounds the bf16-MXU
    # rounding accumulated over the 8-step, 2-layer recurrence).
    pred_r, h_r, c_r = reference_f32(x, h0, c0, w_ih0, w_hh0, b0,
                                     w_ih1, w_hh1, b1, w_fc, b_fc)
    np.testing.assert_allclose(np.asarray(pred), np.asarray(pred_r), rtol=5e-2, atol=5e-2)
    np.testing.assert_allclose(np.asarray(h_out), np.asarray(h_r), rtol=5e-2, atol=5e-2)
    np.testing.assert_allclose(np.asarray(c_out), np.asarray(c_r), rtol=5e-2, atol=5e-2)

    print("KERNEL_OK")
</pallas_src>

<mosaic_0001>
module attributes {stable_mosaic.version = 11 : i64} {
  func.func @decoder_kernel(%arg0: memref<8x128xbf16, #tpu.memory_space<vmem>>, %arg1: memref<2x128xf32, #tpu.memory_space<vmem>>, %arg2: memref<2x128xf32, #tpu.memory_space<vmem>>, %arg3: memref<128x512xbf16, #tpu.memory_space<vmem>>, %arg4: memref<128x512xbf16, #tpu.memory_space<vmem>>, %arg5: memref<1x512xf32, #tpu.memory_space<vmem>>, %arg6: memref<128x512xbf16, #tpu.memory_space<vmem>>, %arg7: memref<128x512xbf16, #tpu.memory_space<vmem>>, %arg8: memref<1x512xf32, #tpu.memory_space<vmem>>, %arg9: memref<128x128xbf16, #tpu.memory_space<vmem>>, %arg10: memref<1x128xf32, #tpu.memory_space<vmem>>, %arg11: memref<8x128xf32, #tpu.memory_space<vmem>>, %arg12: memref<2x128xf32, #tpu.memory_space<vmem>>, %arg13: memref<2x128xf32, #tpu.memory_space<vmem>>) attributes {dimension_semantics = [], scalar_prefetch = 0 : i64, scratch_operands = 0 : i64, tpu.core_type = #tpu.core_type<tc>} {
    %c0 = arith.constant 0 : index
    %c0_0 = arith.constant 0 : index
    %0 = vector.load %arg0[%c0, %c0_0] : memref<8x128xbf16, #tpu.memory_space<vmem>>, vector<8x128xbf16>
    %c0_1 = arith.constant 0 : index
    %c0_2 = arith.constant 0 : index
    %1 = vector.load %arg3[%c0_1, %c0_2] : memref<128x512xbf16, #tpu.memory_space<vmem>>, vector<128x512xbf16>
    %cst = arith.constant dense<0.000000e+00> : vector<8x512xf32>
    %2 = tpu.matmul %0, %1, %cst {dimension_numbers = #tpu.dot_dimension_numbers<[1], [0], [0], [1], [0, 0, 1, 1], [], []>} : vector<8x128xbf16>, vector<128x512xbf16>, vector<8x512xf32> -> vector<8x512xf32>
    %c0_3 = arith.constant 0 : index
    %c0_4 = arith.constant 0 : index
    %3 = vector.load %arg5[%c0_3, %c0_4] : memref<1x512xf32, #tpu.memory_space<vmem>>, vector<1x512xf32>
    %4 = vector.broadcast %3 : vector<1x512xf32> to vector<8x512xf32>
    %5 = arith.addf %2, %4 : vector<8x512xf32>
    %c0_5 = arith.constant 0 : index
    %c0_6 = arith.constant 0 : index
    %6 = vector.load %arg4[%c0_5, %c0_6] : memref<128x512xbf16, #tpu.memory_space<vmem>>, vector<128x512xbf16>
    %c0_7 = arith.constant 0 : index
    %c0_8 = arith.constant 0 : index
    %7 = vector.load %arg6[%c0_7, %c0_8] : memref<128x512xbf16, #tpu.memory_space<vmem>>, vector<128x512xbf16>
    %c0_9 = arith.constant 0 : index
    %c0_10 = arith.constant 0 : index
    %8 = vector.load %arg7[%c0_9, %c0_10] : memref<128x512xbf16, #tpu.memory_space<vmem>>, vector<128x512xbf16>
    %c0_11 = arith.constant 0 : index
    %c0_12 = arith.constant 0 : index
    %9 = vector.load %arg8[%c0_11, %c0_12] : memref<1x512xf32, #tpu.memory_space<vmem>>, vector<1x512xf32>
    %c0_13 = arith.constant 0 : index
    %c0_14 = arith.constant 0 : index
    %10 = vector.load %arg1[%c0_13, %c0_14] : memref<2x128xf32, #tpu.memory_space<vmem>>, vector<1x128xf32>
    %c0_15 = arith.constant 0 : index
    %c0_16 = arith.constant 0 : index
    %11 = vector.load %arg2[%c0_15, %c0_16] : memref<2x128xf32, #tpu.memory_space<vmem>>, vector<1x128xf32>
    %c1 = arith.constant 1 : index
    %c0_17 = arith.constant 0 : index
    %12 = vector.load %arg1[%c1, %c0_17] : memref<2x128xf32, #tpu.memory_space<vmem>>, vector<1x128xf32>
    %c1_18 = arith.constant 1 : index
    %c0_19 = arith.constant 0 : index
    %13 = vector.load %arg2[%c1_18, %c0_19] : memref<2x128xf32, #tpu.memory_space<vmem>>, vector<1x128xf32>
    %14 = vector.extract_strided_slice %5 {offsets = [0, 0], sizes = [1, 512], strides = [1, 1]} : vector<8x512xf32> to vector<1x512xf32>
    %15 = arith.truncf %10 : vector<1x128xf32> to vector<1x128xbf16>
    %cst_20 = arith.constant dense<0.000000e+00> : vector<1x512xf32>
    %16 = tpu.matmul %15, %6, %cst_20 {dimension_numbers = #tpu.dot_dimension_numbers<[1], [0], [0], [1], [0, 0, 1, 1], [], []>} : vector<1x128xbf16>, vector<128x512xbf16>, vector<1x512xf32> -> vector<1x512xf32>
    %17 = arith.addf %14, %16 : vector<1x512xf32>
    %18 = arith.negf %17 : vector<1x512xf32>
    %19 = math.exp %18 : vector<1x512xf32>
    %cst_21 = arith.constant 1.000000e+00 : f32
    %20 = vector.broadcast %cst_21 : f32 to vector<1x512xf32>
    %21 = arith.addf %20, %19 : vector<1x512xf32>
    %22 = arith.divf %20, %21 : vector<1x512xf32>
    %23 = vector.extract_strided_slice %22 {offsets = [0, 0], sizes = [1, 128], strides = [1, 1]} : vector<1x512xf32> to vector<1x128xf32>
    %24 = vector.extract_strided_slice %22 {offsets = [0, 128], sizes = [1, 128], strides = [1, 1]} : vector<1x512xf32> to vector<1x128xf32>
    %25 = vector.extract_strided_slice %22 {offsets = [0, 256], sizes = [1, 128], strides = [1, 1]} : vector<1x512xf32> to vector<1x128xf32>
    %cst_22 = arith.constant 2.000000e+00 : f32
    %26 = vector.broadcast %cst_22 : f32 to vector<1x128xf32>
    %27 = arith.mulf %26, %25 : vector<1x128xf32>
    %cst_23 = arith.constant 1.000000e+00 : f32
    %28 = vector.broadcast %cst_23 : f32 to vector<1x128xf32>
    %29 = arith.subf %27, %28 : vector<1x128xf32>
    %30 = vector.extract_strided_slice %22 {offsets = [0, 384], sizes = [1, 128], strides = [1, 1]} : vector<1x512xf32> to vector<1x128xf32>
    %31 = arith.mulf %24, %11 : vector<1x128xf32>
    %32 = arith.mulf %23, %29 : vector<1x128xf32>
    %33 = arith.addf %31, %32 : vector<1x128xf32>
    %34 = math.tanh %33 : vector<1x128xf32>
    %35 = arith.mulf %30, %34 : vector<1x128xf32>
    %36 = arith.truncf %35 : vector<1x128xf32> to vector<1x128xbf16>
    %cst_24 = arith.constant dense<0.000000e+00> : vector<1x512xf32>
    %37 = tpu.matmul %36, %7, %cst_24 {dimension_numbers = #tpu.dot_dimension_numbers<[1], [0], [0], [1], [0, 0, 1, 1], [], []>} : vector<1x128xbf16>, vector<128x512xbf16>, vector<1x512xf32> -> vector<1x512xf32>
    %38 = arith.truncf %12 : vector<1x128xf32> to vector<1x128xbf16>
    %cst_25 = arith.constant dense<0.000000e+00> : vector<1x512xf32>
    %39 = tpu.matmul %38, %8, %cst_25 {dimension_numbers = #tpu.dot_dimension_numbers<[1], [0], [0], [1], [0, 0, 1, 1], [], []>} : vector<1x128xbf16>, vector<128x512xbf16>, vector<1x512xf32> -> vector<1x512xf32>
    %40 = arith.addf %37, %39 : vector<1x512xf32>
    %41 = arith.addf %40, %9 : vector<1x512xf32>
    %42 = arith.negf %41 : vector<1x512xf32>
    %43 = math.exp %42 : vector<1x512xf32>
    %cst_26 = arith.constant 1.000000e+00 : f32
    %44 = vector.broadcast %cst_26 : f32 to vector<1x512xf32>
    %45 = arith.addf %44, %43 : vector<1x512xf32>
    %46 = arith.divf %44, %45 : vector<1x512xf32>
    %47 = vector.extract_strided_slice %46 {offsets = [0, 0], sizes = [1, 128], strides = [1, 1]} : vector<1x512xf32> to vector<1x128xf32>
    %48 = vector.extract_strided_slice %46 {offsets = [0, 128], sizes = [1, 128], strides = [1, 1]} : vector<1x512xf32> to vector<1x128xf32>
    %49 = vector.extract_strided_slice %46 {offsets = [0, 256], sizes = [1, 128], strides = [1, 1]} : vector<1x512xf32> to vector<1x128xf32>
    %cst_27 = arith.constant 2.000000e+00 : f32
    %50 = vector.broadcast %cst_27 : f32 to vector<1x128xf32>
    %51 = arith.mulf %50, %49 : vector<1x128xf32>
    %cst_28 = arith.constant 1.000000e+00 : f32
    %52 = vector.broadcast %cst_28 : f32 to vector<1x128xf32>
    %53 = arith.subf %51, %52 : vector<1x128xf32>
    %54 = vector.extract_strided_slice %46 {offsets = [0, 384], sizes = [1, 128], strides = [1, 1]} : vector<1x512xf32> to vector<1x128xf32>
    %55 = arith.mulf %48, %13 : vector<1x128xf32>
    %56 = arith.mulf %47, %53 : vector<1x128xf32>
    %57 = arith.addf %55, %56 : vector<1x128xf32>
    %58 = math.tanh %57 : vector<1x128xf32>
    %59 = arith.mulf %54, %58 : vector<1x128xf32>
    %60 = vector.extract_strided_slice %5 {offsets = [1, 0], sizes = [1, 512], strides = [1, 1]} : vector<8x512xf32> to vector<1x512xf32>
    %61 = arith.truncf %35 : vector<1x128xf32> to vector<1x128xbf16>
    %cst_29 = arith.constant dense<0.000000e+00> : vector<1x512xf32>
    %62 = tpu.matmul %61, %6, %cst_29 {dimension_numbers = #tpu.dot_dimension_numbers<[1], [0], [0], [1], [0, 0, 1, 1], [], []>} : vector<1x128xbf16>, vector<128x512xbf16>, vector<1x512xf32> -> vector<1x512xf32>
    %63 = arith.addf %60, %62 : vector<1x512xf32>
    %64 = arith.negf %63 : vector<1x512xf32>
    %65 = math.exp %64 : vector<1x512xf32>
    %cst_30 = arith.constant 1.000000e+00 : f32
    %66 = vector.broadcast %cst_30 : f32 to vector<1x512xf32>
    %67 = arith.addf %66, %65 : vector<1x512xf32>
    %68 = arith.divf %66, %67 : vector<1x512xf32>
    %69 = vector.extract_strided_slice %68 {offsets = [0, 0], sizes = [1, 128], strides = [1, 1]} : vector<1x512xf32> to vector<1x128xf32>
    %70 = vector.extract_strided_slice %68 {offsets = [0, 128], sizes = [1, 128], strides = [1, 1]} : vector<1x512xf32> to vector<1x128xf32>
    %71 = vector.extract_strided_slice %68 {offsets = [0, 256], sizes = [1, 128], strides = [1, 1]} : vector<1x512xf32> to vector<1x128xf32>
    %cst_31 = arith.constant 2.000000e+00 : f32
    %72 = vector.broadcast %cst_31 : f32 to vector<1x128xf32>
    %73 = arith.mulf %72, %71 : vector<1x128xf32>
    %cst_32 = arith.constant 1.000000e+00 : f32
    %74 = vector.broadcast %cst_32 : f32 to vector<1x128xf32>
    %75 = arith.subf %73, %74 : vector<1x128xf32>
    %76 = vector.extract_strided_slice %68 {offsets = [0, 384], sizes = [1, 128], strides = [1, 1]} : vector<1x512xf32> to vector<1x128xf32>
    %77 = arith.mulf %70, %33 : vector<1x128xf32>
    %78 = arith.mulf %69, %75 : vector<1x128xf32>
    %79 = arith.addf %77, %78 : vector<1x128xf32>
    %80 = math.tanh %79 : vector<1x128xf32>
    %81 = arith.mulf %76, %80 : vector<1x128xf32>
    %82 = arith.truncf %81 : vector<1x128xf32> to vector<1x128xbf16>
    %cst_33 = arith.constant dense<0.000000e+00> : vector<1x512xf32>
    %83 = tpu.matmul %82, %7, %cst_33 {dimension_numbers = #tpu.dot_dimension_numbers<[1], [0], [0], [1], [0, 0, 1, 1], [], []>} : vector<1x128xbf16>, vector<128x512xbf16>, vector<1x512xf32> -> vector<1x512xf32>
    %84 = arith.truncf %59 : vector<1x128xf32> to vector<1x128xbf16>
    %cst_34 = arith.constant dense<0.000000e+00> : vector<1x512xf32>
    %85 = tpu.matmul %84, %8, %cst_34 {dimension_numbers = #tpu.dot_dimension_numbers<[1], [0], [0], [1], [0, 0, 1, 1], [], []>} : vector<1x128xbf16>, vector<128x512xbf16>, vector<1x512xf32> -> vector<1x512xf32>
    %86 = arith.addf %83, %85 : vector<1x512xf32>
    %87 = arith.addf %86, %9 : vector<1x512xf32>
    %88 = arith.negf %87 : vector<1x512xf32>
    %89 = math.exp %88 : vector<1x512xf32>
    %cst_35 = arith.constant 1.000000e+00 : f32
    %90 = vector.broadcast %cst_35 : f32 to vector<1x512xf32>
    %91 = arith.addf %90, %89 : vector<1x512xf32>
    %92 = arith.divf %90, %91 : vector<1x512xf32>
    %93 = vector.extract_strided_slice %92 {offsets = [0, 0], sizes = [1, 128], strides = [1, 1]} : vector<1x512xf32> to vector<1x128xf32>
    %94 = vector.extract_strided_slice %92 {offsets = [0, 128], sizes = [1, 128], strides = [1, 1]} : vector<1x512xf32> to vector<1x128xf32>
    %95 = vector.extract_strided_slice %92 {offsets = [0, 256], sizes = [1, 128], strides = [1, 1]} : vector<1x512xf32> to vector<1x128xf32>
    %cst_36 = arith.constant 2.000000e+00 : f32
    %96 = vector.broadcast %cst_36 : f32 to vector<1x128xf32>
    %97 = arith.mulf %96, %95 : vector<1x128xf32>
    %cst_37 = arith.constant 1.000000e+00 : f32
    %98 = vector.broadcast %cst_37 : f32 to vector<1x128xf32>
    %99 = arith.subf %97, %98 : vector<1x128xf32>
    %100 = vector.extract_strided_slice %92 {offsets = [0, 384], sizes = [1, 128], strides = [1, 1]} : vector<1x512xf32> to vector<1x128xf32>
    %101 = arith.mulf %94, %57 : vector<1x128xf32>
    %102 = arith.mulf %93, %99 : vector<1x128xf32>
    %103 = arith.addf %101, %102 : vector<1x128xf32>
    %104 = math.tanh %103 : vector<1x128xf32>
    %105 = arith.mulf %100, %104 : vector<1x128xf32>
    %106 = vector.extract_strided_slice %5 {offsets = [2, 0], sizes = [1, 512], strides = [1, 1]} : vector<8x512xf32> to vector<1x512xf32>
    %107 = arith.truncf %81 : vector<1x128xf32> to vector<1x128xbf16>
    %cst_38 = arith.constant dense<0.000000e+00> : vector<1x512xf32>
    %108 = tpu.matmul %107, %6, %cst_38 {dimension_numbers = #tpu.dot_dimension_numbers<[1], [0], [0], [1], [0, 0, 1, 1], [], []>} : vector<1x128xbf16>, vector<128x512xbf16>, vector<1x512xf32> -> vector<1x512xf32>
    %109 = arith.addf %106, %108 : vector<1x512xf32>
    %110 = arith.negf %109 : vector<1x512xf32>
    %111 = math.exp %110 : vector<1x512xf32>
    %cst_39 = arith.constant 1.000000e+00 : f32
    %112 = vector.broadcast %cst_39 : f32 to vector<1x512xf32>
    %113 = arith.addf %112, %111 : vector<1x512xf32>
    %114 = arith.divf %112, %113 : vector<1x512xf32>
    %115 = vector.extract_strided_slice %114 {offsets = [0, 0], sizes = [1, 128], strides = [1, 1]} : vector<1x512xf32> to vector<1x128xf32>
    %116 = vector.extract_strided_slice %114 {offsets = [0, 128], sizes = [1, 128], strides = [1, 1]} : vector<1x512xf32> to vector<1x128xf32>
    %117 = vector.extract_strided_slice %114 {offsets = [0, 256], sizes = [1, 128], strides = [1, 1]} : vector<1x512xf32> to vector<1x128xf32>
    %cst_40 = arith.constant 2.000000e+00 : f32
    %118 = vector.broadcast %cst_40 : f32 to vector<1x128xf32>
    %119 = arith.mulf %118, %117 : vector<1x128xf32>
    %cst_41 = arith.constant 1.000000e+00 : f32
    %120 = vector.broadcast %cst_41 : f32 to vector<1x128xf32>
    %121 = arith.subf %119, %120 : vector<1x128xf32>
    %122 = vector.extract_strided_slice %114 {offsets = [0, 384], sizes = [1, 128], strides = [1, 1]} : vector<1x512xf32> to vector<1x128xf32>
    %123 = arith.mulf %116, %79 : vector<1x128xf32>
    %124 = arith.mulf %115, %121 : vector<1x128xf32>
    %125 = arith.addf %123, %124 : vector<1x128xf32>
    %126 = math.tanh %125 : vector<1x128xf32>
    %127 = arith.mulf %122, %126 : vector<1x128xf32>
    %128 = arith.truncf %127 : vector<1x128xf32> to vector<1x128xbf16>
    %cst_42 = arith.constant dense<0.000000e+00> : vector<1x512xf32>
    %129 = tpu.matmul %128, %7, %cst_42 {dimension_numbers = #tpu.dot_dimension_numbers<[1], [0], [0], [1], [0, 0, 1, 1], [], []>} : vector<1x128xbf16>, vector<128x512xbf16>, vector<1x512xf32> -> vector<1x512xf32>
    %130 = arith.truncf %105 : vector<1x128xf32> to vector<1x128xbf16>
    %cst_43 = arith.constant dense<0.000000e+00> : vector<1x512xf32>
    %131 = tpu.matmul %130, %8, %cst_43 {dimension_numbers = #tpu.dot_dimension_numbers<[1], [0], [0], [1], [0, 0, 1, 1], [], []>} : vector<1x128xbf16>, vector<128x512xbf16>, vector<1x512xf32> -> vector<1x512xf32>
    %132 = arith.addf %129, %131 : vector<1x512xf32>
    %133 = arith.addf %132, %9 : vector<1x512xf32>
    %134 = arith.negf %133 : vector<1x512xf32>
    %135 = math.exp %134 : vector<1x512xf32>
    %cst_44 = arith.constant 1.000000e+00 : f32
    %136 = vector.broadcast %cst_44 : f32 to vector<1x512xf32>
    %137 = arith.addf %136, %135 : vector<1x512xf32>
    %138 = arith.divf %136, %137 : vector<1x512xf32>
    %139 = vector.extract_strided_slice %138 {offsets = [0, 0], sizes = [1, 128], strides = [1, 1]} : vector<1x512xf32> to vector<1x128xf32>
    %140 = vector.extract_strided_slice %138 {offsets = [0, 128], sizes = [1, 128], strides = [1, 1]} : vector<1x512xf32> to vector<1x128xf32>
    %141 = vector.extract_strided_slice %138 {offsets = [0, 256], sizes = [1, 128], strides = [1, 1]} : vector<1x512xf32> to vector<1x128xf32>
    %cst_45 = arith.constant 2.000000e+00 : f32
    %142 = vector.broadcast %cst_45 : f32 to vector<1x128xf32>
    %143 = arith.mulf %142, %141 : vector<1x128xf32>
    %cst_46 = arith.constant 1.000000e+00 : f32
    %144 = vector.broadcast %cst_46 : f32 to vector<1x128xf32>
    %145 = arith.subf %143, %144 : vector<1x128xf32>
    %146 = vector.extract_strided_slice %138 {offsets = [0, 384], sizes = [1, 128], strides = [1, 1]} : vector<1x512xf32> to vector<1x128xf32>
    %147 = arith.mulf %140, %103 : vector<1x128xf32>
    %148 = arith.mulf %139, %145 : vector<1x128xf32>
    %149 = arith.addf %147, %148 : vector<1x128xf32>
    %150 = math.tanh %149 : vector<1x128xf32>
    %151 = arith.mulf %146, %150 : vector<1x128xf32>
    %152 = vector.extract_strided_slice %5 {offsets = [3, 0], sizes = [1, 512], strides = [1, 1]} : vector<8x512xf32> to vector<1x512xf32>
    %153 = arith.truncf %127 : vector<1x128xf32> to vector<1x128xbf16>
    %cst_47 = arith.constant dense<0.000000e+00> : vector<1x512xf32>
    %154 = tpu.matmul %153, %6, %cst_47 {dimension_numbers = #tpu.dot_dimension_numbers<[1], [0], [0], [1], [0, 0, 1, 1], [], []>} : vector<1x128xbf16>, vector<128x512xbf16>, vector<1x512xf32> -> vector<1x512xf32>
    %155 = arith.addf %152, %154 : vector<1x512xf32>
    %156 = arith.negf %155 : vector<1x512xf32>
    %157 = math.exp %156 : vector<1x512xf32>
    %cst_48 = arith.constant 1.000000e+00 : f32
    %158 = vector.broadcast %cst_48 : f32 to vector<1x512xf32>
    %159 = arith.addf %158, %157 : vector<1x512xf32>
    %160 = arith.divf %158, %159 : vector<1x512xf32>
    %161 = vector.extract_strided_slice %160 {offsets = [0, 0], sizes = [1, 128], strides = [1, 1]} : vector<1x512xf32> to vector<1x128xf32>
    %162 = vector.extract_strided_slice %160 {offsets = [0, 128], sizes = [1, 128], strides = [1, 1]} : vector<1x512xf32> to vector<1x128xf32>
    %163 = vector.extract_strided_slice %160 {offsets = [0, 256], sizes = [1, 128], strides = [1, 1]} : vector<1x512xf32> to vector<1x128xf32>
    %cst_49 = arith.constant 2.000000e+00 : f32
    %164 = vector.broadcast %cst_49 : f32 to vector<1x128xf32>
    %165 = arith.mulf %164, %163 : vector<1x128xf32>
    %cst_50 = arith.constant 1.000000e+00 : f32
    %166 = vector.broadcast %cst_50 : f32 to vector<1x128xf32>
    %167 = arith.subf %165, %166 : vector<1x128xf32>
    %168 = vector.extract_strided_slice %160 {offsets = [0, 384], sizes = [1, 128], strides = [1, 1]} : vector<1x512xf32> to vector<1x128xf32>
    %169 = arith.mulf %162, %125 : vector<1x128xf32>
    %170 = arith.mulf %161, %167 : vector<1x128xf32>
    %171 = arith.addf %169, %170 : vector<1x128xf32>
    %172 = math.tanh %171 : vector<1x128xf32>
    %173 = arith.mulf %168, %172 : vector<1x128xf32>
    %174 = arith.truncf %173 : vector<1x128xf32> to vector<1x128xbf16>
    %cst_51 = arith.constant dense<0.000000e+00> : vector<1x512xf32>
    %175 = tpu.matmul %174, %7, %cst_51 {dimension_numbers = #tpu.dot_dimension_numbers<[1], [0], [0], [1], [0, 0, 1, 1], [], []>} : vector<1x128xbf16>, vector<128x512xbf16>, vector<1x512xf32> -> vector<1x512xf32>
    %176 = arith.truncf %151 : vector<1x128xf32> to vector<1x128xbf16>
    %cst_52 = arith.constant dense<0.000000e+00> : vector<1x512xf32>
    %177 = tpu.matmul %176, %8, %cst_52 {dimension_numbers = #tpu.dot_dimension_numbers<[1], [0], [0], [1], [0, 0, 1, 1], [], []>} : vector<1x128xbf16>, vector<128x512xbf16>, vector<1x512xf32> -> vector<1x512xf32>
    %178 = arith.addf %175, %177 : vector<1x512xf32>
    %179 = arith.addf %178, %9 : vector<1x512xf32>
    %180 = arith.negf %179 : vector<1x512xf32>
    %181 = math.exp %180 : vector<1x512xf32>
    %cst_53 = arith.constant 1.000000e+00 : f32
    %182 = vector.broadcast %cst_53 : f32 to vector<1x512xf32>
    %183 = arith.addf %182, %181 : vector<1x512xf32>
    %184 = arith.divf %182, %183 : vector<1x512xf32>
    %185 = vector.extract_strided_slice %184 {offsets = [0, 0], sizes = [1, 128], strides = [1, 1]} : vector<1x512xf32> to vector<1x128xf32>
    %186 = vector.extract_strided_slice %184 {offsets = [0, 128], sizes = [1, 128], strides = [1, 1]} : vector<1x512xf32> to vector<1x128xf32>
    %187 = vector.extract_strided_slice %184 {offsets = [0, 256], sizes = [1, 128], strides = [1, 1]} : vector<1x512xf32> to vector<1x128xf32>
    %cst_54 = arith.constant 2.000000e+00 : f32
    %188 = vector.broadcast %cst_54 : f32 to vector<1x128xf32>
    %189 = arith.mulf %188, %187 : vector<1x128xf32>
    %cst_55 = arith.constant 1.000000e+00 : f32
    %190 = vector.broadcast %cst_55 : f32 to vector<1x128xf32>
    %191 = arith.subf %189, %190 : vector<1x128xf32>
    %192 = vector.extract_strided_slice %184 {offsets = [0, 384], sizes = [1, 128], strides = [1, 1]} : vector<1x512xf32> to vector<1x128xf32>
    %193 = arith.mulf %186, %149 : vector<1x128xf32>
    %194 = arith.mulf %185, %191 : vector<1x128xf32>
    %195 = arith.addf %193, %194 : vector<1x128xf32>
    %196 = math.tanh %195 : vector<1x128xf32>
    %197 = arith.mulf %192, %196 : vector<1x128xf32>
    %198 = vector.extract_strided_slice %5 {offsets = [4, 0], sizes = [1, 512], strides = [1, 1]} : vector<8x512xf32> to vector<1x512xf32>
    %199 = arith.truncf %173 : vector<1x128xf32> to vector<1x128xbf16>
    %cst_56 = arith.constant dense<0.000000e+00> : vector<1x512xf32>
    %200 = tpu.matmul %199, %6, %cst_56 {dimension_numbers = #tpu.dot_dimension_numbers<[1], [0], [0], [1], [0, 0, 1, 1], [], []>} : vector<1x128xbf16>, vector<128x512xbf16>, vector<1x512xf32> -> vector<1x512xf32>
    %201 = arith.addf %198, %200 : vector<1x512xf32>
    %202 = arith.negf %201 : vector<1x512xf32>
    %203 = math.exp %202 : vector<1x512xf32>
    %cst_57 = arith.constant 1.000000e+00 : f32
    %204 = vector.broadcast %cst_57 : f32 to vector<1x512xf32>
    %205 = arith.addf %204, %203 : vector<1x512xf32>
    %206 = arith.divf %204, %205 : vector<1x512xf32>
    %207 = vector.extract_strided_slice %206 {offsets = [0, 0], sizes = [1, 128], strides = [1, 1]} : vector<1x512xf32> to vector<1x128xf32>
    %208 = vector.extract_strided_slice %206 {offsets = [0, 128], sizes = [1, 128], strides = [1, 1]} : vector<1x512xf32> to vector<1x128xf32>
    %209 = vector.extract_strided_slice %206 {offsets = [0, 256], sizes = [1, 128], strides = [1, 1]} : vector<1x512xf32> to vector<1x128xf32>
    %cst_58 = arith.constant 2.000000e+00 : f32
    %210 = vector.broadcast %cst_58 : f32 to vector<1x128xf32>
    %211 = arith.mulf %210, %209 : vector<1x128xf32>
    %cst_59 = arith.constant 1.000000e+00 : f32
    %212 = vector.broadcast %cst_59 : f32 to vector<1x128xf32>
    %213 = arith.subf %211, %212 : vector<1x128xf32>
    %214 = vector.extract_strided_slice %206 {offsets = [0, 384], sizes = [1, 128], strides = [1, 1]} : vector<1x512xf32> to vector<1x128xf32>
    %215 = arith.mulf %208, %171 : vector<1x128xf32>
    %216 = arith.mulf %207, %213 : vector<1x128xf32>
    %217 = arith.addf %215, %216 : vector<1x128xf32>
    %218 = math.tanh %217 : vector<1x128xf32>
    %219 = arith.mulf %214, %218 : vector<1x128xf32>
    %220 = arith.truncf %219 : vector<1x128xf32> to vector<1x128xbf16>
    %cst_60 = arith.constant dense<0.000000e+00> : vector<1x512xf32>
    %221 = tpu.matmul %220, %7, %cst_60 {dimension_numbers = #tpu.dot_dimension_numbers<[1], [0], [0], [1], [0, 0, 1, 1], [], []>} : vector<1x128xbf16>, vector<128x512xbf16>, vector<1x512xf32> -> vector<1x512xf32>
    %222 = arith.truncf %197 : vector<1x128xf32> to vector<1x128xbf16>
    %cst_61 = arith.constant dense<0.000000e+00> : vector<1x512xf32>
    %223 = tpu.matmul %222, %8, %cst_61 {dimension_numbers = #tpu.dot_dimension_numbers<[1], [0], [0], [1], [0, 0, 1, 1], [], []>} : vector<1x128xbf16>, vector<128x512xbf16>, vector<1x512xf32> -> vector<1x512xf32>
    %224 = arith.addf %221, %223 : vector<1x512xf32>
    %225 = arith.addf %224, %9 : vector<1x512xf32>
    %226 = arith.negf %225 : vector<1x512xf32>
    %227 = math.exp %226 : vector<1x512xf32>
    %cst_62 = arith.constant 1.000000e+00 : f32
    %228 = vector.broadcast %cst_62 : f32 to vector<1x512xf32>
    %229 = arith.addf %228, %227 : vector<1x512xf32>
    %230 = arith.divf %228, %229 : vector<1x512xf32>
    %231 = vector.extract_strided_slice %230 {offsets = [0, 0], sizes = [1, 128], strides = [1, 1]} : vector<1x512xf32> to vector<1x128xf32>
    %232 = vector.extract_strided_slice %230 {offsets = [0, 128], sizes = [1, 128], strides = [1, 1]} : vector<1x512xf32> to vector<1x128xf32>
    %233 = vector.extract_strided_slice %230 {offsets = [0, 256], sizes = [1, 128], strides = [1, 1]} : vector<1x512xf32> to vector<1x128xf32>
    %cst_63 = arith.constant 2.000000e+00 : f32
    %234 = vector.broadcast %cst_63 : f32 to vector<1x128xf32>
    %235 = arith.mulf %234, %233 : vector<1x128xf32>
    %cst_64 = arith.constant 1.000000e+00 : f32
    %236 = vector.broadcast %cst_64 : f32 to vector<1x128xf32>
    %237 = arith.subf %235, %236 : vector<1x128xf32>
    %238 = vector.extract_strided_slice %230 {offsets = [0, 384], sizes = [1, 128], strides = [1, 1]} : vector<1x512xf32> to vector<1x128xf32>
    %239 = arith.mulf %232, %195 : vector<1x128xf32>
    %240 = arith.mulf %231, %237 : vector<1x128xf32>
    %241 = arith.addf %239, %240 : vector<1x128xf32>
    %242 = math.tanh %241 : vector<1x128xf32>
    %243 = arith.mulf %238, %242 : vector<1x128xf32>
    %244 = vector.extract_strided_slice %5 {offsets = [5, 0], sizes = [1, 512], strides = [1, 1]} : vector<8x512xf32> to vector<1x512xf32>
    %245 = arith.truncf %219 : vector<1x128xf32> to vector<1x128xbf16>
    %cst_65 = arith.constant dense<0.000000e+00> : vector<1x512xf32>
    %246 = tpu.matmul %245, %6, %cst_65 {dimension_numbers = #tpu.dot_dimension_numbers<[1], [0], [0], [1], [0, 0, 1, 1], [], []>} : vector<1x128xbf16>, vector<128x512xbf16>, vector<1x512xf32> -> vector<1x512xf32>
    %247 = arith.addf %244, %246 : vector<1x512xf32>
    %248 = arith.negf %247 : vector<1x512xf32>
    %249 = math.exp %248 : vector<1x512xf32>
    %cst_66 = arith.constant 1.000000e+00 : f32
    %250 = vector.broadcast %cst_66 : f32 to vector<1x512xf32>
    %251 = arith.addf %250, %249 : vector<1x512xf32>
    %252 = arith.divf %250, %251 : vector<1x512xf32>
    %253 = vector.extract_strided_slice %252 {offsets = [0, 0], sizes = [1, 128], strides = [1, 1]} : vector<1x512xf32> to vector<1x128xf32>
    %254 = vector.extract_strided_slice %252 {offsets = [0, 128], sizes = [1, 128], strides = [1, 1]} : vector<1x512xf32> to vector<1x128xf32>
    %255 = vector.extract_strided_slice %252 {offsets = [0, 256], sizes = [1, 128], strides = [1, 1]} : vector<1x512xf32> to vector<1x128xf32>
    %cst_67 = arith.constant 2.000000e+00 : f32
    %256 = vector.broadcast %cst_67 : f32 to vector<1x128xf32>
    %257 = arith.mulf %256, %255 : vector<1x128xf32>
    %cst_68 = arith.constant 1.000000e+00 : f32
    %258 = vector.broadcast %cst_68 : f32 to vector<1x128xf32>
    %259 = arith.subf %257, %258 : vector<1x128xf32>
    %260 = vector.extract_strided_slice %252 {offsets = [0, 384], sizes = [1, 128], strides = [1, 1]} : vector<1x512xf32> to vector<1x128xf32>
    %261 = arith.mulf %254, %217 : vector<1x128xf32>
    %262 = arith.mulf %253, %259 : vector<1x128xf32>
    %263 = arith.addf %261, %262 : vector<1x128xf32>
    %264 = math.tanh %263 : vector<1x128xf32>
    %265 = arith.mulf %260, %264 : vector<1x128xf32>
    %266 = arith.truncf %265 : vector<1x128xf32> to vector<1x128xbf16>
    %cst_69 = arith.constant dense<0.000000e+00> : vector<1x512xf32>
    %267 = tpu.matmul %266, %7, %cst_69 {dimension_numbers = #tpu.dot_dimension_numbers<[1], [0], [0], [1], [0, 0, 1, 1], [], []>} : vector<1x128xbf16>, vector<128x512xbf16>, vector<1x512xf32> -> vector<1x512xf32>
    %268 = arith.truncf %243 : vector<1x128xf32> to vector<1x128xbf16>
    %cst_70 = arith.constant dense<0.000000e+00> : vector<1x512xf32>
    %269 = tpu.matmul %268, %8, %cst_70 {dimension_numbers = #tpu.dot_dimension_numbers<[1], [0], [0], [1], [0, 0, 1, 1], [], []>} : vector<1x128xbf16>, vector<128x512xbf16>, vector<1x512xf32> -> vector<1x512xf32>
    %270 = arith.addf %267, %269 : vector<1x512xf32>
    %271 = arith.addf %270, %9 : vector<1x512xf32>
    %272 = arith.negf %271 : vector<1x512xf32>
    %273 = math.exp %272 : vector<1x512xf32>
    %cst_71 = arith.constant 1.000000e+00 : f32
    %274 = vector.broadcast %cst_71 : f32 to vector<1x512xf32>
    %275 = arith.addf %274, %273 : vector<1x512xf32>
    %276 = arith.divf %274, %275 : vector<1x512xf32>
    %277 = vector.extract_strided_slice %276 {offsets = [0, 0], sizes = [1, 128], strides = [1, 1]} : vector<1x512xf32> to vector<1x128xf32>
    %278 = vector.extract_strided_slice %276 {offsets = [0, 128], sizes = [1, 128], strides = [1, 1]} : vector<1x512xf32> to vector<1x128xf32>
    %279 = vector.extract_strided_slice %276 {offsets = [0, 256], sizes = [1, 128], strides = [1, 1]} : vector<1x512xf32> to vector<1x128xf32>
    %cst_72 = arith.constant 2.000000e+00 : f32
    %280 = vector.broadcast %cst_72 : f32 to vector<1x128xf32>
    %281 = arith.mulf %280, %279 : vector<1x128xf32>
    %cst_73 = arith.constant 1.000000e+00 : f32
    %282 = vector.broadcast %cst_73 : f32 to vector<1x128xf32>
    %283 = arith.subf %281, %282 : vector<1x128xf32>
    %284 = vector.extract_strided_slice %276 {offsets = [0, 384], sizes = [1, 128], strides = [1, 1]} : vector<1x512xf32> to vector<1x128xf32>
    %285 = arith.mulf %278, %241 : vector<1x128xf32>
    %286 = arith.mulf %277, %283 : vector<1x128xf32>
    %287 = arith.addf %285, %286 : vector<1x128xf32>
    %288 = math.tanh %287 : vector<1x128xf32>
    %289 = arith.mulf %284, %288 : vector<1x128xf32>
    %290 = vector.extract_strided_slice %5 {offsets = [6, 0], sizes = [1, 512], strides = [1, 1]} : vector<8x512xf32> to vector<1x512xf32>
    %291 = arith.truncf %265 : vector<1x128xf32> to vector<1x128xbf16>
    %cst_74 = arith.constant dense<0.000000e+00> : vector<1x512xf32>
    %292 = tpu.matmul %291, %6, %cst_74 {dimension_numbers = #tpu.dot_dimension_numbers<[1], [0], [0], [1], [0, 0, 1, 1], [], []>} : vector<1x128xbf16>, vector<128x512xbf16>, vector<1x512xf32> -> vector<1x512xf32>
    %293 = arith.addf %290, %292 : vector<1x512xf32>
    %294 = arith.negf %293 : vector<1x512xf32>
    %295 = math.exp %294 : vector<1x512xf32>
    %cst_75 = arith.constant 1.000000e+00 : f32
    %296 = vector.broadcast %cst_75 : f32 to vector<1x512xf32>
    %297 = arith.addf %296, %295 : vector<1x512xf32>
    %298 = arith.divf %296, %297 : vector<1x512xf32>
    %299 = vector.extract_strided_slice %298 {offsets = [0, 0], sizes = [1, 128], strides = [1, 1]} : vector<1x512xf32> to vector<1x128xf32>
    %300 = vector.extract_strided_slice %298 {offsets = [0, 128], sizes = [1, 128], strides = [1, 1]} : vector<1x512xf32> to vector<1x128xf32>
    %301 = vector.extract_strided_slice %298 {offsets = [0, 256], sizes = [1, 128], strides = [1, 1]} : vector<1x512xf32> to vector<1x128xf32>
    %cst_76 = arith.constant 2.000000e+00 : f32
    %302 = vector.broadcast %cst_76 : f32 to vector<1x128xf32>
    %303 = arith.mulf %302, %301 : vector<1x128xf32>
    %cst_77 = arith.constant 1.000000e+00 : f32
    %304 = vector.broadcast %cst_77 : f32 to vector<1x128xf32>
    %305 = arith.subf %303, %304 : vector<1x128xf32>
    %306 = vector.extract_strided_slice %298 {offsets = [0, 384], sizes = [1, 128], strides = [1, 1]} : vector<1x512xf32> to vector<1x128xf32>
    %307 = arith.mulf %300, %263 : vector<1x128xf32>
    %308 = arith.mulf %299, %305 : vector<1x128xf32>
    %309 = arith.addf %307, %308 : vector<1x128xf32>
    %310 = math.tanh %309 : vector<1x128xf32>
    %311 = arith.mulf %306, %310 : vector<1x128xf32>
    %312 = arith.truncf %311 : vector<1x128xf32> to vector<1x128xbf16>
    %cst_78 = arith.constant dense<0.000000e+00> : vector<1x512xf32>
    %313 = tpu.matmul %312, %7, %cst_78 {dimension_numbers = #tpu.dot_dimension_numbers<[1], [0], [0], [1], [0, 0, 1, 1], [], []>} : vector<1x128xbf16>, vector<128x512xbf16>, vector<1x512xf32> -> vector<1x512xf32>
    %314 = arith.truncf %289 : vector<1x128xf32> to vector<1x128xbf16>
    %cst_79 = arith.constant dense<0.000000e+00> : vector<1x512xf32>
    %315 = tpu.matmul %314, %8, %cst_79 {dimension_numbers = #tpu.dot_dimension_numbers<[1], [0], [0], [1], [0, 0, 1, 1], [], []>} : vector<1x128xbf16>, vector<128x512xbf16>, vector<1x512xf32> -> vector<1x512xf32>
    %316 = arith.addf %313, %315 : vector<1x512xf32>
    %317 = arith.addf %316, %9 : vector<1x512xf32>
    %318 = arith.negf %317 : vector<1x512xf32>
    %319 = math.exp %318 : vector<1x512xf32>
    %cst_80 = arith.constant 1.000000e+00 : f32
    %320 = vector.broadcast %cst_80 : f32 to vector<1x512xf32>
    %321 = arith.addf %320, %319 : vector<1x512xf32>
    %322 = arith.divf %320, %321 : vector<1x512xf32>
    %323 = vector.extract_strided_slice %322 {offsets = [0, 0], sizes = [1, 128], strides = [1, 1]} : vector<1x512xf32> to vector<1x128xf32>
    %324 = vector.extract_strided_slice %322 {offsets = [0, 128], sizes = [1, 128], strides = [1, 1]} : vector<1x512xf32> to vector<1x128xf32>
    %325 = vector.extract_strided_slice %322 {offsets = [0, 256], sizes = [1, 128], strides = [1, 1]} : vector<1x512xf32> to vector<1x128xf32>
    %cst_81 = arith.constant 2.000000e+00 : f32
    %326 = vector.broadcast %cst_81 : f32 to vector<1x128xf32>
    %327 = arith.mulf %326, %325 : vector<1x128xf32>
    %cst_82 = arith.constant 1.000000e+00 : f32
    %328 = vector.broadcast %cst_82 : f32 to vector<1x128xf32>
    %329 = arith.subf %327, %328 : vector<1x128xf32>
    %330 = vector.extract_strided_slice %322 {offsets = [0, 384], sizes = [1, 128], strides = [1, 1]} : vector<1x512xf32> to vector<1x128xf32>
    %331 = arith.mulf %324, %287 : vector<1x128xf32>
    %332 = arith.mulf %323, %329 : vector<1x128xf32>
    %333 = arith.addf %331, %332 : vector<1x128xf32>
    %334 = math.tanh %333 : vector<1x128xf32>
    %335 = arith.mulf %330, %334 : vector<1x128xf32>
    %336 = vector.extract_strided_slice %5 {offsets = [7, 0], sizes = [1, 512], strides = [1, 1]} : vector<8x512xf32> to vector<1x512xf32>
    %337 = arith.truncf %311 : vector<1x128xf32> to vector<1x128xbf16>
    %cst_83 = arith.constant dense<0.000000e+00> : vector<1x512xf32>
    %338 = tpu.matmul %337, %6, %cst_83 {dimension_numbers = #tpu.dot_dimension_numbers<[1], [0], [0], [1], [0, 0, 1, 1], [], []>} : vector<1x128xbf16>, vector<128x512xbf16>, vector<1x512xf32> -> vector<1x512xf32>
    %339 = arith.addf %336, %338 : vector<1x512xf32>
    %340 = arith.negf %339 : vector<1x512xf32>
    %341 = math.exp %340 : vector<1x512xf32>
    %cst_84 = arith.constant 1.000000e+00 : f32
    %342 = vector.broadcast %cst_84 : f32 to vector<1x512xf32>
    %343 = arith.addf %342, %341 : vector<1x512xf32>
    %344 = arith.divf %342, %343 : vector<1x512xf32>
    %345 = vector.extract_strided_slice %344 {offsets = [0, 0], sizes = [1, 128], strides = [1, 1]} : vector<1x512xf32> to vector<1x128xf32>
    %346 = vector.extract_strided_slice %344 {offsets = [0, 128], sizes = [1, 128], strides = [1, 1]} : vector<1x512xf32> to vector<1x128xf32>
    %347 = vector.extract_strided_slice %344 {offsets = [0, 256], sizes = [1, 128], strides = [1, 1]} : vector<1x512xf32> to vector<1x128xf32>
    %cst_85 = arith.constant 2.000000e+00 : f32
    %348 = vector.broadcast %cst_85 : f32 to vector<1x128xf32>
    %349 = arith.mulf %348, %347 : vector<1x128xf32>
    %cst_86 = arith.constant 1.000000e+00 : f32
    %350 = vector.broadcast %cst_86 : f32 to vector<1x128xf32>
    %351 = arith.subf %349, %350 : vector<1x128xf32>
    %352 = vector.extract_strided_slice %344 {offsets = [0, 384], sizes = [1, 128], strides = [1, 1]} : vector<1x512xf32> to vector<1x128xf32>
    %353 = arith.mulf %346, %309 : vector<1x128xf32>
    %354 = arith.mulf %345, %351 : vector<1x128xf32>
    %355 = arith.addf %353, %354 : vector<1x128xf32>
    %356 = math.tanh %355 : vector<1x128xf32>
    %357 = arith.mulf %352, %356 : vector<1x128xf32>
    %358 = arith.truncf %357 : vector<1x128xf32> to vector<1x128xbf16>
    %cst_87 = arith.constant dense<0.000000e+00> : vector<1x512xf32>
    %359 = tpu.matmul %358, %7, %cst_87 {dimension_numbers = #tpu.dot_dimension_numbers<[1], [0], [0], [1], [0, 0, 1, 1], [], []>} : vector<1x128xbf16>, vector<128x512xbf16>, vector<1x512xf32> -> vector<1x512xf32>
    %360 = arith.truncf %335 : vector<1x128xf32> to vector<1x128xbf16>
    %cst_88 = arith.constant dense<0.000000e+00> : vector<1x512xf32>
    %361 = tpu.matmul %360, %8, %cst_88 {dimension_numbers = #tpu.dot_dimension_numbers<[1], [0], [0], [1], [0, 0, 1, 1], [], []>} : vector<1x128xbf16>, vector<128x512xbf16>, vector<1x512xf32> -> vector<1x512xf32>
    %362 = arith.addf %359, %361 : vector<1x512xf32>
    %363 = arith.addf %362, %9 : vector<1x512xf32>
    %364 = arith.negf %363 : vector<1x512xf32>
    %365 = math.exp %364 : vector<1x512xf32>
    %cst_89 = arith.constant 1.000000e+00 : f32
    %366 = vector.broadcast %cst_89 : f32 to vector<1x512xf32>
    %367 = arith.addf %366, %365 : vector<1x512xf32>
    %368 = arith.divf %366, %367 : vector<1x512xf32>
    %369 = vector.extract_strided_slice %368 {offsets = [0, 0], sizes = [1, 128], strides = [1, 1]} : vector<1x512xf32> to vector<1x128xf32>
    %370 = vector.extract_strided_slice %368 {offsets = [0, 128], sizes = [1, 128], strides = [1, 1]} : vector<1x512xf32> to vector<1x128xf32>
    %371 = vector.extract_strided_slice %368 {offsets = [0, 256], sizes = [1, 128], strides = [1, 1]} : vector<1x512xf32> to vector<1x128xf32>
    %cst_90 = arith.constant 2.000000e+00 : f32
    %372 = vector.broadcast %cst_90 : f32 to vector<1x128xf32>
    %373 = arith.mulf %372, %371 : vector<1x128xf32>
    %cst_91 = arith.constant 1.000000e+00 : f32
    %374 = vector.broadcast %cst_91 : f32 to vector<1x128xf32>
    %375 = arith.subf %373, %374 : vector<1x128xf32>
    %376 = vector.extract_strided_slice %368 {offsets = [0, 384], sizes = [1, 128], strides = [1, 1]} : vector<1x512xf32> to vector<1x128xf32>
    %377 = arith.mulf %370, %333 : vector<1x128xf32>
    %378 = arith.mulf %369, %375 : vector<1x128xf32>
    %379 = arith.addf %377, %378 : vector<1x128xf32>
    %380 = math.tanh %379 : vector<1x128xf32>
    %381 = arith.mulf %376, %380 : vector<1x128xf32>
    %382 = tpu.concatenate %59, %105, %151, %197, %243, %289, %335, %381 in 0 : vector<1x128xf32>, vector<1x128xf32>, vector<1x128xf32>, vector<1x128xf32>, vector<1x128xf32>, vector<1x128xf32>, vector<1x128xf32>, vector<1x128xf32> -> vector<8x128xf32>
    %383 = arith.truncf %382 : vector<8x128xf32> to vector<8x128xbf16>
    %c0_92 = arith.constant 0 : index
    %c0_93 = arith.constant 0 : index
    %384 = vector.load %arg9[%c0_92, %c0_93] : memref<128x128xbf16, #tpu.memory_space<vmem>>, vector<128x128xbf16>
    %cst_94 = arith.constant dense<0.000000e+00> : vector<8x128xf32>
    %385 = tpu.matmul %383, %384, %cst_94 {dimension_numbers = #tpu.dot_dimension_numbers<[1], [0], [0], [1], [0, 0, 1, 1], [], []>} : vector<8x128xbf16>, vector<128x128xbf16>, vector<8x128xf32> -> vector<8x128xf32>
    %c0_95 = arith.constant 0 : index
    %c0_96 = arith.constant 0 : index
    %386 = vector.load %arg10[%c0_95, %c0_96] : memref<1x128xf32, #tpu.memory_space<vmem>>, vector<1x128xf32>
    %387 = vector.broadcast %386 : vector<1x128xf32> to vector<8x128xf32>
    %388 = arith.addf %385, %387 : vector<8x128xf32>
    %389 = arith.negf %388 : vector<8x128xf32>
    %390 = math.exp %389 : vector<8x128xf32>
    %cst_97 = arith.constant 1.000000e+00 : f32
    %391 = vector.broadcast %cst_97 : f32 to vector<8x128xf32>
    %392 = arith.addf %391, %390 : vector<8x128xf32>
    %393 = arith.divf %391, %392 : vector<8x128xf32>
    %c0_98 = arith.constant 0 : index
    %c0_99 = arith.constant 0 : index
    %394 = vector.load %arg11[%c0_98, %c0_99] : memref<8x128xf32, #tpu.memory_space<vmem>>, vector<8x128xf32>
    tpu.vector_store %arg11[%c0_98, %c0_99], %393 {strides = array<i32>} : memref<8x128xf32, #tpu.memory_space<vmem>>, vector<8x128xf32>,
    %395 = tpu.concatenate %357, %381 in 0 : vector<1x128xf32>, vector<1x128xf32> -> vector<2x128xf32>
    %c0_100 = arith.constant 0 : index
    %c0_101 = arith.constant 0 : index
    %396 = vector.load %arg12[%c0_100, %c0_101] : memref<2x128xf32, #tpu.memory_space<vmem>>, vector<2x128xf32>
    tpu.vector_store %arg12[%c0_100, %c0_101], %395 {strides = array<i32>} : memref<2x128xf32, #tpu.memory_space<vmem>>, vector<2x128xf32>,
    %397 = tpu.concatenate %355, %379 in 0 : vector<1x128xf32>, vector<1x128xf32> -> vector<2x128xf32>
    %c0_102 = arith.constant 0 : index
    %c0_103 = arith.constant 0 : index
    %398 = vector.load %arg13[%c0_102, %c0_103] : memref<2x128xf32, #tpu.memory_space<vmem>>, vector<2x128xf32>
    tpu.vector_store %arg13[%c0_102, %c0_103], %397 {strides = array<i32>} : memref<2x128xf32, #tpu.memory_space<vmem>>, vector<2x128xf32>,
    return
  }
}

</mosaic_0001>

<bundles_post_ra>
// kernel: tpu_custom_call.1
= control target key start
LH: loop header
LB: loop body
LE: loop exit
PB: predicated region body
PF: predicated region fallthrough
CT: control target
= control target key end

     0   :  { %19 = vsyncpa [#allocation3], 0  ;;  %s7643_s0 = inlined_call_operand.hbm [shape: bf16[8,128], index: 0, kind: input, shape index: {}]   ;;  %s7644_s1 = inlined_call_operand.hbm [shape: f32[2,128], index: 1, kind: input, shape index: {}]   ;;  %s7645_s2 = inlined_call_operand.hbm [shape: f32[2,128], index: 2, kind: input, shape index: {}]   ;;  %s7646_s3 = inlined_call_operand.hbm [shape: bf16[128,512], index: 3, kind: input, shape index: {}]   ;;  %s7647_s4 = inlined_call_operand.hbm [shape: bf16[128,512], index: 4, kind: input, shape index: {}]   ;;  %s7648_s5 = inlined_call_operand.vmem [shape: f32[1,512], index: 5, kind: input, shape index: {}]   ;;  %s7649_s6 = inlined_call_operand.hbm [shape: bf16[128,512], index: 6, kind: input, shape index: {}]   ;;  %s7650_s7 = inlined_call_operand.hbm [shape: bf16[128,512], index: 7, kind: input, shape index: {}]   ;;  %s7651_s8 = inlined_call_operand.hbm [shape: f32[1,512], index: 8, kind: input, shape index: {}]   ;;  %s7652_s9 = inlined_call_operand.hbm [shape: bf16[128,128], index: 9, kind: input, shape index: {}]   ;;  %s7653_s10 = inlined_call_operand.vmem [shape: f32[1,128], index: 10, kind: input, shape index: {}]   ;;  %s7654_s11 = inlined_call_operand.hbm [shape: f32[8,128], index: 11, kind: output, shape index: {0}]   ;;  %s7655_s12 = inlined_call_operand.hbm [shape: f32[2,128], index: 12, kind: output, shape index: {1}]   ;;  %s7656_s13 = inlined_call_operand.hbm [shape: f32[2,128], index: 13, kind: output, shape index: {2}]  }
   0x1   :  { %20 = vsyncpa [#allocation6], 0 }
   0x2   :  { %21 = vsyncpa [#allocation9], 0 }
   0x3   :  { %22 = vsyncpa [#allocation12], 0 }
   0x4   :  { %23 = vsyncpa [#allocation15], 0 }
   0x5   :  { %24 = vsyncpa [#allocation4], 0  ;;  %s42_s27 = sshll.u32 %s7644_s1, 4  ;;  %s43_s27 = int_to_ptr.hbm [resolvable:$true] %s42_s27 }
   0x6   :  { %25 = vsyncpa [#allocation19], 0  ;;  %s5386_s28 = smov [#allocation5]   ;;  %s63_s15 = sshll.u32 %s7646_s3, 4  ;;  %s64_s15 = int_to_ptr.hbm [resolvable:$true] %s63_s15 }
   0x7   :  { %s44_s29 = sshll.u32 %s5386_s28, 4  ;;  %s5387_s16 = smov [#allocation8]   ;;  %s45_s29 = int_to_ptr.vmem [resolvable:$true] %s44_s29 }
   0x8   :  { %47 = dma.hbm_to_vmem [thread:$0]  %s43_s27, 32, %s45_s29, [#allocation6]  }
   0x9   :  { %s65_s17 = sshll.u32 %s5387_s16, 4  ;;  %s5388_s18 = smov 256   ;;  %s66_s17 = int_to_ptr.vmem [resolvable:$true] %s65_s17 }
   0xa   :  { %s5389_s19 = smov 16   ;;  %s91_s21 = sshll.u32 %s7649_s6, 4  ;;  %s92_s21 = int_to_ptr.hbm [resolvable:$true] %s91_s21 }
   0xb   :  { %71 = dma.hbm_to_vmem [thread:$0]  %s64_s15, 4096, %s66_s17, [#allocation9], %s5388_s18, %s5388_s18, %s5389_s19  }
   0xc   :  { %s5390_s22 = smov [#allocation11]   ;;  %s118_s25 = sshll.u32 %s7651_s8, 4  ;;  %s119_s25 = int_to_ptr.hbm [resolvable:$true] %s118_s25 }
   0xd   :  { %s93_s23 = sshll.u32 %s5390_s22, 4  ;;  %s5391_s26 = smov [#allocation14]   ;;  %s94_s23 = int_to_ptr.vmem [resolvable:$true] %s93_s23 }
   0xe   :  { %99 = dma.hbm_to_vmem [thread:$0]  %s92_s21, 4096, %s94_s23, [#allocation12], %s5388_s18, %s5388_s18, %s5389_s19  }
   0xf   :  { %s120_s27 = sshll.u32 %s5391_s26, 4  ;;  %s31_s30 = sshll.u32 %s7643_s0, 4  ;;  %s121_s27 = int_to_ptr.vmem [resolvable:$true] %s120_s27  ;;  %s32_s30 = int_to_ptr.hbm [resolvable:$true] %s31_s30 }
  0x10   :  { %123 = dma.hbm_to_vmem [thread:$0]  %s119_s25, 64, %s121_s27, [#allocation15]  }
  0x11   :  { %s53_s15 = sshll.u32 %s7645_s2, 4  ;;  %s5392_s16 = smov [#allocation2]   ;;  %s54_s15 = int_to_ptr.hbm [resolvable:$true] %s53_s15 }
  0x12   :  { %s33_s8 = sshll.u32 %s5392_s16, 4  ;;  %s5393_s17 = smov [#allocation7]   ;;  %s34_s8 = int_to_ptr.vmem [resolvable:$true] %s33_s8 }
  0x13   :  { %36 = dma.hbm_to_vmem [thread:$0]  %s32_s30, 64, %s34_s8, [#allocation3]  }
  0x14   :  { %s55_s1 = sshll.u32 %s5393_s17, 4  ;;  %s76_s22 = sshll.u32 %s7647_s4, 4  ;;  %s56_s1 = int_to_ptr.vmem [resolvable:$true] %s55_s1  ;;  %s77_s22 = int_to_ptr.hbm [resolvable:$true] %s76_s22 }
  0x15   :  { %58 = dma.hbm_to_vmem [thread:$0]  %s54_s15, 32, %s56_s1, [#allocation6]  }
  0x16   :  { %s104_s3 = sshll.u32 %s7650_s7, 4  ;;  %s5394_s24 = smov [#allocation10]   ;;  %s105_s3 = int_to_ptr.hbm [resolvable:$true] %s104_s3 }
  0x17   :  { %s78_s2 = sshll.u32 %s5394_s24, 4  ;;  %s5395_s25 = smov [#allocation13]   ;;  %s79_s2 = int_to_ptr.vmem [resolvable:$true] %s78_s2 }
  0x18   :  { %84 = dma.hbm_to_vmem [thread:$0]  %s77_s22, 4096, %s79_s2, [#allocation9], %s5388_s18, %s5388_s18, %s5389_s19  }
  0x19   :  { %s106_s26 = sshll.u32 %s5395_s25, 4  ;;  %s128_s4 = sshll.u32 %s7652_s9, 4  ;;  %s107_s26 = int_to_ptr.vmem [resolvable:$true] %s106_s26  ;;  %s129_s4 = int_to_ptr.hbm [resolvable:$true] %s128_s4 }
  0x1a   :  { %112 = dma.hbm_to_vmem [thread:$0]  %s105_s3, 4096, %s107_s26, [#allocation12], %s5388_s18, %s5388_s18, %s5389_s19  }
  0x1b   :  { %s5396_s7 = smov [#allocation16]   ;;  %s5397_s30 = smov 64  }
  0x1c   :  { %s130_s29 = sshll.u32 %s5396_s7, 4  ;;  %s5398_s6 = smov 4   ;;  %s131_s29 = int_to_ptr.vmem [resolvable:$true] %s130_s29 }
  0x1d   :  { %136 = dma.hbm_to_vmem [thread:$0]  %s129_s4, 1024, %s131_s29, [#allocation15], %s5397_s30, %s5397_s30, %s5398_s6  }
  0x1e   :  { %5372 = dma.done.wait [#allocation3], 64  }
  0x1f   :  { %5373 = vsyncadd [#allocation3], 4294967232 }
  0x20   :  { %5374 = dma.done.wait [#allocation6], 64  }
  0x21   :  { %5375 = vsyncadd [#allocation6], 4294967232 }
  0x22   :  { %5376 = dma.done.wait [#allocation9], 8192  }
  0x23   :  { %5377 = vsyncadd [#allocation9], 4294959104 }
  0x24   :  { %5378 = dma.done.wait [#allocation12], 8192  }
  0x25   :  { %5379 = vsyncadd [#allocation12], 4294959104 }
  0x26   :  { %5380 = dma.done.wait [#allocation15], 1088  }
  0x27   :  { %5381 = vsyncadd [#allocation15], 4294966208  ;;  %v4128_v0 = vld [vmem:[#allocation8 + $0xe0] sm:$0xf]  ;;  %v4669_v1 = vld [vmem:[#allocation8 + $0xec] sm:$0xf0] }
  0x28   :  { %v4667_v2 = vld [vmem:[#allocation8 + $0xe4] sm:$0xf]  ;;  %v4129_v3 = vor.u32 %v4669_v1, %v4128_v0  ;;  %v4130_v4 = vld [vmem:[#allocation8 + $0xf0] sm:$0xf0]  ;;  %v4136_v5 = vld [vmem:[#allocation8 + $0xe8] sm:$0xf] }
  0x29   :  { %v4670_v6 = vld [vmem:[#allocation8 + $0xf4] sm:$0xf0]  ;;  %v4133_v7 = vor.u32 %v4667_v2, %v4130_v4  ;;  %v4668_v9 = vld [vmem:[#allocation8 + $0xec] sm:$0xf]  ;;  %v4138_v10 = vld [vmem:[#allocation8 + $0xf8] sm:$0xf0] }
  0x2a   :  { %v4137_v8 = vor.u32 %v4670_v6, %v4136_v5  ;;  %v4112_v11 = vld [vmem:[#allocation8 + $0xc0] sm:$0xf]  ;;  %378 = vmatpush.bf16.msra.mxu0 %v4129_v3  ;;  %v4141_v12 = vor.u32 %v4668_v9, %v4138_v10  ;;  %v4665_v13 = vld [vmem:[#allocation8 + $0xcc] sm:$0xf0]  ;;  %v4663_v14 = vld [vmem:[#allocation8 + $0xc4] sm:$0xf] }
  0x2b   :  { %v4114_v15 = vld [vmem:[#allocation8 + $0xd0] sm:$0xf0]  ;;  %391 = vmatpush.bf16.msra.mxu1 %v4133_v7  ;;  %v4113_v16 = vor.u32 %v4665_v13, %v4112_v11  ;;  %v4120_v18 = vld [vmem:[#allocation8 + $0xc8] sm:$0xf]  ;;  %v4666_v19 = vld [vmem:[#allocation8 + $0xd4] sm:$0xf0] }
  0x2c   :  { %404 = vmatpush.bf16.msra.mxu2 %v4137_v8  ;;  %v4117_v17 = vor.u32 %v4663_v14, %v4114_v15  ;;  %v4664_v20 = vld [vmem:[#allocation8 + $0xcc] sm:$0xf]  ;;  %417 = vmatpush.bf16.msra.mxu3 %v4141_v12  ;;  %v4121_v21 = vor.u32 %v4666_v19, %v4120_v18  ;;  %v4122_v22 = vld [vmem:[#allocation8 + $0xd8] sm:$0xf0]  ;;  %v4096_v23 = vld [vmem:[#allocation8 + $0xa0] sm:$0xf] }
  0x2d   :  { %v4661_v24 = vld [vmem:[#allocation8 + $0xac] sm:$0xf0]  ;;  %v4125_v25 = vor.u32 %v4664_v20, %v4122_v22  ;;  %v4659_v26 = vld [vmem:[#allocation8 + $0xa4] sm:$0xf]  ;;  %v4098_v27 = vld [vmem:[#allocation8 + $0xb0] sm:$0xf0] }
  0x2e   :  { %v4104_v28 = vld [vmem:[#allocation8 + $0xa8] sm:$0xf]  ;;  %379 = vmatpush.bf16.msra.mxu0 %v4113_v16  ;;  %v4097_v29 = vor.u32 %v4661_v24, %v4096_v23  ;;  %v4662_v30 = vld [vmem:[#allocation8 + $0xb4] sm:$0xf0]  ;;  %v4660_v31 = vld [vmem:[#allocation8 + $0xac] sm:$0xf]  ;;  %v4101_v33 = vor.u32 %v4659_v26, %v4098_v27 }
  0x2f   :  { %v4106_v32 = vld [vmem:[#allocation8 + $0xb8] sm:$0xf0]  ;;  %392 = vmatpush.bf16.msra.mxu1 %v4117_v17  ;;  %v4105_v34 = vor.u32 %v4662_v30, %v4104_v28  ;;  %v4080_v35 = vld [vmem:[#allocation8 + $0x80] sm:$0xf]  ;;  %v4657_v36 = vld [vmem:[#allocation8 + $0x8c] sm:$0xf0] }
  0x30   :  { %405 = vmatpush.bf16.msra.mxu2 %v4121_v21  ;;  %v4655_v37 = vld [vmem:[#allocation8 + $0x84] sm:$0xf]  ;;  %418 = vmatpush.bf16.msra.mxu3 %v4125_v25  ;;  %v4109_v38 = vor.u32 %v4660_v31, %v4106_v32  ;;  %v4082_v39 = vld [vmem:[#allocation8 + $0x90] sm:$0xf0]  ;;  %v4088_v40 = vld [vmem:[#allocation8 + $0x88] sm:$0xf]  ;;  %v4081_v44 = vor.u32 %v4657_v36, %v4080_v35 }
  0x31   :  { %v4658_v41 = vld [vmem:[#allocation8 + $0x94] sm:$0xf0]  ;;  %v4656_v42 = vld [vmem:[#allocation8 + $0x8c] sm:$0xf]  ;;  %v4090_v43 = vld [vmem:[#allocation8 + $0x98] sm:$0xf0]  ;;  %v4085_v45 = vor.u32 %v4655_v37, %v4082_v39 }
  0x32   :  { %380 = vmatpush.bf16.msra.mxu0 %v4097_v29  ;;  %v4089_v46 = vor.u32 %v4658_v41, %v4088_v40  ;;  %v4064_v47 = vld [vmem:[#allocation8 + $0x60] sm:$0xf]  ;;  %v4653_v48 = vld [vmem:[#allocation8 + $0x6c] sm:$0xf0]  ;;  %v4651_v49 = vld [vmem:[#allocation8 + $0x64] sm:$0xf]  ;;  %v4093_v50 = vor.u32 %v4656_v42, %v4090_v43 }
  0x33   :  { %393 = vmatpush.bf16.msra.mxu1 %v4101_v33  ;;  %v4066_v51 = vld [vmem:[#allocation8 + $0x70] sm:$0xf0]  ;;  %v4072_v52 = vld [vmem:[#allocation8 + $0x68] sm:$0xf]  ;;  %v4654_v53 = vld [vmem:[#allocation8 + $0x74] sm:$0xf0]  ;;  %v4065_v56 = vor.u32 %v4653_v48, %v4064_v47 }
  0x34   :  { %406 = vmatpush.bf16.msra.mxu2 %v4105_v34  ;;  %419 = vmatpush.bf16.msra.mxu3 %v4109_v38  ;;  %v4652_v54 = vld [vmem:[#allocation8 + $0x6c] sm:$0xf]  ;;  %v4074_v55 = vld [vmem:[#allocation8 + $0x78] sm:$0xf0]  ;;  %v4069_v57 = vor.u32 %v4651_v49, %v4066_v51  ;;  %v4073_v58 = vor.u32 %v4654_v53, %v4072_v52  ;;  %v4048_v59 = vld [vmem:[#allocation8 + $0x40] sm:$0xf] }
  0x35   :  { %v4649_v60 = vld [vmem:[#allocation8 + $0x4c] sm:$0xf0]  ;;  %v4647_v61 = vld [vmem:[#allocation8 + $0x44] sm:$0xf]  ;;  %v4077_v62 = vor.u32 %v4652_v54, %v4074_v55  ;;  %v4050_v63 = vld [vmem:[#allocation8 + $0x50] sm:$0xf0] }
  0x36   :  { %381 = vmatpush.bf16.msra.mxu0 %v4081_v44  ;;  %v4056_v0 = vld [vmem:[#allocation8 + $0x48] sm:$0xf]  ;;  %v4650_v1 = vld [vmem:[#allocation8 + $0x54] sm:$0xf0]  ;;  %v4648_v2 = vld [vmem:[#allocation8 + $0x4c] sm:$0xf]  ;;  %v4049_v4 = vor.u32 %v4649_v60, %v4048_v59  ;;  %v4053_v5 = vor.u32 %v4647_v61, %v4050_v63 }
  0x37   :  { %394 = vmatpush.bf16.msra.mxu1 %v4085_v45  ;;  %v4058_v3 = vld [vmem:[#allocation8 + $0x58] sm:$0xf0]  ;;  %v4057_v6 = vor.u32 %v4650_v1, %v4056_v0  ;;  %v4032_v7 = vld [vmem:[#allocation8 + $0x20] sm:$0xf]  ;;  %v4645_v8 = vld [vmem:[#allocation8 + $0x2c] sm:$0xf0] }
  0x38   :  { %407 = vmatpush.bf16.msra.mxu2 %v4089_v46  ;;  %420 = vmatpush.bf16.msra.mxu3 %v4093_v50  ;;  %v4643_v9 = vld [vmem:[#allocation8 + $0x24] sm:$0xf]  ;;  %v4061_v10 = vor.u32 %v4648_v2, %v4058_v3  ;;  %v4034_v11 = vld [vmem:[#allocation8 + $0x30] sm:$0xf0]  ;;  %v4040_v12 = vld [vmem:[#allocation8 + $0x28] sm:$0xf]  ;;  %v4033_v16 = vor.u32 %v4645_v8, %v4032_v7 }
  0x39   :  { %v4646_v13 = vld [vmem:[#allocation8 + $0x34] sm:$0xf0]  ;;  %v4644_v14 = vld [vmem:[#allocation8 + $0x2c] sm:$0xf]  ;;  %v4042_v15 = vld [vmem:[#allocation8 + $0x38] sm:$0xf0]  ;;  %v4037_v19 = vor.u32 %v4643_v9, %v4034_v11 }
  0x3a   :  { %382 = vmatpush.bf16.msra.mxu0 %v4065_v56  ;;  %v4016_v17 = vld [vmem:[#allocation8] sm:$0xf]  ;;  %v4641_v18 = vld [vmem:[#allocation8 + $0xc] sm:$0xf0]  ;;  %v4041_v20 = vor.u32 %v4646_v13, %v4040_v12  ;;  %v4639_v21 = vld [vmem:[#allocation8 + $0x4] sm:$0xf]  ;;  %v4045_v24 = vor.u32 %v4644_v14, %v4042_v15 }
  0x3b   :  { %395 = vmatpush.bf16.msra.mxu1 %v4069_v57  ;;  %v4018_v22 = vld [vmem:[#allocation8 + $0x10] sm:$0xf0]  ;;  %v4024_v23 = vld [vmem:[#allocation8 + $0x8] sm:$0xf]  ;;  %v4642_v25 = vld [vmem:[#allocation8 + $0x14] sm:$0xf0]  ;;  %v4017_v31 = vor.u32 %v4641_v18, %v4016_v17 }
  0x3c   :  { %408 = vmatpush.bf16.msra.mxu2 %v4073_v58  ;;  %421 = vmatpush.bf16.msra.mxu3 %v4077_v62  ;;  %v4640_v26 = vld [vmem:[#allocation8 + $0xc] sm:$0xf]  ;;  %v4026_v27 = vld [vmem:[#allocation8 + $0x18] sm:$0xf0]  ;;  %v4256_v28 = vld [vmem:[#allocation10 + $0xe0] sm:$0xf]  ;;  %v4021_v35 = vor.u32 %v4639_v21, %v4018_v22  ;;  %v4025_v36 = vor.u32 %v4642_v25, %v4024_v23 }
  0x3d   :  { %v4701_v29 = vld [vmem:[#allocation10 + $0xec] sm:$0xf0]  ;;  %v4699_v30 = vld [vmem:[#allocation10 + $0xe4] sm:$0xf]  ;;  %v4258_v32 = vld [vmem:[#allocation10 + $0xf0] sm:$0xf0]  ;;  %v4029_v39 = vor.u32 %v4640_v26, %v4026_v27 }
  0x3e   :  { %383 = vmatpush.bf16.msra.mxu0 %v4049_v4  ;;  %v4264_v33 = vld [vmem:[#allocation10 + $0xe8] sm:$0xf]  ;;  %v4702_v34 = vld [vmem:[#allocation10 + $0xf4] sm:$0xf0]  ;;  %v4700_v37 = vld [vmem:[#allocation10 + $0xec] sm:$0xf]  ;;  %v5511_v40 = vor.u32 %v4701_v29, %v4256_v28  ;;  %v5513_v41 = vor.u32 %v4699_v30, %v4258_v32 }
  0x3f   :  { %396 = vmatpush.bf16.msra.mxu1 %v4053_v5  ;;  %v4266_v38 = vld [vmem:[#allocation10 + $0xf8] sm:$0xf0]  ;;  %v5515_v42 = vor.u32 %v4702_v34, %v4264_v33  ;;  %v4240_v43 = vld [vmem:[#allocation10 + $0xc0] sm:$0xf]  ;;  %v4697_v44 = vld [vmem:[#allocation10 + $0xcc] sm:$0xf0] }
  0x40   :  { %409 = vmatpush.bf16.msra.mxu2 %v4057_v6  ;;  %422 = vmatpush.bf16.msra.mxu3 %v4061_v10  ;;  %v4695_v45 = vld [vmem:[#allocation10 + $0xc4] sm:$0xf]  ;;  %v5517_v46 = vor.u32 %v4700_v37, %v4266_v38  ;;  %v4242_v47 = vld [vmem:[#allocation10 + $0xd0] sm:$0xf0]  ;;  %v4248_v48 = vld [vmem:[#allocation10 + $0xc8] sm:$0xf]  ;;  %v5520_v53 = vor.u32 %v4697_v44, %v4240_v43 }
  0x41   :  { %v4698_v49 = vld [vmem:[#allocation10 + $0xd4] sm:$0xf0]  ;;  %v4696_v50 = vld [vmem:[#allocation10 + $0xcc] sm:$0xf]  ;;  %v4250_v51 = vld [vmem:[#allocation10 + $0xd8] sm:$0xf0]  ;;  %v5524_v54 = vor.u32 %v4695_v45, %v4242_v47 }
  0x42   :  { %384 = vmatpush.bf16.msra.mxu0 %v4033_v16  ;;  %v175_v52 = vld [vmem:[#allocation2] sm:$0xf]  ;;  %v5526_v55 = vor.u32 %v4698_v49, %v4248_v48  ;;  %v4224_v56 = vld [vmem:[#allocation10 + $0xa0] sm:$0xf]  ;;  %v4693_v57 = vld [vmem:[#allocation10 + $0xac] sm:$0xf0]  ;;  %v5529_v59 = vor.u32 %v4696_v50, %v4250_v51 }
  0x43   :  { %397 = vmatpush.bf16.msra.mxu1 %v4037_v19  ;;  %v4691_v58 = vld [vmem:[#allocation10 + $0xa4] sm:$0xf]  ;;  %v4226_v60 = vld [vmem:[#allocation10 + $0xb0] sm:$0xf0]  ;;  %v4232_v61 = vld [vmem:[#allocation10 + $0xa8] sm:$0xf]  ;;  %v5532_v1 = vor.u32 %v4693_v57, %v4224_v56 }
  0x44   :  { %410 = vmatpush.bf16.msra.mxu2 %v4041_v20  ;;  %423 = vmatpush.bf16.msra.mxu3 %v4045_v24  ;;  %v4694_v62 = vld [vmem:[#allocation10 + $0xb4] sm:$0xf0]  ;;  %v4692_v63 = vld [vmem:[#allocation10 + $0xac] sm:$0xf]  ;;  %v4234_v0 = vld [vmem:[#allocation10 + $0xb8] sm:$0xf0]  ;;  %v5536_v2 = vor.u32 %v4691_v58, %v4226_v60 }
  0x45   :  { %v5538_v3 = vor.u32 %v4694_v62, %v4232_v61  ;;  %v4208_v4 = vld [vmem:[#allocation10 + $0x80] sm:$0xf]  ;;  %v4689_v5 = vld [vmem:[#allocation10 + $0x8c] sm:$0xf0]  ;;  %v4687_v6 = vld [vmem:[#allocation10 + $0x84] sm:$0xf]  ;;  %v5541_v7 = vor.u32 %v4692_v63, %v4234_v0 }
  0x46   :  { %385 = vmatpush.bf16.msra.mxu0 %v4017_v31  ;;  %7834 = vst [vmem:[#allocation28_spill] sm:$0xff] %v5536_v2  ;;  %v4210_v8 = vld [vmem:[#allocation10 + $0x90] sm:$0xf0]  ;;  %v4216_v9 = vld [vmem:[#allocation10 + $0x88] sm:$0xf]  ;;  %v5544_v13 = vor.u32 %v4689_v5, %v4208_v4  ;;  %s3980_s14 = sshll.u32 %s7655_s12, 4  ;;  %s3981_s14 = int_to_ptr.hbm [resolvable:$true] %s3980_s14 }
  0x47   :  { %398 = vmatpush.bf16.msra.mxu1 %v4021_v35  ;;  %7835 = vst [vmem:[#allocation29_spill] sm:$0xff] %v5538_v3  ;;  %v4690_v10 = vld [vmem:[#allocation10 + $0x94] sm:$0xf0]  ;;  %v4688_v11 = vld [vmem:[#allocation10 + $0x8c] sm:$0xf]  ;;  %v5548_v15 = vor.u32 %v4687_v6, %v4210_v8  ;;  %s5399_s15 = smov [#allocation18]  }
  0x48   :  { %411 = vmatpush.bf16.msra.mxu2 %v4025_v36  ;;  %424 = vmatpush.bf16.msra.mxu3 %v4029_v39  ;;  %7836 = vst [vmem:[#allocation30_spill] sm:$0xff] %v5541_v7  ;;  %v4218_v12 = vld [vmem:[#allocation10 + $0x98] sm:$0xf0]  ;;  %v4192_v14 = vld [vmem:[#allocation10 + $0x60] sm:$0xf]  ;;  %v5550_v16 = vor.u32 %v4690_v10, %v4216_v9  ;;  %s3978_s16 = sshll.u32 %s5399_s15, 4  ;;  %s3979_s16 = int_to_ptr.vmem [resolvable:$true] %s3978_s16 }
  0x49   :  { %386 = vmatmul.bf16.vlgmr.msra.gmra.mxu0 %v175_v52  ;;  %7837 = vst [vmem:[#allocation31_spill] sm:$0xff] %v5544_v13  ;;  %v4685_v17 = vld [vmem:[#allocation10 + $0x6c] sm:$0xf0]  ;;  %v4683_v18 = vld [vmem:[#allocation10 + $0x64] sm:$0xf]  ;;  %v5553_v20 = vor.u32 %v4688_v11, %v4218_v12  ;;  %s5400_s8 = smov [#allocation20]  }
  0x4a   :  { %692 = vmatpush.bf16.msrb.mxu0 %v5511_v40  ;;  %399 = vmatmul.bf16.vlgmr.msra.gmra.mxu1 %v175_v52  ;;  %7838 = vst [vmem:[#allocation32_spill] sm:$0xff] %v5548_v15  ;;  %v4194_v19 = vld [vmem:[#allocation10 + $0x70] sm:$0xf0]  ;;  %v4200_v21 = vld [vmem:[#allocation10 + $0x68] sm:$0xf]  ;;  %v5556_v25 = vor.u32 %v4685_v17, %v4192_v14  ;;  %s3989_s17 = sshll.u32 %s5400_s8, 4  ;;  %s3990_s17 = int_to_ptr.vmem [resolvable:$true] %s3989_s17 }
  0x4b   :  { %705 = vmatpush.bf16.msrb.mxu1 %v5513_v41  ;;  %412 = vmatmul.bf16.vlgmr.msra.gmra.mxu2 %v175_v52  ;;  %7839 = vst [vmem:[#allocation33_spill] sm:$0xff] %v5550_v16  ;;  %v4686_v22 = vld [vmem:[#allocation10 + $0x74] sm:$0xf0]  ;;  %v4684_v23 = vld [vmem:[#allocation10 + $0x6c] sm:$0xf]  ;;  %v5560_v26 = vor.u32 %v4683_v18, %v4194_v19  ;;  %s3991_s21 = sshll.u32 %s7656_s13, 4  ;;  %s3992_s21 = int_to_ptr.hbm [resolvable:$true] %s3991_s21 }
  0x4c   :  { %718 = vmatpush.bf16.msrb.mxu2 %v5515_v42  ;;  %731 = vmatpush.bf16.msrb.mxu3 %v5517_v46  ;;  %7840 = vst [vmem:[#allocation34_spill] sm:$0xff] %v5553_v20  ;;  %v4202_v24 = vld [vmem:[#allocation10 + $0x78] sm:$0xf0]  ;;  %v5562_v27 = vor.u32 %v4686_v22, %v4200_v21  ;;  %v4176_v28 = vld [vmem:[#allocation10 + $0x40] sm:$0xf]  ;;  %s5401_s12 = smov [#allocation17]  }
  0x4d   :  { %425 = vmatmul.bf16.vlgmr.msra.gmra.mxu3 %v175_v52  ;;  %7841 = vst [vmem:[#allocation35_spill] sm:$0xff] %v5556_v25  ;;  %v4681_v29 = vld [vmem:[#allocation10 + $0x4c] sm:$0xf0]  ;;  %v4679_v30 = vld [vmem:[#allocation10 + $0x44] sm:$0xf]  ;;  %v5565_v31 = vor.u32 %v4684_v23, %v4202_v24  ;;  %s3967_s13 = sshll.u32 %s5401_s12, 4  ;;  %s3968_s13 = int_to_ptr.vmem [resolvable:$true] %s3967_s13 }
  0x4e   :  { %693 = vmatpush.bf16.msrb.mxu0 %v5520_v53  ;;  %7842 = vst [vmem:[#allocation36_spill] sm:$0xff] %v5560_v26  ;;  %v4178_v32 = vld [vmem:[#allocation10 + $0x50] sm:$0xf0]  ;;  %v4184_v33 = vld [vmem:[#allocation10 + $0x48] sm:$0xf]  ;;  %v5568_v37 = vor.u32 %v4681_v29, %v4176_v28 }
  0x4f   :  { %706 = vmatpush.bf16.msrb.mxu1 %v5524_v54  ;;  %7843 = vst [vmem:[#allocation37_spill] sm:$0xff] %v5562_v27  ;;  %v4682_v34 = vld [vmem:[#allocation10 + $0x54] sm:$0xf0]  ;;  %v4680_v35 = vld [vmem:[#allocation10 + $0x4c] sm:$0xf]  ;;  %v5572_v38 = vor.u32 %v4679_v30, %v4178_v32 }
  0x50   :  { %719 = vmatpush.bf16.msrb.mxu2 %v5526_v55  ;;  %732 = vmatpush.bf16.msrb.mxu3 %v5529_v59  ;;  %7844 = vst [vmem:[#allocation38_spill] sm:$0xff] %v5565_v31  ;;  %v4186_v36 = vld [vmem:[#allocation10 + $0x58] sm:$0xf0]  ;;  %v5574_v39 = vor.u32 %v4682_v34, %v4184_v33  ;;  %v4160_v43 = vld [vmem:[#allocation10 + $0x20] sm:$0xf] }
  0x51   :  { %v4677_v44 = vld [vmem:[#allocation10 + $0x2c] sm:$0xf0]  ;;  %v4675_v45 = vld [vmem:[#allocation10 + $0x24] sm:$0xf]  ;;  %v5577_v47 = vor.u32 %v4680_v35, %v4186_v36  ;;  %v4162_v48 = vld [vmem:[#allocation10 + $0x30] sm:$0xf0] }
  0x52   :  { %694 = vmatpush.bf16.msrb.mxu0 %v5532_v1  ;;  %v4168_v49 = vld [vmem:[#allocation10 + $0x28] sm:$0xf]  ;;  %v4678_v50 = vld [vmem:[#allocation10 + $0x34] sm:$0xf0]  ;;  %v4676_v51 = vld [vmem:[#allocation10 + $0x2c] sm:$0xf]  ;;  %v5580_v56 = vor.u32 %v4677_v44, %v4160_v43  ;;  %v5584_v57 = vor.u32 %v4675_v45, %v4162_v48 }
  0x53   :  { %707 = vmatpush.bf16.msrb.mxu1 %v5536_v2  ;;  %v4170_v52 = vld [vmem:[#allocation10 + $0x38] sm:$0xf0]  ;;  %v5586_v58 = vor.u32 %v4678_v50, %v4168_v49  ;;  %v4144_v60 = vld [vmem:[#allocation10] sm:$0xf]  ;;  %v4673_v61 = vld [vmem:[#allocation10 + $0xc] sm:$0xf0] }
  0x54   :  { %720 = vmatpush.bf16.msrb.mxu2 %v5538_v3  ;;  %733 = vmatpush.bf16.msrb.mxu3 %v5541_v7  ;;  %v4671_v62 = vld [vmem:[#allocation10 + $0x4] sm:$0xf]  ;;  %v5589_v63 = vor.u32 %v4676_v51, %v4170_v52  ;;  %v4146_v0 = vld [vmem:[#allocation10 + $0x10] sm:$0xf0]  ;;  %v4152_v4 = vld [vmem:[#allocation10 + $0x8] sm:$0xf]  ;;  %v5592_v9 = vor.u32 %v4673_v61, %v4144_v60 }
  0x55   :  { %v4674_v5 = vld [vmem:[#allocation10 + $0x14] sm:$0xf0]  ;;  %v4672_v6 = vld [vmem:[#allocation10 + $0xc] sm:$0xf]  ;;  %v4154_v8 = vld [vmem:[#allocation10 + $0x18] sm:$0xf0]  ;;  %v5596_v11 = vor.u32 %v4671_v62, %v4146_v0 }
  0x56   :  { %695 = vmatpush.bf16.msrb.mxu0 %v5544_v13  ;;  %v527_v10 = vld [vmem:[#allocation5] sm:$0x1]  ;;  %v5598_v12 = vor.u32 %v4674_v5, %v4152_v4  ;;  %v5601_v14 = vor.u32 %v4672_v6, %v4154_v8  ;;  %v4389_v18 = vld [vmem:[#allocation13 + $0xe0] sm:$0xf]  ;;  %v4765_v19 = vld [vmem:[#allocation13 + $0xec] sm:$0xf0] }
  0x57   :  { %708 = vmatpush.bf16.msrb.mxu1 %v5548_v15  ;;  %v531_v17 = vpack.c.bf16 %v527_v10, %v527_v10  ;;  %v4763_v21 = vld [vmem:[#allocation13 + $0xe4] sm:$0xf]  ;;  %v5607_v22 = vor.u32 %v4765_v19, %v4389_v18  ;;  %v4391_v23 = vld [vmem:[#allocation13 + $0xf0] sm:$0xf0]  ;;  %v4397_v24 = vld [vmem:[#allocation13 + $0xe8] sm:$0xf] }
  0x58   :  { %721 = vmatpush.bf16.msrb.mxu2 %v5550_v16  ;;  %734 = vmatpush.bf16.msrb.mxu3 %v5553_v20  ;;  %v4766_v28 = vld [vmem:[#allocation13 + $0xf4] sm:$0xf0]  ;;  %v5609_v29 = vor.u32 %v4763_v21, %v4391_v23  ;;  %v4764_v32 = vld [vmem:[#allocation13 + $0xec] sm:$0xf]  ;;  %v4399_v33 = vld [vmem:[#allocation13 + $0xf8] sm:$0xf0] }
  0x59   :  { %7845 = vst [vmem:[#allocation39_spill] sm:$0xff] %v5607_v22  ;;  %v5611_v30 = vor.u32 %v4766_v28, %v4397_v24  ;;  %v5614_v34 = vor.u32 %v4764_v32, %v4399_v33  ;;  %v4373_v35 = vld [vmem:[#allocation13 + $0xc0] sm:$0xf]  ;;  %v4761_v36 = vld [vmem:[#allocation13 + $0xcc] sm:$0xf0] }
  0x5a   :  { %696 = vmatpush.bf16.msrb.mxu0 %v5556_v25  ;;  %7846 = vst [vmem:[#allocation40_spill] sm:$0xff] %v5609_v29  ;;  %v4759_v43 = vld [vmem:[#allocation13 + $0xc4] sm:$0xf]  ;;  %v5618_v44 = vor.u32 %v4761_v36, %v4373_v35  ;;  %v4375_v45 = vld [vmem:[#allocation13 + $0xd0] sm:$0xf0] }
  0x5b   :  { %709 = vmatpush.bf16.msrb.mxu1 %v5560_v26  ;;  %7847 = vst [vmem:[#allocation41_spill] sm:$0xff] %v5611_v30  ;;  %v4381_v48 = vld [vmem:[#allocation13 + $0xc8] sm:$0xf]  ;;  %v4762_v49 = vld [vmem:[#allocation13 + $0xd4] sm:$0xf0]  ;;  %v5621_v50 = vor.u32 %v4759_v43, %v4375_v45 }
  0x5c   :  { %722 = vmatpush.bf16.msrb.mxu2 %v5562_v27  ;;  %735 = vmatpush.bf16.msrb.mxu3 %v5565_v31  ;;  %7848 = vst [vmem:[#allocation42_spill] sm:$0xff] %v5614_v34  ;;  %v5623_v51 = vor.u32 %v4762_v49, %v4381_v48  ;;  %v4760_v52 = vld [vmem:[#allocation13 + $0xcc] sm:$0xf]  ;;  %v4383_v60 = vld [vmem:[#allocation13 + $0xd8] sm:$0xf0] }
  0x5d   :  { %7849 = vst [vmem:[#allocation43_spill] sm:$0xff] %v5618_v44  ;;  %v5625_v61 = vor.u32 %v4760_v52, %v4383_v60  ;;  %v4357_v62 = vld [vmem:[#allocation13 + $0xa0] sm:$0xf]  ;;  %v4757_v0 = vld [vmem:[#allocation13 + $0xac] sm:$0xf0] }
  0x5e   :  { %697 = vmatpush.bf16.msrb.mxu0 %v5568_v37  ;;  %7850 = vst [vmem:[#allocation44_spill] sm:$0xff] %v5621_v50  ;;  %v5630_v4 = vor.u32 %v4757_v0, %v4357_v62  ;;  %v4755_v5 = vld [vmem:[#allocation13 + $0xa4] sm:$0xf]  ;;  %v4359_v6 = vld [vmem:[#allocation13 + $0xb0] sm:$0xf0] }
  0x5f   :  { %710 = vmatpush.bf16.msrb.mxu1 %v5572_v38  ;;  %7851 = vst [vmem:[#allocation45_spill] sm:$0xff] %v5623_v51  ;;  %v4365_v8 = vld [vmem:[#allocation13 + $0xa8] sm:$0xf]  ;;  %v5633_v10 = vor.u32 %v4755_v5, %v4359_v6  ;;  %v4756_v18 = vld [vmem:[#allocation13 + $0xac] sm:$0xf] }
  0x60   :  { %723 = vmatpush.bf16.msrb.mxu2 %v5574_v39  ;;  %736 = vmatpush.bf16.msrb.mxu3 %v5577_v47  ;;  %7852 = vst [vmem:[#allocation46_spill] sm:$0xff] %v5625_v61  ;;  %v4367_v19 = vld [vmem:[#allocation13 + $0xb8] sm:$0xf0]  ;;  %v4341_v24 = vld [vmem:[#allocation13 + $0x80] sm:$0xf] }
  0x61   :  { %7853 = vst [vmem:[#allocation47_spill] sm:$0xff] %v5630_v4  ;;  %v5637_v23 = vor.u32 %v4756_v18, %v4367_v19  ;;  %v4753_v28 = vld [vmem:[#allocation13 + $0x8c] sm:$0xf0]  ;;  %v4751_v32 = vld [vmem:[#allocation13 + $0x84] sm:$0xf] }
  0x62   :  { %698 = vmatpush.bf16.msrb.mxu0 %v5580_v56  ;;  %7854 = vst [vmem:[#allocation48_spill] sm:$0xff] %v5633_v10  ;;  %v5640_v33 = vor.u32 %v4753_v28, %v4341_v24  ;;  %v4343_v35 = vld [vmem:[#allocation13 + $0x90] sm:$0xf0]  ;;  %v4349_v36 = vld [vmem:[#allocation13 + $0x88] sm:$0xf] }
  0x63   :  { %711 = vmatpush.bf16.msrb.mxu1 %v5584_v57  ;;  %7856 = vst [vmem:[#allocation50_spill] sm:$0xff] %v5637_v23  ;;  %v4754_v43 = vld [vmem:[#allocation13 + $0x94] sm:$0xf0]  ;;  %v5644_v45 = vor.u32 %v4751_v32, %v4343_v35  ;;  %v4752_v49 = vld [vmem:[#allocation13 + $0x8c] sm:$0xf] }
  0x64   :  { %724 = vmatpush.bf16.msrb.mxu2 %v5586_v58  ;;  %737 = vmatpush.bf16.msrb.mxu3 %v5589_v63  ;;  %7857 = vst [vmem:[#allocation51_spill] sm:$0xff] %v5640_v33  ;;  %v5646_v48 = vor.u32 %v4754_v43, %v4349_v36  ;;  %v4351_v52 = vld [vmem:[#allocation13 + $0x98] sm:$0xf0]  ;;  %v4325_v60 = vld [vmem:[#allocation13 + $0x60] sm:$0xf] }
  0x65   :  { %7858 = vst [vmem:[#allocation52_spill] sm:$0xff] %v5644_v45  ;;  %v5649_v62 = vor.u32 %v4752_v49, %v4351_v52  ;;  %v4749_v0 = vld [vmem:[#allocation13 + $0x6c] sm:$0xf0]  ;;  %v4747_v5 = vld [vmem:[#allocation13 + $0x64] sm:$0xf] }
  0x66   :  { %699 = vmatpush.bf16.msrb.mxu0 %v5592_v9  ;;  %7859 = vst [vmem:[#allocation53_spill] sm:$0xff] %v5646_v48  ;;  %v4327_v6 = vld [vmem:[#allocation13 + $0x70] sm:$0xf0]  ;;  %v4748_v18 = vld [vmem:[#allocation13 + $0x6c] sm:$0xf]  ;;  %v5652_v19 = vor.u32 %v4749_v0, %v4325_v60 }
  0x67   :  { %712 = vmatpush.bf16.msrb.mxu1 %v5596_v11  ;;  %7860 = vst [vmem:[#allocation54_spill] sm:$0xff] %v5649_v62  ;;  %v4335_v24 = vld [vmem:[#allocation13 + $0x78] sm:$0xf0]  ;;  %v5656_v28 = vor.u32 %v4747_v5, %v4327_v6  ;;  %v4309_v36 = vld [vmem:[#allocation13 + $0x40] sm:$0xf] }
  0x68   :  { %725 = vmatpush.bf16.msrb.mxu2 %v5598_v12  ;;  %738 = vmatpush.bf16.msrb.mxu3 %v5601_v14  ;;  %7861 = vst [vmem:[#allocation55_spill] sm:$0xff] %v5652_v19  ;;  %v5661_v35 = vor.u32 %v4748_v18, %v4335_v24  ;;  %v4745_v43 = vld [vmem:[#allocation13 + $0x4c] sm:$0xf0]  ;;  %v4743_v49 = vld [vmem:[#allocation13 + $0x44] sm:$0xf] }
  0x69   :  { %700 = vmatmul.bf16.vlgmr.msrb.gmra.mxu0 %v531_v17  ;;  %7862 = vst [vmem:[#allocation56_spill] sm:$0xff] %v5656_v28  ;;  %v5667_v52 = vor.u32 %v4745_v43, %v4309_v36  ;;  %v4311_v60 = vld [vmem:[#allocation13 + $0x50] sm:$0xf0]  ;;  %v4317_v0 = vld [vmem:[#allocation13 + $0x48] sm:$0xf] }
  0x6a   :  { %713 = vmatmul.bf16.vlgmr.msrb.gmra.mxu1 %v531_v17  ;;  %993 = vmatpush.bf16.msra.mxu0 %v5607_v22  ;;  %7864 = vst [vmem:[#allocation58_spill] sm:$0xff] %v5661_v35  ;;  %v4746_v5 = vld [vmem:[#allocation13 + $0x54] sm:$0xf0]  ;;  %v4744_v24 = vld [vmem:[#allocation13 + $0x4c] sm:$0xf] }
  0x6b   :  { %726 = vmatmul.bf16.vlgmr.msrb.gmra.mxu2 %v531_v17  ;;  %739 = vmatmul.bf16.vlgmr.msrb.gmra.mxu3 %v531_v17  ;;  %v4758_v17 = vld [vmem:[#allocation13 + $0xb4] sm:$0xf0]  ;;  %7865 = vst [vmem:[#allocation59_spill] sm:$0xff] %v5667_v52  ;;  %v5675_v18 = vor.u32 %v4746_v5, %v4317_v0  ;;  %v4293_v36 = vld [vmem:[#allocation13 + $0x20] sm:$0xf] }
  0x6c   :  { %1006 = vmatpush.bf16.msra.mxu1 %v5609_v29  ;;  %1019 = vmatpush.bf16.msra.mxu2 %v5611_v30  ;;  %v5635_v21 = vor.u32 %v4758_v17, %v4365_v8  ;;  %v4333_v8 = vld [vmem:[#allocation13 + $0x68] sm:$0xf]  ;;  %v4750_v17 = vld [vmem:[#allocation13 + $0x74] sm:$0xf0]  ;;  %v4741_v43 = vld [vmem:[#allocation13 + $0x2c] sm:$0xf0] }
  0x6d   :  { %1032 = vmatpush.bf16.msra.mxu3 %v5614_v34  ;;  %v5658_v32 = vor.u32 %v4750_v17, %v4333_v8  ;;  %v5673_v17 = vor.u32 %v4743_v49, %v4311_v60  ;;  %7867 = vst [vmem:[#allocation61_spill] sm:$0xff] %v5675_v18  ;;  %v5685_v49 = vor.u32 %v4741_v43, %v4293_v36  ;;  %v4295_v60 = vld [vmem:[#allocation13 + $0x30] sm:$0xf0]  ;;  %v4301_v0 = vld [vmem:[#allocation13 + $0x28] sm:$0xf] }
  0x6e   :  { %994 = vmatpush.bf16.msra.mxu0 %v5618_v44  ;;  %7855 = vst [vmem:[#allocation49_spill] sm:$0xff] %v5635_v21  ;;  %v4742_v5 = vld [vmem:[#allocation13 + $0x34] sm:$0xf0]  ;;  %v4277_v36 = vld [vmem:[#allocation13] sm:$0xf] }
  0x6f   :  { %7863 = vst [vmem:[#allocation57_spill] sm:$0xff] %v5658_v32  ;;  %v4737_v43 = vld [vmem:[#allocation13 + $0xc] sm:$0xf0] }
  0x70   :  { %1007 = vmatpush.bf16.msra.mxu1 %v5621_v50  ;;  %1020 = vmatpush.bf16.msra.mxu2 %v5623_v51  ;;  %7866 = vst [vmem:[#allocation60_spill] sm:$0xff] %v5673_v17 }
  0x71   :  { %1033 = vmatpush.bf16.msra.mxu3 %v5625_v61  ;;  %7869 = vst [vmem:[#allocation63_spill] sm:$0xff] %v5685_v49 }
  0x72   :  { %995 = vmatpush.bf16.msra.mxu0 %v5630_v4 }
  0x74   :  { %1008 = vmatpush.bf16.msra.mxu1 %v5633_v10  ;;  %1021 = vmatpush.bf16.msra.mxu2 %v5635_v21 }
  0x75   :  { %1034 = vmatpush.bf16.msra.mxu3 %v5637_v23  ;;  %v4519_v23 = vld [vmem:[#allocation11 + $0xf0] sm:$0xf0] }
  0x76   :  { %996 = vmatpush.bf16.msra.mxu0 %v5640_v33 }
  0x78   :  { %1009 = vmatpush.bf16.msra.mxu1 %v5644_v45  ;;  %1022 = vmatpush.bf16.msra.mxu2 %v5646_v48  ;;  %v4738_v45 = vld [vmem:[#allocation13 + $0x14] sm:$0xf0] }
  0x79   :  { %1035 = vmatpush.bf16.msra.mxu3 %v5649_v62 }
  0x7a   :  { %997 = vmatpush.bf16.msra.mxu0 %v5652_v19 }
  0x7c   :  { %1010 = vmatpush.bf16.msra.mxu1 %v5656_v28  ;;  %1023 = vmatpush.bf16.msra.mxu2 %v5658_v32  ;;  %v4319_v32 = vld [vmem:[#allocation13 + $0x58] sm:$0xf0]  ;;  %v4739_v28 = vld [vmem:[#allocation13 + $0x24] sm:$0xf] }
  0x7d   :  { %1036 = vmatpush.bf16.msra.mxu3 %v5661_v35  ;;  %v5678_v35 = vor.u32 %v4744_v24, %v4319_v32  ;;  %v5687_v62 = vor.u32 %v4739_v28, %v4295_v60  ;;  %v5689_v32 = vor.u32 %v4742_v5, %v4301_v0  ;;  %v4740_v24 = vld [vmem:[#allocation13 + $0x2c] sm:$0xf]  ;;  %v4735_v28 = vld [vmem:[#allocation13 + $0x4] sm:$0xf]  ;;  %v5699_v60 = vor.u32 %v4737_v43, %v4277_v36  ;;  %v4279_v0 = vld [vmem:[#allocation13 + $0x10] sm:$0xf0] }
  0x7e   :  { %998 = vmatpush.bf16.msra.mxu0 %v5667_v52  ;;  %v4285_v5 = vld [vmem:[#allocation13 + $0x8] sm:$0xf]  ;;  %v5701_v33 = vor.u32 %v4735_v28, %v4279_v0  ;;  %v4734_v28 = vld [vmem:[#allocation11 + $0xf4] sm:$0xf0]  ;;  %v4732_v0 = vld [vmem:[#allocation11 + $0xec] sm:$0xf] }
  0x7f   :  { %7868 = vst [vmem:[#allocation62_spill] sm:$0xff] %v5678_v35 }
  0x80   :  { %1011 = vmatpush.bf16.msra.mxu1 %v5673_v17  ;;  %1024 = vmatpush.bf16.msra.mxu2 %v5675_v18  ;;  %7870 = vst [vmem:[#allocation64_spill] sm:$0xff] %v5687_v62  ;;  %v4303_v17 = vld [vmem:[#allocation13 + $0x38] sm:$0xf0] }
  0x81   :  { %1037 = vmatpush.bf16.msra.mxu3 %v5678_v35  ;;  %7871 = vst [vmem:[#allocation65_spill] sm:$0xff] %v5689_v32  ;;  %v5694_v35 = vor.u32 %v4740_v24, %v4303_v17  ;;  %v5703_v17 = vor.u32 %v4738_v45, %v4285_v5  ;;  %v4517_v24 = vld [vmem:[#allocation11 + $0xe0] sm:$0xf]  ;;  %v4525_v45 = vld [vmem:[#allocation11 + $0xe8] sm:$0xf] }
  0x82   :  { %999 = vmatpush.bf16.msra.mxu0 %v5685_v49  ;;  %7873 = vst [vmem:[#allocation67_spill] sm:$0xff] %v5699_v60  ;;  %v4731_v49 = vld [vmem:[#allocation11 + $0xe4] sm:$0xf] }
  0x83   :  { %7872 = vst [vmem:[#allocation66_spill] sm:$0xff] %v5694_v35  ;;  %v5712_v43 = vor.u32 %v4731_v49, %v4519_v23  ;;  %v4727_v23 = vld [vmem:[#allocation11 + $0xc4] sm:$0xf]  ;;  %v4503_v49 = vld [vmem:[#allocation11 + $0xd0] sm:$0xf0] }
  0x84   :  { %1012 = vmatpush.bf16.msra.mxu1 %v5687_v62  ;;  %1025 = vmatpush.bf16.msra.mxu2 %v5689_v32  ;;  %7874 = vst [vmem:[#allocation68_spill] sm:$0xff] %v5701_v33  ;;  %v4733_v62 = vld [vmem:[#allocation11 + $0xec] sm:$0xf0] }
  0x85   :  { %1038 = vmatpush.bf16.msra.mxu3 %v5694_v35  ;;  %7875 = vst [vmem:[#allocation69_spill] sm:$0xff] %v5703_v17  ;;  %v5710_v36 = vor.u32 %v4733_v62, %v4517_v24  ;;  %v4729_v35 = vld [vmem:[#allocation11 + $0xcc] sm:$0xf0]  ;;  %v4509_v24 = vld [vmem:[#allocation11 + $0xc8] sm:$0xf] }
  0x86   :  { %1000 = vmatpush.bf16.msra.mxu0 %v5699_v60  ;;  %7878 = vst [vmem:[#allocation72_spill] sm:$0xff] %v5712_v43  ;;  %v5715_v60 = vor.u32 %v4734_v28, %v4525_v45  ;;  %v4730_v45 = vld [vmem:[#allocation11 + $0xd4] sm:$0xf0]  ;;  %v4728_v28 = vld [vmem:[#allocation11 + $0xcc] sm:$0xf] }
  0x87   :  { %7877 = vst [vmem:[#allocation71_spill] sm:$0xff] %v5710_v36 }
  0x88   :  { %1013 = vmatpush.bf16.msra.mxu1 %v5701_v33  ;;  %1026 = vmatpush.bf16.msra.mxu2 %v5703_v17  ;;  %7879 = vst [vmem:[#allocation73_spill] sm:$0xff] %v5715_v60 }
  0x8a   :  { %1205 = vmatpush.bf16.msrb.mxu0 %v5710_v36  ;;  %v5727_v36 = vor.u32 %v4730_v45, %v4509_v24  ;;  %v4495_v45 = vld [vmem:[#allocation11 + $0xb8] sm:$0xf0] }
  0x8c   :  { %1218 = vmatpush.bf16.msrb.mxu1 %v5712_v43  ;;  %1231 = vmatpush.bf16.msrb.mxu2 %v5715_v60  ;;  %7883 = vst [vmem:[#allocation77_spill] sm:$0xff] %v5727_v36 }
  0x90   :  { %1232 = vmatpush.bf16.msrb.mxu2 %v5727_v36 }
  0xc6   :  { %v5669_v6 = vpop.f32.mrf.mxu0 }
  0xc7   :  { %v5671_v8 = vpop.f32.mrf.mxu1 }
  0xce   :  { %v5683_v19 = vpop.f32.mrf.mxu2  ;;  %v389_v18 = vpop.f32.mrf.mxu0 }
  0xcf   :  { %v402_v48 = vpop.f32.mrf.mxu1  ;;  %v4736_v18 = vld [vmem:[#allocation13 + $0xc] sm:$0xf] }
  0xd0   :  { %v5691_v52 = vpop.f32.mrf.mxu3  ;;  %v4287_v48 = vld [vmem:[#allocation13 + $0x18] sm:$0xf0] }
  0xd1   :  { %v5706_v32 = vor.u32 %v4736_v18, %v4287_v48  ;;  %v4527_v18 = vld [vmem:[#allocation11 + $0xf8] sm:$0xf0]  ;;  %v4501_v48 = vld [vmem:[#allocation11 + $0xc0] sm:$0xf] }
  0xd2   :  { %v5719_v17 = vor.u32 %v4732_v0, %v4527_v18  ;;  %v5721_v62 = vor.u32 %v4729_v35, %v4501_v48  ;;  %v4485_v0 = vld [vmem:[#allocation11 + $0xa0] sm:$0xf]  ;;  %v4725_v35 = vld [vmem:[#allocation11 + $0xac] sm:$0xf0]  ;;  %v4723_v18 = vld [vmem:[#allocation11 + $0xa4] sm:$0xf] }
  0xd3   :  { %7876 = vst [vmem:[#allocation70_spill] sm:$0xff] %v5706_v32  ;;  %1039 = vmatpush.bf16.msra.mxu3 %v5706_v32  ;;  %v4511_v32 = vld [vmem:[#allocation11 + $0xd8] sm:$0xf0]  ;;  %v4487_v48 = vld [vmem:[#allocation11 + $0xb0] sm:$0xf0] }
  0xd4   :  { %7880 = vst [vmem:[#allocation74_spill] sm:$0xff] %v5719_v17  ;;  %v5729_v43 = vor.u32 %v4728_v28, %v4511_v32  ;;  %1206 = vmatpush.bf16.msrb.mxu0 %v5721_v62  ;;  %v5736_v60 = vor.u32 %v4723_v18, %v4487_v48  ;;  %v4724_v32 = vld [vmem:[#allocation11 + $0xac] sm:$0xf]  ;;  %v5743_v28 = vld [vmem:[%s7648_s5] sm:$0xf] }
  0xd5   :  { %7881 = vst [vmem:[#allocation75_spill] sm:$0xff] %v5721_v62  ;;  %v4719_v62 = vld [vmem:[#allocation11 + $0x84] sm:$0xf]  ;;  %v4471_v48 = vld [vmem:[#allocation11 + $0x90] sm:$0xf0]  ;;  %v210_v36 = vperm.slane %v5743_v28, 0 }
  0xd6   :  { %v415_v5 = vpop.f32.mrf.mxu2  ;;  %7884 = vst [vmem:[#allocation78_spill] sm:$0xff] %v5729_v43  ;;  %v211_v21 = vperm.slane %v5743_v28, 1  ;;  %v212_v10 = vperm.slane %v5743_v28, 2 }
  0xd7   :  { %v5724_v5 = vor.u32 %v4727_v23, %v4503_v49  ;;  %1244 = vmatpush.bf16.msrb.mxu3 %v5719_v17  ;;  %v4493_v23 = vld [vmem:[#allocation11 + $0xa8] sm:$0xf]  ;;  %v4726_v49 = vld [vmem:[#allocation11 + $0xb4] sm:$0xf0]  ;;  %7886 = vst [vmem:[#allocation80_spill] sm:$0xff] %v5736_v60  ;;  %v5754_v17 = vor.u32 %v4719_v62, %v4471_v48 }
  0xd8   :  { %v428_v33 = vpop.f32.mrf.mxu3  ;;  %v5738_v24 = vor.u32 %v4726_v49, %v4493_v23  ;;  %v4477_v23 = vld [vmem:[#allocation11 + $0x88] sm:$0xf]  ;;  %v4722_v49 = vld [vmem:[#allocation11 + $0x94] sm:$0xf0]  ;;  %v4455_v48 = vld [vmem:[#allocation11 + $0x70] sm:$0xf0]  ;;  %v5774_v4 = vadd.f32 %v5671_v8, %v211_v21 }
  0xd9   :  { %7882 = vst [vmem:[#allocation76_spill] sm:$0xff] %v5724_v5  ;;  %1219 = vmatpush.bf16.msrb.mxu1 %v5724_v5  ;;  %v5733_v33 = vor.u32 %v4725_v35, %v4485_v0  ;;  %v5746_v0 = vor.u32 %v4724_v32, %v4495_v45  ;;  %v4469_v35 = vld [vmem:[#allocation11 + $0x80] sm:$0xf]  ;;  %v4721_v5 = vld [vmem:[#allocation11 + $0x8c] sm:$0xf0]  ;;  %v5756_v32 = vor.u32 %v4722_v49, %v4477_v23 }
  0xda   :  { %7887 = vst [vmem:[#allocation81_spill] sm:$0xff] %v5738_v24  ;;  %v5750_v18 = vor.u32 %v4721_v5, %v4469_v35  ;;  %1233 = vmatpush.bf16.msrb.mxu2 %v5738_v24  ;;  %v4720_v45 = vld [vmem:[#allocation11 + $0x8c] sm:$0xf]  ;;  %v4453_v5 = vld [vmem:[#allocation11 + $0x60] sm:$0xf]  ;;  %v5768_v49 = vadd.f32 %v5669_v6, %v210_v36 }
  0xdb   :  { %7885 = vst [vmem:[#allocation79_spill] sm:$0xff] %v5733_v33  ;;  %1245 = vmatpush.bf16.msrb.mxu3 %v5729_v43  ;;  %1207 = vmatpush.bf16.msrb.mxu0 %v5733_v33  ;;  %v4479_v43 = vld [vmem:[#allocation11 + $0x98] sm:$0xf0]  ;;  %v4717_v35 = vld [vmem:[#allocation11 + $0x6c] sm:$0xf0] }
  0xdc   :  { %7888 = vst [vmem:[#allocation82_spill] sm:$0xff] %v5746_v0  ;;  %v4715_v33 = vld [vmem:[#allocation11 + $0x64] sm:$0xf]  ;;  %v5765_v62 = vor.u32 %v4717_v35, %v4453_v5  ;;  %v4461_v23 = vld [vmem:[#allocation11 + $0x68] sm:$0xf] }
  0xdd   :  { %1220 = vmatpush.bf16.msrb.mxu1 %v5736_v60  ;;  %7889 = vst [vmem:[#allocation83_spill] sm:$0xff] %v5750_v18  ;;  %v5760_v60 = vor.u32 %v4720_v45, %v4479_v43  ;;  %v5771_v43 = vor.u32 %v4715_v33, %v4455_v48  ;;  %v4718_v45 = vld [vmem:[#allocation11 + $0x74] sm:$0xf0]  ;;  %v4463_v24 = vld [vmem:[#allocation11 + $0x78] sm:$0xf0] }
  0xde   :  { %7890 = vst [vmem:[#allocation84_spill] sm:$0xff] %v5754_v17  ;;  %1234 = vmatpush.bf16.msrb.mxu2 %v5756_v32  ;;  %v5778_v5 = vor.u32 %v4718_v45, %v4461_v23  ;;  %v529_v33 = vld [vmem:[#allocation5 + $0x1] sm:$0x1]  ;;  %v4437_v48 = vld [vmem:[#allocation11 + $0x40] sm:$0xf] }
  0xdf   :  { %7891 = vst [vmem:[#allocation85_spill] sm:$0xff] %v5756_v32  ;;  %1246 = vmatpush.bf16.msrb.mxu3 %v5746_v0  ;;  %1208 = vmatpush.bf16.msrb.mxu0 %v5750_v18  ;;  %v4716_v0 = vld [vmem:[#allocation11 + $0x6c] sm:$0xf]  ;;  %v213_v18 = vperm.slane %v5743_v28, 3  ;;  %v4713_v32 = vld [vmem:[#allocation11 + $0x4c] sm:$0xf0]  ;;  %v832_v21 = vpack.c.bf16 %v529_v33, %v529_v33 }
  0xe0   :  { %7892 = vst [vmem:[#allocation86_spill] sm:$0xff] %v5760_v60  ;;  %v5780_v35 = vor.u32 %v4716_v0, %v4463_v24  ;;  %v5786_v8 = vor.u32 %v4713_v32, %v4437_v48  ;;  %v4711_v28 = vld [vmem:[#allocation11 + $0x44] sm:$0xf]  ;;  %v4439_v23 = vld [vmem:[#allocation11 + $0x50] sm:$0xf0] }
  0xe1   :  { %1221 = vmatpush.bf16.msrb.mxu1 %v5754_v17  ;;  %7893 = vst [vmem:[#allocation87_spill] sm:$0xff] %v5765_v62  ;;  %v4445_v45 = vld [vmem:[#allocation11 + $0x48] sm:$0xf]  ;;  %v4714_v0 = vld [vmem:[#allocation11 + $0x54] sm:$0xf0]  ;;  %1027 = vmatmul.bf16.vlgmr.msra.gmra.mxu2 %v832_v21  ;;  %v5795_v32 = vadd.f32 %v5691_v52, %v213_v18 }
  0xe2   :  { %7894 = vst [vmem:[#allocation88_spill] sm:$0xff] %v5768_v49  ;;  %1235 = vmatpush.bf16.msrb.mxu2 %v5778_v5  ;;  %v4709_v48 = vld [vmem:[#allocation11 + $0x2c] sm:$0xf0]  ;;  %1001 = vmatmul.bf16.vlgmr.msra.gmra.mxu0 %v832_v21  ;;  %v4423_v52 = vld [vmem:[#allocation11 + $0x30] sm:$0xf0] }
  0xe3   :  { %7895 = vst [vmem:[#allocation89_spill] sm:$0xff] %v5771_v43  ;;  %1247 = vmatpush.bf16.msrb.mxu3 %v5760_v60  ;;  %1209 = vmatpush.bf16.msrb.mxu0 %v5765_v62  ;;  %v4429_v18 = vld [vmem:[#allocation11 + $0x28] sm:$0xf] }
  0xe4   :  { %7896 = vst [vmem:[#allocation90_spill] sm:$0xff] %v5774_v4  ;;  %1014 = vmatmul.bf16.vlgmr.msra.gmra.mxu1 %v832_v21  ;;  %1040 = vmatmul.bf16.vlgmr.msra.gmra.mxu3 %v832_v21 }
  0xe5   :  { %7897 = vst [vmem:[#allocation91_spill] sm:$0xff] %v5778_v5  ;;  %1222 = vmatpush.bf16.msrb.mxu1 %v5771_v43  ;;  %v4707_v5 = vld [vmem:[#allocation11 + $0x24] sm:$0xf] }
  0xe6   :  { %v701_v17 = vpop.f32.mrf.mxu0  ;;  %7898 = vst [vmem:[#allocation92_spill] sm:$0xff] %v5780_v35 }
  0xe7   :  { %v744_v6 = vadd.f32 %v701_v17, %v5768_v49  ;;  %v714_v36 = vpop.f32.mrf.mxu1  ;;  %7899 = vst [vmem:[#allocation93_spill] sm:$0xff] %v5786_v8  ;;  %v5789_v17 = vor.u32 %v4711_v28, %v4439_v23  ;;  %v4712_v49 = vld [vmem:[#allocation11 + $0x4c] sm:$0xf]  ;;  %1248 = vmatpush.bf16.msrb.mxu3 %v5780_v35  ;;  %v5800_v28 = vadd.f32 %v5683_v19, %v212_v10  ;;  %v4710_v23 = vld [vmem:[#allocation11 + $0x34] sm:$0xf0] }
  0xe8   :  { %v745_v61 = vadd.f32 %v714_v36, %v5774_v4  ;;  %v5792_v36 = vor.u32 %v4714_v0, %v4445_v45  ;;  %v4447_v4 = vld [vmem:[#allocation11 + $0x58] sm:$0xf0]  ;;  %7902 = vst [vmem:[#allocation96_spill] sm:$0xff] %v5795_v32  ;;  %1210 = vmatpush.bf16.msrb.mxu0 %v5786_v8  ;;  %v5809_v45 = vor.u32 %v4710_v23, %v4429_v18  ;;  %v4405_v8 = vld [vmem:[#allocation11] sm:$0xf] }
  0xe9   :  { %v4270_v24 = vmul.f32 -1.442695, %v744_v6  ;;  %7900 = vst [vmem:[#allocation94_spill] sm:$0xff] %v5789_v17  ;;  %v5797_v33 = vor.u32 %v4712_v49, %v4447_v4  ;;  %v4421_v6 = vld [vmem:[#allocation11 + $0x20] sm:$0xf]  ;;  %1223 = vmatpush.bf16.msrb.mxu1 %v5789_v17  ;;  %v5807_v49 = vor.u32 %v4707_v5, %v4423_v52 }
  0xea   :  { %v4271_v60 = vmul.f32 -1.442695, %v745_v61  ;;  %7901 = vst [vmem:[#allocation95_spill] sm:$0xff] %v5792_v36  ;;  %v5804_v61 = vor.u32 %v4709_v48, %v4421_v6  ;;  %1236 = vmatpush.bf16.msrb.mxu2 %v5792_v36  ;;  %v4431_v10 = vld [vmem:[#allocation11 + $0x38] sm:$0xf0] }
  0xeb   :  { %4792 = vpow2.f32 %v4270_v24  ;;  %7903 = vst [vmem:[#allocation97_spill] sm:$0xff] %v5797_v33  ;;  %v4708_v24 = vld [vmem:[#allocation11 + $0x2c] sm:$0xf]  ;;  %1249 = vmatpush.bf16.msrb.mxu3 %v5797_v33  ;;  %v4705_v36 = vld [vmem:[#allocation11 + $0xc] sm:$0xf0] }
  0xec   :  { %7904 = vst [vmem:[#allocation98_spill] sm:$0xff] %v5800_v28  ;;  %4794 = vpow2.f32 %v4271_v60  ;;  %v5813_v6 = vor.u32 %v4708_v24, %v4431_v10  ;;  %v4703_v5 = vld [vmem:[#allocation11 + $0x4] sm:$0xf]  ;;  %1211 = vmatpush.bf16.msrb.mxu0 %v5804_v61  ;;  %v5818_v21 = vor.u32 %v4705_v36, %v4405_v8  ;;  %v4407_v18 = vld [vmem:[#allocation11 + $0x10] sm:$0xf0] }
  0xed   :  { %7905 = vst [vmem:[#allocation99_spill] sm:$0xff] %v5804_v61  ;;  %1224 = vmatpush.bf16.msrb.mxu1 %v5807_v49  ;;  %v4413_v23 = vld [vmem:[#allocation11 + $0x8] sm:$0xf]  ;;  %v5821_v24 = vor.u32 %v4703_v5, %v4407_v18  ;;  %v4706_v10 = vld [vmem:[#allocation11 + $0x14] sm:$0xf0] }
  0xee   :  { %v727_v4 = vpop.f32.mrf.mxu2  ;;  %7906 = vst [vmem:[#allocation100_spill] sm:$0xff] %v5807_v49  ;;  %v740_v60 = vpop.f32.mrf.mxu3  ;;  %1237 = vmatpush.bf16.msrb.mxu2 %v5809_v45  ;;  %v4415_v8 = vld [vmem:[#allocation11 + $0x18] sm:$0xf0] }
  0xef   :  { %7907 = vst [vmem:[#allocation101_spill] sm:$0xff] %v5809_v45  ;;  %v746_v19 = vadd.f32 %v727_v4, %v5800_v28  ;;  %v703_v0 = vpop.f32.mrf.mxu0  ;;  %v747_v48 = vadd.f32 %v740_v60, %v5795_v32  ;;  %v716_v17 = vpop.f32.mrf.mxu1  ;;  %1250 = vmatpush.bf16.msrb.mxu3 %v5813_v6 }
  0xf0   :  { %7908 = vst [vmem:[#allocation102_spill] sm:$0xff] %v5813_v6  ;;  %v4704_v17 = vld [vmem:[#allocation11 + $0xc] sm:$0xf]  ;;  %1212 = vmatpush.bf16.msrb.mxu0 %v5818_v21 }
  0xf1   :  { %v4272_v52 = vmul.f32 -1.442695, %v746_v19  ;;  %7909 = vst [vmem:[#allocation103_spill] sm:$0xff] %v5818_v21  ;;  %v4793_v4 = vpop.eup %4792  ;;  %v4273_v0 = vmul.f32 -1.442695, %v747_v48  ;;  %v5826_v19 = vor.u32 %v4706_v10, %v4413_v23  ;;  %v5830_v28 = vor.u32 %v4704_v17, %v4415_v8  ;;  %1225 = vmatpush.bf16.msrb.mxu1 %v5821_v24 }
  0xf2   :  { %7910 = vst [vmem:[#allocation104_spill] sm:$0xff] %v5821_v24  ;;  %v4795_v60 = vpop.eup %4794  ;;  %v5823_v32 = vadd.f32 1.0, %v4793_v4 }
  0xf3   :  { %4796 = vpow2.f32 %v4272_v52  ;;  %7911 = vst [vmem:[#allocation105_spill] sm:$0xff] %v5826_v19  ;;  %v5828_v36 = vadd.f32 1.0, %v4795_v60  ;;  %1238 = vmatpush.bf16.msrb.mxu2 %v5826_v19  ;;  %1251 = vmatpush.bf16.msrb.mxu3 %v5830_v28 }
  0xf4   :  { %4798 = vpow2.f32 %v4273_v0  ;;  %7912 = vst [vmem:[#allocation106_spill] sm:$0xff] %v5830_v28  ;;  %1353 = vmatpush.bf16.msra.mxu0 %v5511_v40  ;;  %vm769_vm6 = vweird.f32 %v5823_v32 }
  0xf5   :  { %4800 = vrcp.f32 %v5823_v32  ;;  %1366 = vmatpush.bf16.msra.mxu1 %v5513_v41  ;;  %vm784_vm2 = vweird.f32 %v5828_v36 }
  0xf6   :  { %4802 = vrcp.f32 %v5828_v36  ;;  %v729_v48 = vpop.f32.mrf.mxu2  ;;  %v742_v5 = vpop.f32.mrf.mxu3 }
  0xf7   :  { %1379 = vmatpush.bf16.msra.mxu2 %v5515_v42  ;;  %1392 = vmatpush.bf16.msra.mxu3 %v5517_v46 }
  0xf8   :  { %1354 = vmatpush.bf16.msra.mxu0 %v5520_v53 }
  0xf9   :  { %v4797_v52 = vpop.eup %4796  ;;  %1367 = vmatpush.bf16.msra.mxu1 %v5524_v54 }
  0xfa   :  { %v4799_v18 = vpop.eup %4798  ;;  %v762_v23 = vadd.f32 1.0, %v4797_v52 }
  0xfb   :  { %v5843_v4 = vpop.eup %4800  ;;  %v5845_v0 = vadd.f32 1.0, %v4799_v18  ;;  %1380 = vmatpush.bf16.msra.mxu2 %v5526_v55  ;;  %1393 = vmatpush.bf16.msra.mxu3 %v5529_v59 }
  0xfc   :  { %v5848_v10 = vpop.eup %4802  ;;  %4804 = vrcp.f32 %v762_v23  ;;  %v765_v17 = vmul.f32 %v5843_v4, %v5823_v32  ;;  %1355 = vmatpush.bf16.msra.mxu0 %v5532_v1  ;;  %vm770_vm3 = vweird.f32 %v5843_v4  ;;  %vm799_vm5 = vweird.f32 %v762_v23 }
  0xfd   :  { %v780_v60 = vmul.f32 %v5848_v10, %v5828_v36  ;;  %4806 = vrcp.f32 %v5845_v0  ;;  %1368 = vmatpush.bf16.msra.mxu1 %v5536_v2  ;;  %vm785_vm0 = vweird.f32 %v5848_v10  ;;  %vm5897_vm9 = vmor %vm769_vm6, %vm770_vm3  ;;  %vm814_vm13 = vweird.f32 %v5845_v0 }
  0xfe   :  { %v766_v48 = vsub.f32 1.0, %v765_v17  ;;  %v805_v17 = vand.u32 2147483648, %v762_v23  ;;  %vm5884_vm4 = vmor %vm784_vm2, %vm785_vm0 }
  0xff   :  { %v781_v8 = vsub.f32 1.0, %v780_v60  ;;  %1381 = vmatpush.bf16.msra.mxu2 %v5538_v3  ;;  %1394 = vmatpush.bf16.msra.mxu3 %v5541_v7  ;;  %v803_v7 = vand.u32 2147483647, %v762_v23 }
 0x100   :  { %1356 = vmatpush.bf16.msra.mxu0 %v5544_v13  ;;  %v767_v2 = vmul.f32 %v5843_v4, %v766_v48 }
 0x101   :  { %v782_v52 = vmul.f32 %v5848_v10, %v781_v8  ;;  %1369 = vmatpush.bf16.msra.mxu1 %v5548_v15  ;;  %vm804_vm8 = vcmp.eq.f32.partialorder %v803_v7, 8.507059e+37 }
 0x102   :  { %v4805_v5 = vpop.eup %4804 }
 0x103   :  { %v795_v18 = vmul.f32 %v4805_v5, %v762_v23  ;;  %1382 = vmatpush.bf16.msra.mxu2 %v5550_v16  ;;  %1395 = vmatpush.bf16.msra.mxu3 %v5553_v20  ;;  %v5866_v60 = vpop.eup %4806  ;;  %v783_v13 = vadd.f32 %v5848_v10, %v782_v52  ;;  %vm800_vm1 = vweird.f32 %v4805_v5  ;;  %v788_v20 = vand.u32 2147483647, %v5828_v36  ;;  %v7919_v23 = vld [vmem:[#allocation48_spill] sm:$0xff] }
 0x104   :  { %1357 = vmatpush.bf16.msra.mxu0 %v5556_v25  ;;  %v790_v16 = vand.u32 2147483648, %v5828_v36  ;;  %v810_v48 = vmul.f32 %v5866_v60, %v5845_v0  ;;  %v768_v52 = vadd.f32 %v5843_v4, %v767_v2  ;;  %v775_v36 = vand.u32 2147483648, %v5823_v32  ;;  %vm801_vm7 = vmor %vm799_vm5, %vm800_vm1 }
 0x105   :  { %v796_v3 = vsub.f32 1.0, %v795_v18  ;;  %1370 = vmatpush.bf16.msra.mxu1 %v5560_v26  ;;  %v773_v2 = vand.u32 2147483647, %v5823_v32  ;;  %vm789_vm10 = vcmp.eq.f32.partialorder %v788_v20, 8.507059e+37  ;;  %vm815_vm12 = vweird.f32 %v5866_v60 }
 0x106   :  { %v811_v15 = vsub.f32 1.0, %v810_v48  ;;  %v772_v32 = vsel %vm5897_vm9, %v5843_v4, %v768_v52  ;;  %v776_v7 = vor.u32 1.1754944e-38, %v775_v36  ;;  %vm816_vm14 = vmor %vm814_vm13, %vm815_vm12 }
 0x107   :  { %v797_v8 = vmul.f32 %v4805_v5, %v796_v3  ;;  %1383 = vmatpush.bf16.msra.mxu2 %v5562_v27  ;;  %1396 = vmatpush.bf16.msra.mxu3 %v5565_v31  ;;  %v806_v27 = vor.u32 1.1754944e-38, %v805_v17  ;;  %v787_v31 = vsel %vm5884_vm4, %v5848_v10, %v783_v13  ;;  %v528_v10 = vld [vmem:[#allocation7] sm:$0x1]  ;;  %vm774_vm11 = vcmp.eq.f32.partialorder %v773_v2, 8.507059e+37 }
 0x108   :  { %1358 = vmatpush.bf16.msra.mxu0 %v5568_v37 }
 0x109   :  { %v798_v18 = vadd.f32 %v4805_v5, %v797_v8  ;;  %1371 = vmatpush.bf16.msra.mxu1 %v5572_v38  ;;  %v791_v8 = vor.u32 1.1754944e-38, %v790_v16  ;;  %v777_v16 = vsel %vm774_vm11, %v776_v7, %v772_v32  ;;  %v7921_v32 = vld [vmem:[#allocation50_spill] sm:$0xff]  ;;  %v7923_v7 = vld [vmem:[#allocation52_spill] sm:$0xff] }
 0x10b   :  { %v802_v26 = vsel %vm801_vm7, %v4805_v5, %v798_v18  ;;  %1384 = vmatpush.bf16.msra.mxu2 %v5574_v39  ;;  %1397 = vmatpush.bf16.msra.mxu3 %v5577_v47  ;;  %v792_v5 = vsel %vm789_vm10, %v791_v8, %v787_v31  ;;  %v818_v31 = vand.u32 2147483647, %v5845_v0  ;;  %v7920_v8 = vld [vmem:[#allocation49_spill] sm:$0xff] }
 0x10c   :  { %v807_v25 = vsel %vm804_vm8, %v806_v27, %v802_v26  ;;  %1359 = vmatpush.bf16.msra.mxu0 %v5580_v56  ;;  %v812_v26 = vmul.f32 %v5866_v60, %v811_v15  ;;  %v826_v27 = vmul.f32 %v792_v5, %v528_v10  ;;  %v820_v15 = vand.u32 2147483648, %v5845_v0  ;;  %v7917_v0 = vld [vmem:[#allocation46_spill] sm:$0xff]  ;;  %v7924_v10 = vld [vmem:[#allocation53_spill] sm:$0xff] }
 0x10d   :  { %v824_v13 = vmul.f32 2.0, %v807_v25  ;;  %1372 = vmatpush.bf16.msra.mxu1 %v5584_v57  ;;  %vm819_vm15 = vcmp.eq.f32.partialorder %v818_v31, 8.507059e+37  ;;  %v7925_v5 = vld [vmem:[#allocation54_spill] sm:$0xff] }
 0x10e   :  { %v813_v25 = vadd.f32 %v5866_v60, %v812_v26  ;;  %v821_v52 = vor.u32 1.1754944e-38, %v820_v15  ;;  %v7928_v26 = vld [vmem:[#allocation57_spill] sm:$0xff]  ;;  %v7933_v31 = vld [vmem:[#allocation62_spill] sm:$0xff] }
 0x10f   :  { %v4274_v17 = vadd.f32 -1.0, %v824_v13  ;;  %1385 = vmatpush.bf16.msra.mxu2 %v5586_v58  ;;  %1398 = vmatpush.bf16.msra.mxu3 %v5589_v63  ;;  %v7922_v13 = vld [vmem:[#allocation51_spill] sm:$0xff]  ;;  %v7932_v15 = vld [vmem:[#allocation61_spill] sm:$0xff] }
 0x110   :  { %1360 = vmatpush.bf16.msra.mxu0 %v5592_v9  ;;  %v817_v48 = vsel %vm816_vm14, %v5866_v60, %v813_v25  ;;  %v7918_v60 = vld [vmem:[#allocation47_spill] sm:$0xff]  ;;  %v7931_v25 = vld [vmem:[#allocation60_spill] sm:$0xff] }
 0x111   :  { %v827_v4 = vmul.f32 %v4274_v17, %v777_v16  ;;  %1373 = vmatpush.bf16.msra.mxu1 %v5596_v11  ;;  %v822_v18 = vsel %vm819_vm15, %v821_v52, %v817_v48  ;;  %v7926_v17 = vld [vmem:[#allocation55_spill] sm:$0xff]  ;;  %v7927_v16 = vld [vmem:[#allocation56_spill] sm:$0xff] }
 0x112   :  { %v7934_v48 = vld [vmem:[#allocation63_spill] sm:$0xff]  ;;  %v7935_v52 = vld [vmem:[#allocation64_spill] sm:$0xff] }
 0x113   :  { %v5912_v20 = vadd.f32 %v827_v4, %v826_v27  ;;  %1386 = vmatpush.bf16.msra.mxu2 %v5598_v12  ;;  %1399 = vmatpush.bf16.msra.mxu3 %v5601_v14  ;;  %v7929_v27 = vld [vmem:[#allocation58_spill] sm:$0xff]  ;;  %v7930_v4 = vld [vmem:[#allocation59_spill] sm:$0xff] }
 0x115   :  { %4808 = vtanh.f32 %v5912_v20 }
 0x11b   :  { %v4809_v3 = vpop.eup %4808 }
 0x11c   :  { %v830_v36 = vmul.f32 %v4809_v3, %v822_v18  ;;  %v7936_v3 = vld [vmem:[#allocation65_spill] sm:$0xff]  ;;  %v7937_v18 = vld [vmem:[#allocation66_spill] sm:$0xff] }
 0x11e   :  { %v831_v2 = vpack.c.bf16 %v830_v36, %v830_v36  ;;  %v7938_v36 = vld [vmem:[#allocation67_spill] sm:$0xff] }
 0x120   :  { %1213 = vmatmul.bf16.vlgmr.msrb.gmra.mxu0 %v831_v2  ;;  %1226 = vmatmul.bf16.vlgmr.msrb.gmra.mxu1 %v831_v2 }
 0x121   :  { %1239 = vmatmul.bf16.vlgmr.msrb.gmra.mxu2 %v831_v2  ;;  %1252 = vmatmul.bf16.vlgmr.msrb.gmra.mxu3 %v831_v2 }
 0x122   :  { %1509 = vmatpush.bf16.msrb.mxu0 %v5607_v22  ;;  %1522 = vmatpush.bf16.msrb.mxu1 %v5609_v29 }
 0x123   :  { %1535 = vmatpush.bf16.msrb.mxu2 %v5611_v30  ;;  %1548 = vmatpush.bf16.msrb.mxu3 %v5614_v34 }
 0x126   :  { %1510 = vmatpush.bf16.msrb.mxu0 %v5618_v44  ;;  %1523 = vmatpush.bf16.msrb.mxu1 %v5621_v50 }
 0x127   :  { %1536 = vmatpush.bf16.msrb.mxu2 %v5623_v51  ;;  %1549 = vmatpush.bf16.msrb.mxu3 %v7917_v0 }
 0x12a   :  { %1511 = vmatpush.bf16.msrb.mxu0 %v7918_v60  ;;  %1524 = vmatpush.bf16.msrb.mxu1 %v7919_v23 }
 0x12b   :  { %1537 = vmatpush.bf16.msrb.mxu2 %v7920_v8  ;;  %1550 = vmatpush.bf16.msrb.mxu3 %v7921_v32 }
 0x12e   :  { %1512 = vmatpush.bf16.msrb.mxu0 %v7922_v13  ;;  %1525 = vmatpush.bf16.msrb.mxu1 %v7923_v7 }
 0x12f   :  { %1538 = vmatpush.bf16.msrb.mxu2 %v7924_v10  ;;  %1551 = vmatpush.bf16.msrb.mxu3 %v7925_v5 }
 0x130   :  { %1361 = vmatmul.bf16.vlgmr.msra.gmra.mxu0 %v831_v2  ;;  %1374 = vmatmul.bf16.vlgmr.msra.gmra.mxu1 %v831_v2 }
 0x131   :  { %1387 = vmatmul.bf16.vlgmr.msra.gmra.mxu2 %v831_v2  ;;  %1400 = vmatmul.bf16.vlgmr.msra.gmra.mxu3 %v831_v2  ;;  %v7939_v2 = vld [vmem:[#allocation68_spill] sm:$0xff] }
 0x132   :  { %1513 = vmatpush.bf16.msrb.mxu0 %v7926_v17  ;;  %1526 = vmatpush.bf16.msrb.mxu1 %v7927_v16 }
 0x133   :  { %1539 = vmatpush.bf16.msrb.mxu2 %v7928_v26  ;;  %1552 = vmatpush.bf16.msrb.mxu3 %v7929_v27  ;;  %v7940_v27 = vld [vmem:[#allocation69_spill] sm:$0xff] }
 0x136   :  { %1514 = vmatpush.bf16.msrb.mxu0 %v7930_v4  ;;  %1527 = vmatpush.bf16.msrb.mxu1 %v7931_v25  ;;  %v7941_v4 = vld [vmem:[#allocation70_spill] sm:$0xff]  ;;  %v7942_v25 = vld [vmem:[#allocation71_spill] sm:$0xff] }
 0x137   :  { %1540 = vmatpush.bf16.msrb.mxu2 %v7932_v15  ;;  %1553 = vmatpush.bf16.msrb.mxu3 %v7933_v31  ;;  %v7943_v15 = vld [vmem:[#allocation72_spill] sm:$0xff]  ;;  %v7944_v31 = vld [vmem:[#allocation73_spill] sm:$0xff] }
 0x13a   :  { %1515 = vmatpush.bf16.msrb.mxu0 %v7934_v48  ;;  %1528 = vmatpush.bf16.msrb.mxu1 %v7935_v52  ;;  %v7945_v48 = vld [vmem:[#allocation74_spill] sm:$0xff]  ;;  %v7946_v52 = vld [vmem:[#allocation75_spill] sm:$0xff] }
 0x13b   :  { %1541 = vmatpush.bf16.msrb.mxu2 %v7936_v3  ;;  %1554 = vmatpush.bf16.msrb.mxu3 %v7937_v18  ;;  %v7947_v3 = vld [vmem:[#allocation76_spill] sm:$0xff]  ;;  %v7948_v18 = vld [vmem:[#allocation77_spill] sm:$0xff] }
 0x13e   :  { %1516 = vmatpush.bf16.msrb.mxu0 %v7938_v36  ;;  %1529 = vmatpush.bf16.msrb.mxu1 %v7939_v2  ;;  %v7949_v36 = vld [vmem:[#allocation78_spill] sm:$0xff]  ;;  %v7950_v2 = vld [vmem:[#allocation79_spill] sm:$0xff] }
 0x13f   :  { %1542 = vmatpush.bf16.msrb.mxu2 %v7940_v27  ;;  %1555 = vmatpush.bf16.msrb.mxu3 %v7941_v4  ;;  %v7951_v27 = vld [vmem:[#allocation80_spill] sm:$0xff]  ;;  %v7952_v4 = vld [vmem:[#allocation81_spill] sm:$0xff] }
 0x142   :  { %1565 = vmatpush.bf16.msra.mxu0 %v7942_v25  ;;  %1578 = vmatpush.bf16.msra.mxu1 %v7943_v15  ;;  %v7953_v25 = vld [vmem:[#allocation82_spill] sm:$0xff]  ;;  %v7954_v15 = vld [vmem:[#allocation83_spill] sm:$0xff] }
 0x143   :  { %1591 = vmatpush.bf16.msra.mxu2 %v7944_v31  ;;  %1604 = vmatpush.bf16.msra.mxu3 %v7945_v48  ;;  %v7955_v31 = vld [vmem:[#allocation84_spill] sm:$0xff]  ;;  %v7956_v48 = vld [vmem:[#allocation85_spill] sm:$0xff] }
 0x146   :  { %1566 = vmatpush.bf16.msra.mxu0 %v7946_v52  ;;  %1579 = vmatpush.bf16.msra.mxu1 %v7947_v3  ;;  %v7957_v52 = vld [vmem:[#allocation86_spill] sm:$0xff] }
 0x147   :  { %1592 = vmatpush.bf16.msra.mxu2 %v7948_v18  ;;  %1605 = vmatpush.bf16.msra.mxu3 %v7949_v36  ;;  %v7958_v36 = vld [vmem:[#allocation91_spill] sm:$0xff] }
 0x14a   :  { %1567 = vmatpush.bf16.msra.mxu0 %v7950_v2  ;;  %1580 = vmatpush.bf16.msra.mxu1 %v7951_v27  ;;  %v7959_v27 = vld [vmem:[#allocation93_spill] sm:$0xff] }
 0x14b   :  { %1593 = vmatpush.bf16.msra.mxu2 %v7952_v4  ;;  %1606 = vmatpush.bf16.msra.mxu3 %v7953_v25  ;;  %v7960_v4 = vld [vmem:[#allocation94_spill] sm:$0xff]  ;;  %v7961_v25 = vld [vmem:[#allocation95_spill] sm:$0xff] }
 0x14e   :  { %1568 = vmatpush.bf16.msra.mxu0 %v7954_v15  ;;  %1581 = vmatpush.bf16.msra.mxu1 %v7955_v31 }
 0x14f   :  { %1594 = vmatpush.bf16.msra.mxu2 %v7956_v48  ;;  %1607 = vmatpush.bf16.msra.mxu3 %v7957_v52 }
 0x152   :  { %1569 = vmatpush.bf16.msra.mxu0 %v5765_v62  ;;  %1582 = vmatpush.bf16.msra.mxu1 %v5771_v43  ;;  %v526_v43 = vld [vmem:[#allocation14] sm:$0xf] }
 0x153   :  { %1595 = vmatpush.bf16.msra.mxu2 %v7958_v36  ;;  %1608 = vmatpush.bf16.msra.mxu3 %v5780_v35  ;;  %v5994_v15 = vperm.slane %v526_v43, 2 }
 0x155   :  { %7964 = vst [vmem:[#allocation109_spill] sm:$0xff] %v5994_v15 }
 0x156   :  { %1570 = vmatpush.bf16.msra.mxu0 %v7959_v27  ;;  %1583 = vmatpush.bf16.msra.mxu1 %v7960_v4 }
 0x157   :  { %1596 = vmatpush.bf16.msra.mxu2 %v7961_v25  ;;  %1609 = vmatpush.bf16.msra.mxu3 %v5797_v33 }
 0x15a   :  { %1571 = vmatpush.bf16.msra.mxu0 %v5804_v61  ;;  %1584 = vmatpush.bf16.msra.mxu1 %v5807_v49 }
 0x15b   :  { %1597 = vmatpush.bf16.msra.mxu2 %v5809_v45  ;;  %1610 = vmatpush.bf16.msra.mxu3 %v5813_v6  ;;  %v5988_v45 = vperm.slane %v526_v43, 0  ;;  %v5990_v6 = vperm.slane %v526_v43, 1 }
 0x15d   :  { %7962 = vst [vmem:[#allocation107_spill] sm:$0xff] %v5988_v45 }
 0x15e   :  { %1572 = vmatpush.bf16.msra.mxu0 %v5818_v21  ;;  %1585 = vmatpush.bf16.msra.mxu1 %v5821_v24  ;;  %7963 = vst [vmem:[#allocation108_spill] sm:$0xff] %v5990_v6 }
 0x15f   :  { %1598 = vmatpush.bf16.msra.mxu2 %v5826_v19  ;;  %1611 = vmatpush.bf16.msra.mxu3 %v5830_v28  ;;  %v1002_v4 = vpop.f32.mrf.mxu0 }
 0x161   :  { %v1015_v25 = vpop.f32.mrf.mxu1 }
 0x164   :  { %v1028_v27 = vpop.f32.mrf.mxu2 }
 0x167   :  { %v1041_v33 = vpop.f32.mrf.mxu3  ;;  %v1004_v35 = vpop.f32.mrf.mxu0 }
 0x168   :  { %v5996_v35 = vperm.slane %v526_v43, 3 }
 0x169   :  { %v1017_v61 = vpop.f32.mrf.mxu1 }
 0x16a   :  { %7965 = vst [vmem:[#allocation110_spill] sm:$0xff] %v5996_v35 }
 0x16c   :  { %v1030_v36 = vpop.f32.mrf.mxu2 }
 0x16f   :  { %v1043_v49 = vpop.f32.mrf.mxu3 }
 0x19d   :  { %v1214_v21 = vpop.f32.mrf.mxu0  ;;  %v1227_v62 = vpop.f32.mrf.mxu1 }
 0x19e   :  { %v1215_v24 = vadd.f32 %v1214_v21, %v1002_v4  ;;  %v1228_v52 = vadd.f32 %v1227_v62, %v1015_v25 }
 0x1a0   :  { %v1266_v19 = vadd.f32 %v5988_v45, %v1215_v24  ;;  %v1267_v28 = vadd.f32 %v5990_v6, %v1228_v52 }
 0x1a2   :  { %v4531_v48 = vmul.f32 -1.442695, %v1266_v19  ;;  %v4532_v31 = vmul.f32 -1.442695, %v1267_v28 }
 0x1a4   :  { %4810 = vpow2.f32 %v4531_v48  ;;  %v1240_v61 = vpop.f32.mrf.mxu2  ;;  %v1253_v49 = vpop.f32.mrf.mxu3 }
 0x1a5   :  { %4812 = vpow2.f32 %v4532_v31  ;;  %v1241_v36 = vadd.f32 %v1240_v61, %v1028_v27  ;;  %v1254_v2 = vadd.f32 %v1253_v49, %v1041_v33  ;;  %v1216_v18 = vpop.f32.mrf.mxu0  ;;  %v1229_v3 = vpop.f32.mrf.mxu1  ;;  %v7967_v49 = vld [vmem:[#allocation90_spill] sm:$0xff] }
 0x1a7   :  { %v1268_v62 = vadd.f32 %v5994_v15, %v1241_v36  ;;  %v1269_v21 = vadd.f32 %v5996_v35, %v1254_v2  ;;  %v7966_v2 = vld [vmem:[#allocation88_spill] sm:$0xff] }
 0x1a9   :  { %v4533_v24 = vmul.f32 -1.442695, %v1268_v62  ;;  %v4534_v4 = vmul.f32 -1.442695, %v1269_v21 }
 0x1aa   :  { %v4811_v19 = vpop.eup %4810 }
 0x1ab   :  { %v4813_v28 = vpop.eup %4812  ;;  %v6000_v25 = vadd.f32 1.0, %v4811_v19  ;;  %4814 = vpow2.f32 %v4533_v24 }
 0x1ac   :  { %v6002_v43 = vadd.f32 1.0, %v4813_v28  ;;  %4816 = vpow2.f32 %v4534_v4  ;;  %v1242_v48 = vpop.f32.mrf.mxu2  ;;  %v1255_v31 = vpop.f32.mrf.mxu3 }
 0x1ad   :  { %4818 = vrcp.f32 %v6000_v25  ;;  %v1362_v33 = vpop.f32.mrf.mxu0  ;;  %v1375_v27 = vpop.f32.mrf.mxu1  ;;  %vm1291_vm8 = vweird.f32 %v6000_v25 }
 0x1ae   :  { %4820 = vrcp.f32 %v6002_v43  ;;  %v1409_v52 = vrot.slane %v1362_v33, 7  ;;  %v1410_v3 = vrot.slane %v1375_v27, 7  ;;  %vm1306_vm0 = vweird.f32 %v6002_v43 }
 0x1b0   :  { %v1417_v61 = vadd.f32 %v1409_v52, %v7966_v2  ;;  %v1418_v36 = vadd.f32 %v1410_v3, %v7967_v49  ;;  %v7968_v49 = vld [vmem:[#allocation98_spill] sm:$0xff] }
 0x1b1   :  { %v4815_v18 = vpop.eup %4814 }
 0x1b2   :  { %v4817_v62 = vpop.eup %4816  ;;  %v1284_v21 = vadd.f32 1.0, %v4815_v18  ;;  %v4536_v19 = vmul.f32 -1.442695, %v1417_v61  ;;  %v4537_v48 = vmul.f32 -1.442695, %v1418_v36  ;;  %v7969_v36 = vld [vmem:[#allocation96_spill] sm:$0xff] }
 0x1b3   :  { %v6008_v24 = vpop.eup %4818  ;;  %v6010_v4 = vadd.f32 1.0, %v4817_v62 }
 0x1b4   :  { %v6012_v28 = vpop.eup %4820  ;;  %4822 = vrcp.f32 %v1284_v21  ;;  %v1388_v31 = vpop.f32.mrf.mxu2  ;;  %v1287_v3 = vmul.f32 %v6008_v24, %v6000_v25  ;;  %vm1321_vm3 = vweird.f32 %v1284_v21  ;;  %vm1292_vm4 = vweird.f32 %v6008_v24 }
 0x1b5   :  { %v1401_v35 = vpop.f32.mrf.mxu3  ;;  %v1302_v33 = vmul.f32 %v6012_v28, %v6002_v43  ;;  %v1364_v27 = vpop.f32.mrf.mxu0  ;;  %4824 = vrcp.f32 %v6010_v4  ;;  %v1411_v18 = vrot.slane %v1388_v31, 7  ;;  %vm1307_vm2 = vweird.f32 %v6012_v28  ;;  %vm6055_vm9 = vmor %vm1291_vm8, %vm1292_vm4 }
 0x1b6   :  { %v1377_v52 = vpop.f32.mrf.mxu1  ;;  %v1412_v62 = vrot.slane %v1401_v35, 7  ;;  %4826 = vpow2.f32 %v4536_v19  ;;  %v1288_v45 = vsub.f32 1.0, %v1287_v3  ;;  %vm6044_vm6 = vmor %vm1306_vm0, %vm1307_vm2  ;;  %vm1336_vm12 = vweird.f32 %v6010_v4 }
 0x1b7   :  { %v1303_v61 = vsub.f32 1.0, %v1302_v33  ;;  %4828 = vpow2.f32 %v4537_v48  ;;  %v1419_v2 = vadd.f32 %v1411_v18, %v7968_v49  ;;  %v1327_v18 = vand.u32 2147483648, %v1284_v21 }
 0x1b8   :  { %v1420_v15 = vadd.f32 %v1412_v62, %v7969_v36  ;;  %v1289_v33 = vmul.f32 %v6008_v24, %v1288_v45 }
 0x1b9   :  { %v4538_v26 = vmul.f32 -1.442695, %v1419_v2  ;;  %v1304_v17 = vmul.f32 %v6012_v28, %v1303_v61  ;;  %v1325_v2 = vand.u32 2147483647, %v1284_v21 }
 0x1ba   :  { %v4823_v6 = vpop.eup %4822  ;;  %v4539_v16 = vmul.f32 -1.442695, %v1420_v15 }
 0x1bb   :  { %v1317_v27 = vmul.f32 %v4823_v6, %v1284_v21  ;;  %v6021_v52 = vpop.eup %4824  ;;  %4830 = vpow2.f32 %v4538_v26  ;;  %vm1322_vm1 = vweird.f32 %v4823_v6  ;;  %v1305_v26 = vadd.f32 %v6012_v28, %v1304_v17 }
 0x1bc   :  { %v1390_v5 = vpop.f32.mrf.mxu2  ;;  %v4827_v35 = vpop.eup %4826  ;;  %4832 = vpow2.f32 %v4539_v16  ;;  %v1332_v45 = vmul.f32 %v6021_v52, %v6010_v4  ;;  %v1310_v17 = vand.u32 2147483647, %v6002_v43  ;;  %vm1323_vm5 = vmor %vm1321_vm3, %vm1322_vm1  ;;  %vm1326_vm7 = vcmp.eq.f32.partialorder %v1325_v2, 8.507059e+37 }
 0x1bd   :  { %v1403_v31 = vpop.f32.mrf.mxu3  ;;  %v1318_v19 = vsub.f32 1.0, %v1317_v27  ;;  %v4829_v48 = vpop.eup %4828  ;;  %v6026_v62 = vadd.f32 1.0, %v4827_v35  ;;  %v1312_v5 = vand.u32 2147483648, %v6002_v43  ;;  %v1290_v27 = vadd.f32 %v6008_v24, %v1289_v33 }
 0x1be   :  { %v6028_v3 = vadd.f32 1.0, %v4829_v48  ;;  %v1328_v31 = vor.u32 1.1754944e-38, %v1327_v18  ;;  %v1297_v35 = vand.u32 2147483648, %v6000_v25  ;;  %v1309_v18 = vsel %vm6044_vm6, %v6012_v28, %v1305_v26 }
 0x1bf   :  { %v1319_v15 = vmul.f32 %v4823_v6, %v1318_v19  ;;  %4834 = vrcp.f32 %v6026_v62  ;;  %v1313_v49 = vor.u32 1.1754944e-38, %v1312_v5  ;;  %vm1311_vm10 = vcmp.eq.f32.partialorder %v1310_v17, 8.507059e+37  ;;  %v530_v5 = vld [vmem:[#allocation7 + $0x1] sm:$0x1] }
 0x1c0   :  { %4836 = vrcp.f32 %v6028_v3  ;;  %v1298_v26 = vor.u32 1.1754944e-38, %v1297_v35  ;;  %vm1337_vm13 = vweird.f32 %v6021_v52  ;;  %vm1457_vm15 = vweird.f32 %v6028_v3 }
 0x1c1   :  { %v1320_v61 = vadd.f32 %v4823_v6, %v1319_v15  ;;  %v4831_v16 = vpop.eup %4830  ;;  %v1295_v15 = vand.u32 2147483647, %v6000_v25  ;;  %v1294_v25 = vsel %vm6055_vm9, %v6008_v24, %v1290_v27  ;;  %v1340_v27 = vand.u32 2147483647, %v6010_v4  ;;  %vm6099_vm2 = vmor %vm1336_vm12, %vm1337_vm13 }
 0x1c2   :  { %v6048_v48 = vadd.f32 1.0, %v4831_v16  ;;  %v4833_v33 = vpop.eup %4832  ;;  %v1314_v16 = vsel %vm1311_vm10, %v1313_v49, %v1309_v18  ;;  %vm1442_vm6 = vweird.f32 %v6026_v62 }
 0x1c3   :  { %v1324_v19 = vsel %vm1323_vm5, %v4823_v6, %v1320_v61  ;;  %v1333_v6 = vsub.f32 1.0, %v1332_v45  ;;  %v6065_v61 = vadd.f32 1.0, %v4833_v33  ;;  %vm1296_vm11 = vcmp.eq.f32.partialorder %v1295_v15, 8.507059e+37 }
 0x1c4   :  { %v1329_v36 = vsel %vm1326_vm7, %v1328_v31, %v1324_v19  ;;  %4838 = vrcp.f32 %v6048_v48  ;;  %v1299_v21 = vsel %vm1296_vm11, %v1298_v26, %v1294_v25  ;;  %v1348_v35 = vmul.f32 %v1314_v16, %v530_v5 }
 0x1c5   :  { %v1346_v10 = vmul.f32 2.0, %v1329_v36  ;;  %v6060_v2 = vpop.eup %4834  ;;  %4840 = vrcp.f32 %v6065_v61  ;;  %v1334_v24 = vmul.f32 %v6021_v52, %v1333_v6  ;;  %v1342_v33 = vand.u32 2147483648, %v6010_v4 }
 0x1c6   :  { %v6067_v28 = vpop.eup %4836  ;;  %v1438_v36 = vmul.f32 %v6060_v2, %v6026_v62  ;;  %vm6087_vm14 = vcmp.eq.f32.partialorder %v1340_v27, 8.507059e+37  ;;  %v1461_v27 = vand.u32 2147483647, %v6028_v3  ;;  %vm1443_vm3 = vweird.f32 %v6060_v2 }
 0x1c7   :  { %v4535_v31 = vadd.f32 -1.0, %v1346_v10  ;;  %v1453_v45 = vmul.f32 %v6067_v28, %v6028_v3  ;;  %v1335_v7 = vadd.f32 %v6021_v52, %v1334_v24  ;;  %vm1458_vm0 = vweird.f32 %v6067_v28  ;;  %vm1444_vm9 = vmor %vm1442_vm6, %vm1443_vm3 }
 0x1c8   :  { %v1439_v17 = vsub.f32 1.0, %v1438_v36  ;;  %v1343_v36 = vor.u32 1.1754944e-38, %v1342_v33  ;;  %vm6114_vm4 = vmor %vm1457_vm15, %vm1458_vm0  ;;  %vm1472_vm5 = vweird.f32 %v6048_v48  ;;  %vm1462_vm10 = vcmp.eq.f32.partialorder %v1461_v27, 8.507059e+37 }
 0x1c9   :  { %v1454_v19 = vsub.f32 1.0, %v1453_v45  ;;  %v1349_v49 = vmul.f32 %v4535_v31, %v1299_v21  ;;  %v1478_v31 = vand.u32 2147483648, %v6048_v48  ;;  %v1476_v21 = vand.u32 2147483647, %v6048_v48 }
 0x1ca   :  { %v4839_v10 = vpop.eup %4838  ;;  %v1440_v25 = vmul.f32 %v6060_v2, %v1439_v17  ;;  %v1463_v17 = vand.u32 2147483648, %v6028_v3  ;;  %vm1487_vm13 = vweird.f32 %v6065_v61 }
 0x1cb   :  { %v1455_v18 = vmul.f32 %v6067_v28, %v1454_v19  ;;  %v1468_v15 = vmul.f32 %v4839_v10, %v6048_v48  ;;  %v6079_v43 = vadd.f32 %v1349_v49, %v1348_v35  ;;  %v6084_v6 = vpop.eup %4840  ;;  %vm1473_vm1 = vweird.f32 %v4839_v10 }
 0x1cc   :  { %v1483_v19 = vmul.f32 %v6084_v6, %v6065_v61  ;;  %v1339_v35 = vsel %vm6099_vm2, %v6021_v52, %v1335_v7  ;;  %v1441_v49 = vadd.f32 %v6060_v2, %v1440_v25  ;;  %vm1474_vm7 = vmor %vm1472_vm5, %vm1473_vm1  ;;  %v1479_v7 = vor.u32 1.1754944e-38, %v1478_v31 }
 0x1cd   :  { %7974 = vst [vmem:[#allocation111_spill] sm:$0xff] %v6079_v43  ;;  %v1469_v26 = vsub.f32 1.0, %v1468_v15  ;;  %4842 = vtanh.f32 %v6079_v43  ;;  %v1456_v5 = vadd.f32 %v6067_v28, %v1455_v18  ;;  %v1446_v18 = vand.u32 2147483647, %v6026_v62 }
 0x1ce   :  { %v1448_v15 = vand.u32 2147483648, %v6026_v62  ;;  %vm1477_vm8 = vcmp.eq.f32.partialorder %v1476_v21, 8.507059e+37  ;;  %v1464_v48 = vor.u32 1.1754944e-38, %v1463_v17  ;;  %v1484_v24 = vsub.f32 1.0, %v1483_v19 }
 0x1cf   :  { %v1470_v45 = vmul.f32 %v4839_v10, %v1469_v26  ;;  %v1460_v3 = vsel %vm6114_vm4, %v6067_v28, %v1456_v5  ;;  %v1344_v26 = vsel %vm6087_vm14, %v1343_v36, %v1339_v35  ;;  %v1445_v62 = vsel %vm1444_vm9, %v6060_v2, %v1441_v49  ;;  %v7982_v35 = vld [vmem:[#allocation28_spill] sm:$0xff] }
 0x1d0   :  { %v1449_v13 = vor.u32 1.1754944e-38, %v1448_v15  ;;  %v1465_v32 = vsel %vm1462_vm10, %v1464_v48, %v1460_v3  ;;  %vm1447_vm11 = vcmp.eq.f32.partialorder %v1446_v18, 8.507059e+37  ;;  %v1485_v5 = vmul.f32 %v6084_v6, %v1484_v24  ;;  %v7987_v3 = vld [vmem:[#allocation33_spill] sm:$0xff]  ;;  %v7990_v48 = vld [vmem:[#allocation36_spill] sm:$0xff]  ;;  %v7992_v24 = vld [vmem:[#allocation38_spill] sm:$0xff] }
 0x1d1   :  { %v1471_v33 = vadd.f32 %v4839_v10, %v1470_v45  ;;  %vm1488_vm12 = vweird.f32 %v6084_v6 }
 0x1d2   :  { %v1450_v36 = vsel %vm1447_vm11, %v1449_v13, %v1445_v62  ;;  %v1491_v13 = vand.u32 2147483647, %v6065_v61  ;;  %vm1489_vm14 = vmor %vm1487_vm13, %vm1488_vm12  ;;  %v7993_v62 = vld [vmem:[#allocation50_spill] sm:$0xff] }
 0x1d3   :  { %v4843_v52 = vpop.eup %4842  ;;  %v1475_v25 = vsel %vm1474_vm7, %v4839_v10, %v1471_v33  ;;  %v1500_v10 = vrot.slane %v5912_v20, 7  ;;  %v1486_v20 = vadd.f32 %v6084_v6, %v1485_v5  ;;  %v7984_v33 = vld [vmem:[#allocation30_spill] sm:$0xff]  ;;  %v7999_v5 = vld [vmem:[#allocation56_spill] sm:$0xff] }
 0x1d4   :  { %v1480_v45 = vsel %vm1477_vm8, %v1479_v7, %v1475_v25  ;;  %v6128_v43 = vmul.f32 %v4843_v52, %v1344_v26  ;;  %vm1492_vm15 = vcmp.eq.f32.partialorder %v1491_v13, 8.507059e+37  ;;  %v7985_v7 = vld [vmem:[#allocation31_spill] sm:$0xff]  ;;  %v7986_v52 = vld [vmem:[#allocation32_spill] sm:$0xff]  ;;  %v8004_v13 = vld [vmem:[#allocation61_spill] sm:$0xff] }
 0x1d5   :  { %v1497_v31 = vmul.f32 2.0, %v1480_v45  ;;  %v1502_v21 = vmul.f32 %v1500_v10, %v1465_v32  ;;  %v1493_v32 = vand.u32 2147483648, %v6065_v61  ;;  %v1490_v27 = vsel %vm1489_vm14, %v6084_v6, %v1486_v20  ;;  %v7983_v61 = vld [vmem:[#allocation29_spill] sm:$0xff]  ;;  %v7988_v6 = vld [vmem:[#allocation34_spill] sm:$0xff]  ;;  %v7989_v26 = vld [vmem:[#allocation35_spill] sm:$0xff] }
 0x1d6   :  { %7981 = vst [vmem:[#allocation112_spill] sm:$0xff] %v6128_v43  ;;  %v1508_v28 = vpack.c.bf16 %v6128_v43, %v6128_v43  ;;  %v7991_v45 = vld [vmem:[#allocation37_spill] sm:$0xff]  ;;  %v8002_v20 = vld [vmem:[#allocation59_spill] sm:$0xff] }
 0x1d7   :  { %v4540_v16 = vadd.f32 -1.0, %v1497_v31  ;;  %v1494_v19 = vor.u32 1.1754944e-38, %v1493_v32  ;;  %v7994_v31 = vld [vmem:[#allocation51_spill] sm:$0xff]  ;;  %v7996_v10 = vld [vmem:[#allocation53_spill] sm:$0xff]  ;;  %v8003_v32 = vld [vmem:[#allocation60_spill] sm:$0xff] }
 0x1d8   :  { %1517 = vmatmul.bf16.vlgmr.msrb.gmra.mxu0 %v1508_v28  ;;  %1530 = vmatmul.bf16.vlgmr.msrb.gmra.mxu1 %v1508_v28  ;;  %v8012_v43 = vld [vmem:[#allocation71_spill] sm:$0xff] }
 0x1d9   :  { %v1503_v17 = vmul.f32 %v4540_v16, %v1450_v36  ;;  %1543 = vmatmul.bf16.vlgmr.msrb.gmra.mxu2 %v1508_v28  ;;  %1556 = vmatmul.bf16.vlgmr.msrb.gmra.mxu3 %v1508_v28  ;;  %v1495_v4 = vsel %vm1492_vm15, %v1494_v19, %v1490_v27  ;;  %v7995_v28 = vld [vmem:[#allocation52_spill] sm:$0xff]  ;;  %v7997_v16 = vld [vmem:[#allocation54_spill] sm:$0xff]  ;;  %v7998_v36 = vld [vmem:[#allocation55_spill] sm:$0xff] }
 0x1da   :  { %1704 = vmatpush.bf16.msrb.mxu0 %v5511_v40  ;;  %1717 = vmatpush.bf16.msrb.mxu1 %v5513_v41  ;;  %v8005_v27 = vld [vmem:[#allocation62_spill] sm:$0xff]  ;;  %v8006_v19 = vld [vmem:[#allocation63_spill] sm:$0xff] }
 0x1db   :  { %v6137_v2 = vadd.f32 %v1503_v17, %v1502_v21  ;;  %1730 = vmatpush.bf16.msrb.mxu2 %v5515_v42  ;;  %1743 = vmatpush.bf16.msrb.mxu3 %v5517_v46  ;;  %v8000_v21 = vld [vmem:[#allocation57_spill] sm:$0xff]  ;;  %v8001_v17 = vld [vmem:[#allocation58_spill] sm:$0xff] }
 0x1dd   :  { %4844 = vtanh.f32 %v6137_v2 }
 0x1de   :  { %1705 = vmatpush.bf16.msrb.mxu0 %v5520_v53  ;;  %1718 = vmatpush.bf16.msrb.mxu1 %v5524_v54 }
 0x1df   :  { %1731 = vmatpush.bf16.msrb.mxu2 %v5526_v55  ;;  %1744 = vmatpush.bf16.msrb.mxu3 %v5529_v59 }
 0x1e2   :  { %1706 = vmatpush.bf16.msrb.mxu0 %v5532_v1  ;;  %1719 = vmatpush.bf16.msrb.mxu1 %v7982_v35 }
 0x1e3   :  { %v4845_v49 = vpop.eup %4844  ;;  %1732 = vmatpush.bf16.msrb.mxu2 %v7983_v61  ;;  %1745 = vmatpush.bf16.msrb.mxu3 %v7984_v33 }
 0x1e4   :  { %v1506_v18 = vmul.f32 %v4845_v49, %v1495_v4  ;;  %v8007_v49 = vld [vmem:[#allocation64_spill] sm:$0xff]  ;;  %v8008_v4 = vld [vmem:[#allocation65_spill] sm:$0xff] }
 0x1e6   :  { %v1507_v15 = vpack.c.bf16 %v1506_v18, %v1506_v18  ;;  %1707 = vmatpush.bf16.msrb.mxu0 %v7985_v7  ;;  %1720 = vmatpush.bf16.msrb.mxu1 %v7986_v52  ;;  %v8009_v18 = vld [vmem:[#allocation66_spill] sm:$0xff] }
 0x1e7   :  { %1733 = vmatpush.bf16.msrb.mxu2 %v7987_v3  ;;  %1746 = vmatpush.bf16.msrb.mxu3 %v7988_v6 }
 0x1e8   :  { %v1562_v25 = vshrl.u32 %v1507_v15, 16  ;;  %v8010_v15 = vld [vmem:[#allocation67_spill] sm:$0xff] }
 0x1ea   :  { %1573 = vmatmul.bf16.vlgmr.msra.gmra.mxu0 %v1562_v25  ;;  %1586 = vmatmul.bf16.vlgmr.msra.gmra.mxu1 %v1562_v25 }
 0x1eb   :  { %1599 = vmatmul.bf16.vlgmr.msra.gmra.mxu2 %v1562_v25  ;;  %1612 = vmatmul.bf16.vlgmr.msra.gmra.mxu3 %v1562_v25 }
 0x1ec   :  { %1708 = vmatpush.bf16.msrb.mxu0 %v7989_v26  ;;  %1721 = vmatpush.bf16.msrb.mxu1 %v7990_v48 }
 0x1ed   :  { %1734 = vmatpush.bf16.msrb.mxu2 %v7991_v45  ;;  %1747 = vmatpush.bf16.msrb.mxu3 %v7992_v24 }
 0x1f0   :  { %1709 = vmatpush.bf16.msrb.mxu0 %v5568_v37  ;;  %1722 = vmatpush.bf16.msrb.mxu1 %v5572_v38 }
 0x1f1   :  { %1735 = vmatpush.bf16.msrb.mxu2 %v5574_v39  ;;  %1748 = vmatpush.bf16.msrb.mxu3 %v5577_v47 }
 0x1f4   :  { %1710 = vmatpush.bf16.msrb.mxu0 %v5580_v56  ;;  %1723 = vmatpush.bf16.msrb.mxu1 %v5584_v57 }
 0x1f5   :  { %1736 = vmatpush.bf16.msrb.mxu2 %v5586_v58  ;;  %1749 = vmatpush.bf16.msrb.mxu3 %v5589_v63 }
 0x1f8   :  { %1711 = vmatpush.bf16.msrb.mxu0 %v5592_v9  ;;  %1724 = vmatpush.bf16.msrb.mxu1 %v5596_v11 }
 0x1f9   :  { %1737 = vmatpush.bf16.msrb.mxu2 %v5598_v12  ;;  %1750 = vmatpush.bf16.msrb.mxu3 %v5601_v14 }
 0x1fb   :  { %1712 = vmatmul.bf16.vlgmr.msrb.gmra.mxu0 %v1562_v25  ;;  %1725 = vmatmul.bf16.vlgmr.msrb.gmra.mxu1 %v1562_v25 }
 0x1fc   :  { %1860 = vmatpush.bf16.msra.mxu0 %v5607_v22  ;;  %1873 = vmatpush.bf16.msra.mxu1 %v5609_v29 }
 0x1fd   :  { %1738 = vmatmul.bf16.vlgmr.msrb.gmra.mxu2 %v1562_v25  ;;  %1751 = vmatmul.bf16.vlgmr.msrb.gmra.mxu3 %v1562_v25  ;;  %v8011_v25 = vld [vmem:[#allocation68_spill] sm:$0xff] }
 0x1fe   :  { %1886 = vmatpush.bf16.msra.mxu2 %v5611_v30  ;;  %1899 = vmatpush.bf16.msra.mxu3 %v5614_v34 }
 0x200   :  { %1861 = vmatpush.bf16.msra.mxu0 %v5618_v44  ;;  %1874 = vmatpush.bf16.msra.mxu1 %v5621_v50 }
 0x202   :  { %1887 = vmatpush.bf16.msra.mxu2 %v5623_v51  ;;  %1900 = vmatpush.bf16.msra.mxu3 %v7917_v0 }
 0x204   :  { %1862 = vmatpush.bf16.msra.mxu0 %v7918_v60  ;;  %1875 = vmatpush.bf16.msra.mxu1 %v7919_v23  ;;  %v8049_v60 = vld [vmem:[#allocation110_spill] sm:$0xff] }
 0x206   :  { %1888 = vmatpush.bf16.msra.mxu2 %v7920_v8  ;;  %1901 = vmatpush.bf16.msra.mxu3 %v7993_v62 }
 0x208   :  { %1863 = vmatpush.bf16.msra.mxu0 %v7994_v31  ;;  %1876 = vmatpush.bf16.msra.mxu1 %v7995_v28  ;;  %v8047_v28 = vld [vmem:[#allocation108_spill] sm:$0xff] }
 0x20a   :  { %1889 = vmatpush.bf16.msra.mxu2 %v7996_v10  ;;  %1902 = vmatpush.bf16.msra.mxu3 %v7997_v16  ;;  %v8046_v10 = vld [vmem:[#allocation107_spill] sm:$0xff] }
 0x20c   :  { %1864 = vmatpush.bf16.msra.mxu0 %v7998_v36  ;;  %1877 = vmatpush.bf16.msra.mxu1 %v7999_v5 }
 0x20e   :  { %1890 = vmatpush.bf16.msra.mxu2 %v8000_v21  ;;  %1903 = vmatpush.bf16.msra.mxu3 %v8001_v17 }
 0x210   :  { %1865 = vmatpush.bf16.msra.mxu0 %v8002_v20  ;;  %1878 = vmatpush.bf16.msra.mxu1 %v8003_v32  ;;  %v8013_v20 = vld [vmem:[#allocation72_spill] sm:$0xff]  ;;  %v8014_v32 = vld [vmem:[#allocation69_spill] sm:$0xff] }
 0x212   :  { %1891 = vmatpush.bf16.msra.mxu2 %v8004_v13  ;;  %1904 = vmatpush.bf16.msra.mxu3 %v8005_v27  ;;  %v8015_v13 = vld [vmem:[#allocation70_spill] sm:$0xff]  ;;  %v8016_v27 = vld [vmem:[#allocation73_spill] sm:$0xff] }
 0x214   :  { %1866 = vmatpush.bf16.msra.mxu0 %v8006_v19  ;;  %1879 = vmatpush.bf16.msra.mxu1 %v8007_v49  ;;  %v8017_v19 = vld [vmem:[#allocation74_spill] sm:$0xff]  ;;  %v8018_v49 = vld [vmem:[#allocation75_spill] sm:$0xff] }
 0x216   :  { %1892 = vmatpush.bf16.msra.mxu2 %v8008_v4  ;;  %1905 = vmatpush.bf16.msra.mxu3 %v8009_v18  ;;  %v8019_v4 = vld [vmem:[#allocation76_spill] sm:$0xff]  ;;  %v8020_v18 = vld [vmem:[#allocation77_spill] sm:$0xff] }
 0x218   :  { %1867 = vmatpush.bf16.msra.mxu0 %v8010_v15  ;;  %1880 = vmatpush.bf16.msra.mxu1 %v8011_v25  ;;  %v8021_v15 = vld [vmem:[#allocation78_spill] sm:$0xff]  ;;  %v8022_v25 = vld [vmem:[#allocation79_spill] sm:$0xff] }
 0x21a   :  { %1893 = vmatpush.bf16.msra.mxu2 %v8014_v32  ;;  %1906 = vmatpush.bf16.msra.mxu3 %v8015_v13  ;;  %v8025_v32 = vld [vmem:[#allocation82_spill] sm:$0xff]  ;;  %v8026_v13 = vld [vmem:[#allocation83_spill] sm:$0xff] }
 0x21c   :  { %1915 = vmatpush.bf16.msrb.mxu0 %v8012_v43  ;;  %1928 = vmatpush.bf16.msrb.mxu1 %v8013_v20  ;;  %v8023_v43 = vld [vmem:[#allocation80_spill] sm:$0xff]  ;;  %v8024_v20 = vld [vmem:[#allocation81_spill] sm:$0xff] }
 0x21e   :  { %1941 = vmatpush.bf16.msrb.mxu2 %v8016_v27  ;;  %1954 = vmatpush.bf16.msrb.mxu3 %v8017_v19  ;;  %v8027_v27 = vld [vmem:[#allocation84_spill] sm:$0xff]  ;;  %v8028_v19 = vld [vmem:[#allocation85_spill] sm:$0xff] }
 0x220   :  { %1916 = vmatpush.bf16.msrb.mxu0 %v8018_v49  ;;  %1929 = vmatpush.bf16.msrb.mxu1 %v8019_v4  ;;  %v8029_v49 = vld [vmem:[#allocation86_spill] sm:$0xff]  ;;  %v8030_v4 = vld [vmem:[#allocation87_spill] sm:$0xff] }
 0x222   :  { %1942 = vmatpush.bf16.msrb.mxu2 %v8020_v18  ;;  %1955 = vmatpush.bf16.msrb.mxu3 %v8021_v15  ;;  %v8031_v18 = vld [vmem:[#allocation89_spill] sm:$0xff]  ;;  %v8032_v15 = vld [vmem:[#allocation91_spill] sm:$0xff] }
 0x224   :  { %1917 = vmatpush.bf16.msrb.mxu0 %v8022_v25  ;;  %1930 = vmatpush.bf16.msrb.mxu1 %v8023_v43  ;;  %v8033_v25 = vld [vmem:[#allocation92_spill] sm:$0xff]  ;;  %v8034_v43 = vld [vmem:[#allocation93_spill] sm:$0xff] }
 0x226   :  { %1943 = vmatpush.bf16.msrb.mxu2 %v8024_v20  ;;  %1956 = vmatpush.bf16.msrb.mxu3 %v8025_v32  ;;  %v8035_v20 = vld [vmem:[#allocation94_spill] sm:$0xff]  ;;  %v8036_v32 = vld [vmem:[#allocation95_spill] sm:$0xff] }
 0x228   :  { %1918 = vmatpush.bf16.msrb.mxu0 %v8026_v13  ;;  %1931 = vmatpush.bf16.msrb.mxu1 %v8027_v27  ;;  %v8037_v13 = vld [vmem:[#allocation97_spill] sm:$0xff]  ;;  %v8038_v27 = vld [vmem:[#allocation99_spill] sm:$0xff] }
 0x22a   :  { %1944 = vmatpush.bf16.msrb.mxu2 %v8028_v19  ;;  %1957 = vmatpush.bf16.msrb.mxu3 %v8029_v49  ;;  %v8039_v19 = vld [vmem:[#allocation100_spill] sm:$0xff]  ;;  %v8040_v49 = vld [vmem:[#allocation101_spill] sm:$0xff] }
 0x22c   :  { %1919 = vmatpush.bf16.msrb.mxu0 %v8030_v4  ;;  %1932 = vmatpush.bf16.msrb.mxu1 %v8031_v18  ;;  %v8041_v4 = vld [vmem:[#allocation102_spill] sm:$0xff]  ;;  %v8042_v18 = vld [vmem:[#allocation103_spill] sm:$0xff] }
 0x22e   :  { %1945 = vmatpush.bf16.msrb.mxu2 %v8032_v15  ;;  %1958 = vmatpush.bf16.msrb.mxu3 %v8033_v25  ;;  %v8043_v15 = vld [vmem:[#allocation104_spill] sm:$0xff]  ;;  %v8044_v25 = vld [vmem:[#allocation105_spill] sm:$0xff] }
 0x230   :  { %1920 = vmatpush.bf16.msrb.mxu0 %v8034_v43  ;;  %1933 = vmatpush.bf16.msrb.mxu1 %v8035_v20  ;;  %v8045_v43 = vld [vmem:[#allocation106_spill] sm:$0xff] }
 0x232   :  { %1946 = vmatpush.bf16.msrb.mxu2 %v8036_v32  ;;  %1959 = vmatpush.bf16.msrb.mxu3 %v8037_v13 }
 0x234   :  { %1921 = vmatpush.bf16.msrb.mxu0 %v8038_v27  ;;  %1934 = vmatpush.bf16.msrb.mxu1 %v8039_v19 }
 0x236   :  { %1947 = vmatpush.bf16.msrb.mxu2 %v8040_v49  ;;  %1960 = vmatpush.bf16.msrb.mxu3 %v8041_v4 }
 0x238   :  { %1922 = vmatpush.bf16.msrb.mxu0 %v8042_v18  ;;  %1935 = vmatpush.bf16.msrb.mxu1 %v8043_v15 }
 0x23a   :  { %1948 = vmatpush.bf16.msrb.mxu2 %v8044_v25  ;;  %1961 = vmatpush.bf16.msrb.mxu3 %v8045_v43 }
 0x255   :  { %v1518_v20 = vpop.f32.mrf.mxu0  ;;  %v1531_v32 = vpop.f32.mrf.mxu1 }
 0x25c   :  { %v1544_v17 = vpop.f32.mrf.mxu2  ;;  %v1557_v13 = vpop.f32.mrf.mxu3 }
 0x25d   :  { %v1520_v21 = vpop.f32.mrf.mxu0  ;;  %v1533_v27 = vpop.f32.mrf.mxu1 }
 0x264   :  { %v1546_v5 = vpop.f32.mrf.mxu2  ;;  %v1559_v19 = vpop.f32.mrf.mxu3 }
 0x265   :  { %v8048_v5 = vld [vmem:[#allocation109_spill] sm:$0xff] }
 0x267   :  { %v1574_v36 = vpop.f32.mrf.mxu0  ;;  %v1587_v49 = vpop.f32.mrf.mxu1 }
 0x268   :  { %v1575_v16 = vadd.f32 %v1574_v36, %v1518_v20  ;;  %v1588_v4 = vadd.f32 %v1587_v49, %v1531_v32 }
 0x26a   :  { %v1617_v18 = vadd.f32 %v1575_v16, %v8046_v10  ;;  %v1618_v15 = vadd.f32 %v1588_v4, %v8047_v28 }
 0x26c   :  { %v4541_v31 = vmul.f32 -1.442695, %v1617_v18  ;;  %v4542_v25 = vmul.f32 -1.442695, %v1618_v15  ;;  %v8051_v15 = vld [vmem:[#allocation90_spill] sm:$0xff] }
 0x26e   :  { %4846 = vpow2.f32 %v4541_v31  ;;  %v1600_v43 = vpop.f32.mrf.mxu2  ;;  %v1613_v62 = vpop.f32.mrf.mxu3 }
 0x26f   :  { %4848 = vpow2.f32 %v4542_v25  ;;  %v1601_v8 = vadd.f32 %v1600_v43, %v1544_v17  ;;  %v1614_v23 = vadd.f32 %v1613_v62, %v1557_v13  ;;  %v1576_v21 = vpop.f32.mrf.mxu0  ;;  %v1589_v27 = vpop.f32.mrf.mxu1 }
 0x271   :  { %v1619_v19 = vadd.f32 %v1601_v8, %v8048_v5  ;;  %v1620_v0 = vadd.f32 %v1614_v23, %v8049_v60 }
 0x273   :  { %v4543_v36 = vmul.f32 -1.442695, %v1619_v19  ;;  %v4544_v20 = vmul.f32 -1.442695, %v1620_v0  ;;  %v8050_v0 = vld [vmem:[#allocation88_spill] sm:$0xff] }
 0x274   :  { %v4847_v32 = vpop.eup %4846 }
 0x275   :  { %v4849_v16 = vpop.eup %4848  ;;  %v6244_v49 = vadd.f32 1.0, %v4847_v32  ;;  %4850 = vpow2.f32 %v4543_v36 }
 0x276   :  { %v6246_v4 = vadd.f32 1.0, %v4849_v16  ;;  %4852 = vpow2.f32 %v4544_v20  ;;  %v1602_v31 = vpop.f32.mrf.mxu2  ;;  %v1615_v18 = vpop.f32.mrf.mxu3 }
 0x277   :  { %4854 = vrcp.f32 %v6244_v49  ;;  %vm1642_vm8 = vweird.f32 %v6244_v49 }
 0x278   :  { %4856 = vrcp.f32 %v6246_v4  ;;  %v1713_v43 = vpop.f32.mrf.mxu0  ;;  %v1726_v8 = vpop.f32.mrf.mxu1  ;;  %vm1657_vm0 = vweird.f32 %v6246_v4 }
 0x279   :  { %v1760_v62 = vrot.slane %v1713_v43, 6  ;;  %v1761_v23 = vrot.slane %v1726_v8, 6 }
 0x27b   :  { %v4851_v17 = vpop.eup %4850  ;;  %v1768_v13 = vadd.f32 %v1760_v62, %v8050_v0  ;;  %v1769_v25 = vadd.f32 %v1761_v23, %v8051_v15  ;;  %v8052_v15 = vld [vmem:[#allocation98_spill] sm:$0xff] }
 0x27c   :  { %v4853_v21 = vpop.eup %4852  ;;  %v1635_v27 = vadd.f32 1.0, %v4851_v17 }
 0x27d   :  { %v6252_v19 = vpop.eup %4854  ;;  %v6254_v36 = vadd.f32 1.0, %v4853_v21  ;;  %v4546_v20 = vmul.f32 -1.442695, %v1768_v13  ;;  %v4547_v16 = vmul.f32 -1.442695, %v1769_v25  ;;  %v8053_v25 = vld [vmem:[#allocation96_spill] sm:$0xff] }
 0x27e   :  { %v6256_v32 = vpop.eup %4856  ;;  %4858 = vrcp.f32 %v1635_v27  ;;  %v1638_v8 = vmul.f32 %v6252_v19, %v6244_v49  ;;  %vm1672_vm3 = vweird.f32 %v1635_v27  ;;  %vm1643_vm4 = vweird.f32 %v6252_v19 }
 0x27f   :  { %v1653_v31 = vmul.f32 %v6256_v32, %v6246_v4  ;;  %4860 = vrcp.f32 %v6254_v36  ;;  %vm1658_vm2 = vweird.f32 %v6256_v32  ;;  %vm6299_vm9 = vmor %vm1642_vm8, %vm1643_vm4  ;;  %vm1687_vm12 = vweird.f32 %v6254_v36 }
 0x280   :  { %v1739_v18 = vpop.f32.mrf.mxu2  ;;  %v1752_v43 = vpop.f32.mrf.mxu3  ;;  %4862 = vpow2.f32 %v4546_v20  ;;  %v1639_v28 = vsub.f32 1.0, %v1638_v8  ;;  %vm6288_vm6 = vmor %vm1657_vm0, %vm1658_vm2 }
 0x281   :  { %v1762_v62 = vrot.slane %v1739_v18, 6  ;;  %v1763_v23 = vrot.slane %v1752_v43, 6  ;;  %v1715_v17 = vpop.f32.mrf.mxu0  ;;  %v1728_v21 = vpop.f32.mrf.mxu1  ;;  %v1654_v13 = vsub.f32 1.0, %v1653_v31  ;;  %4864 = vpow2.f32 %v4547_v16 }
 0x283   :  { %v1770_v0 = vadd.f32 %v1762_v62, %v8052_v15  ;;  %v1771_v60 = vadd.f32 %v1763_v23, %v8053_v25  ;;  %v1655_v34 = vmul.f32 %v6256_v32, %v1654_v13  ;;  %v1640_v62 = vmul.f32 %v6252_v19, %v1639_v28 }
 0x284   :  { %v4859_v5 = vpop.eup %4858  ;;  %v1678_v23 = vand.u32 2147483648, %v1635_v27 }
 0x285   :  { %v4548_v10 = vmul.f32 -1.442695, %v1770_v0  ;;  %v4549_v51 = vmul.f32 -1.442695, %v1771_v60  ;;  %v1668_v50 = vmul.f32 %v4859_v5, %v1635_v27  ;;  %v6265_v44 = vpop.eup %4860  ;;  %vm1673_vm1 = vweird.f32 %v4859_v5 }
 0x286   :  { %v4863_v18 = vpop.eup %4862  ;;  %v1676_v0 = vand.u32 2147483647, %v1635_v27  ;;  %v1683_v28 = vmul.f32 %v6265_v44, %v6254_v36  ;;  %v1641_v13 = vadd.f32 %v6252_v19, %v1640_v62  ;;  %vm1674_vm5 = vmor %vm1672_vm3, %vm1673_vm1  ;;  %v1646_v62 = vand.u32 2147483647, %v6244_v49 }
 0x287   :  { %4866 = vpow2.f32 %v4548_v10  ;;  %v1669_v20 = vsub.f32 1.0, %v1668_v50  ;;  %v4865_v43 = vpop.eup %4864  ;;  %v6270_v17 = vadd.f32 1.0, %v4863_v18  ;;  %v1656_v10 = vadd.f32 %v6256_v32, %v1655_v34 }
 0x288   :  { %v1741_v31 = vpop.f32.mrf.mxu2  ;;  %v1754_v16 = vpop.f32.mrf.mxu3  ;;  %4868 = vpow2.f32 %v4549_v51  ;;  %v6272_v8 = vadd.f32 1.0, %v4865_v43  ;;  %v1663_v50 = vand.u32 2147483648, %v6246_v4  ;;  %v1661_v34 = vand.u32 2147483647, %v6246_v4 }
 0x289   :  { %v1670_v60 = vmul.f32 %v4859_v5, %v1669_v20  ;;  %4870 = vrcp.f32 %v6270_v17  ;;  %v1679_v18 = vor.u32 1.1754944e-38, %v1678_v23  ;;  %v1648_v20 = vand.u32 2147483648, %v6244_v49 }
 0x28a   :  { %4872 = vrcp.f32 %v6272_v8  ;;  %vm1677_vm7 = vcmp.eq.f32.partialorder %v1676_v0, 8.507059e+37  ;;  %v1660_v23 = vsel %vm6288_vm6, %v6256_v32, %v1656_v10  ;;  %v1664_v25 = vor.u32 1.1754944e-38, %v1663_v50 }
 0x28b   :  { %v1671_v21 = vadd.f32 %v4859_v5, %v1670_v60  ;;  %v1645_v49 = vsel %vm6299_vm9, %v6252_v19, %v1641_v13  ;;  %vm1662_vm10 = vcmp.eq.f32.partialorder %v1661_v34, 8.507059e+37  ;;  %v1649_v10 = vor.u32 1.1754944e-38, %v1648_v20 }
 0x28c   :  { %vm1647_vm11 = vcmp.eq.f32.partialorder %v1646_v62, 8.507059e+37  ;;  %v1691_v13 = vand.u32 2147483647, %v6254_v36  ;;  %vm1688_vm13 = vweird.f32 %v6265_v44  ;;  %vm1808_vm15 = vweird.f32 %v6272_v8 }
 0x28d   :  { %v4867_v51 = vpop.eup %4866  ;;  %v1675_v31 = vsel %vm1674_vm5, %v4859_v5, %v1671_v21  ;;  %v1684_v5 = vsub.f32 1.0, %v1683_v28  ;;  %v1650_v27 = vsel %vm1647_vm11, %v1649_v10, %v1645_v49  ;;  %vm6344_vm2 = vmor %vm1687_vm12, %vm1688_vm13  ;;  %vm1793_vm6 = vweird.f32 %v6270_v17 }
 0x28e   :  { %v6292_v16 = vadd.f32 1.0, %v4867_v51  ;;  %v4869_v43 = vpop.eup %4868  ;;  %v1680_v60 = vsel %vm1677_vm7, %v1679_v18, %v1675_v31  ;;  %v1665_v51 = vsel %vm1662_vm10, %v1664_v25, %v1660_v23  ;;  %v1693_v23 = vand.u32 2147483648, %v6254_v36  ;;  %v8066_v36 = vld [vmem:[#allocation39_spill] sm:$0xff] }
 0x28f   :  { %v1697_v15 = vmul.f32 2.0, %v1680_v60  ;;  %v6304_v0 = vpop.eup %4870  ;;  %v6309_v21 = vadd.f32 1.0, %v4869_v43  ;;  %v1685_v19 = vmul.f32 %v6265_v44, %v1684_v5  ;;  %v8058_v43 = vld [vmem:[#allocation111_spill] sm:$0xff]  ;;  %vm6332_vm14 = vcmp.eq.f32.partialorder %v1691_v13, 8.507059e+37 }
 0x290   :  { %4874 = vrcp.f32 %v6292_v16  ;;  %v6311_v32 = vpop.eup %4872  ;;  %v1789_v50 = vmul.f32 %v6304_v0, %v6270_v17  ;;  %v1699_v20 = vmul.f32 %v1665_v51, %v8058_v43  ;;  %v1814_v43 = vand.u32 2147483648, %v6272_v8 }
 0x291   :  { %v4545_v18 = vadd.f32 -1.0, %v1697_v15  ;;  %v1804_v28 = vmul.f32 %v6311_v32, %v6272_v8  ;;  %4876 = vrcp.f32 %v6309_v21  ;;  %v1686_v49 = vadd.f32 %v6265_v44, %v1685_v19 }
 0x292   :  { %v1790_v34 = vsub.f32 1.0, %v1789_v50  ;;  %vm1809_vm0 = vweird.f32 %v6311_v32  ;;  %v1829_v50 = vand.u32 2147483648, %v6292_v16  ;;  %vm1794_vm3 = vweird.f32 %v6304_v0 }
 0x293   :  { %v1805_v31 = vsub.f32 1.0, %v1804_v28  ;;  %v1700_v25 = vmul.f32 %v4545_v18, %v1650_v27  ;;  %v1694_v28 = vor.u32 1.1754944e-38, %v1693_v23  ;;  %vm6359_vm4 = vmor %vm1808_vm15, %vm1809_vm0  ;;  %vm1823_vm5 = vweird.f32 %v6292_v16 }
 0x294   :  { %v1791_v10 = vmul.f32 %v6304_v0, %v1790_v34  ;;  %v1827_v34 = vand.u32 2147483647, %v6292_v16  ;;  %vm1795_vm9 = vmor %vm1793_vm6, %vm1794_vm3  ;;  %vm1838_vm13 = vweird.f32 %v6309_v21 }
 0x295   :  { %v1806_v62 = vmul.f32 %v6311_v32, %v1805_v31  ;;  %v6324_v4 = vadd.f32 %v1700_v25, %v1699_v20  ;;  %v1812_v31 = vand.u32 2147483647, %v6272_v8  ;;  %v1690_v25 = vsel %vm6344_vm2, %v6265_v44, %v1686_v49 }
 0x296   :  { %v4875_v15 = vpop.eup %4874  ;;  %v1792_v23 = vadd.f32 %v6304_v0, %v1791_v10  ;;  %v1830_v44 = vor.u32 1.1754944e-38, %v1829_v50  ;;  %vm1828_vm8 = vcmp.eq.f32.partialorder %v1827_v34, 8.507059e+37 }
 0x297   :  { %v1819_v60 = vmul.f32 %v4875_v15, %v6292_v16  ;;  %8059 = vst [vmem:[#allocation28_spill] sm:$0xff] %v6324_v4  ;;  %v6329_v5 = vpop.eup %4876  ;;  %4878 = vtanh.f32 %v6324_v4  ;;  %v1807_v27 = vadd.f32 %v6311_v32, %v1806_v62  ;;  %vm1824_vm1 = vweird.f32 %v4875_v15 }
 0x298   :  { %v1834_v20 = vmul.f32 %v6329_v5, %v6309_v21  ;;  %vm1825_vm7 = vmor %vm1823_vm5, %vm1824_vm1  ;;  %v1815_v16 = vor.u32 1.1754944e-38, %v1814_v43  ;;  %vm1813_vm10 = vcmp.eq.f32.partialorder %v1812_v31, 8.507059e+37  ;;  %vm1839_vm12 = vweird.f32 %v6329_v5 }
 0x299   :  { %v1820_v51 = vsub.f32 1.0, %v1819_v60  ;;  %v1797_v60 = vand.u32 2147483647, %v6270_v17  ;;  %v1811_v8 = vsel %vm6359_vm4, %v6311_v32, %v1807_v27 }
 0x29a   :  { %v1835_v4 = vsub.f32 1.0, %v1834_v20  ;;  %v1816_v22 = vsel %vm1813_vm10, %v1815_v16, %v1811_v8  ;;  %v8072_v8 = vld [vmem:[#allocation45_spill] sm:$0xff]  ;;  %v8075_v16 = vld [vmem:[#allocation48_spill] sm:$0xff] }
 0x29b   :  { %v1821_v19 = vmul.f32 %v4875_v15, %v1820_v51  ;;  %v1799_v51 = vand.u32 2147483648, %v6270_v17  ;;  %v1796_v17 = vsel %vm1795_vm9, %v6304_v0, %v1792_v23  ;;  %vm1798_vm11 = vcmp.eq.f32.partialorder %v1797_v60, 8.507059e+37  ;;  %v8068_v60 = vld [vmem:[#allocation41_spill] sm:$0xff] }
 0x29c   :  { %v1836_v27 = vmul.f32 %v6329_v5, %v1835_v4 }
 0x29d   :  { %v1822_v62 = vadd.f32 %v4875_v15, %v1821_v19  ;;  %v4879_v49 = vpop.eup %4878  ;;  %v1695_v19 = vsel %vm6332_vm14, %v1694_v28, %v1690_v25  ;;  %v1800_v29 = vor.u32 1.1754944e-38, %v1799_v51  ;;  %vm1840_vm14 = vmor %vm1838_vm13, %vm1839_vm12  ;;  %v8069_v51 = vld [vmem:[#allocation42_spill] sm:$0xff]  ;;  %vm3831_vm12 = vcmask 1040384  }
 0x29e   :  { %v6373_v30 = vmul.f32 %v4879_v49, %v1695_v19  ;;  %v8071_v49 = vld [vmem:[#allocation44_spill] sm:$0xff]  ;;  %v8074_v19 = vld [vmem:[#allocation47_spill] sm:$0xff] }
 0x29f   :  { %v1826_v10 = vsel %vm1825_vm7, %v4875_v15, %v1822_v62  ;;  %v1851_v15 = vrot.slane %v6137_v2, 7  ;;  %v1801_v28 = vsel %vm1798_vm11, %v1800_v29, %v1796_v17  ;;  %v1837_v29 = vadd.f32 %v6329_v5, %v1836_v27  ;;  %v8067_v62 = vld [vmem:[#allocation40_spill] sm:$0xff]  ;;  %v8077_v17 = vld [vmem:[#allocation50_spill] sm:$0xff] }
 0x2a0   :  { %v1831_v13 = vsel %vm1828_vm8, %v1830_v44, %v1826_v10  ;;  %v1859_v32 = vpack.c.bf16 %v6373_v30, %v6373_v30  ;;  %v1842_v2 = vand.u32 2147483647, %v6309_v21  ;;  %v8070_v44 = vld [vmem:[#allocation43_spill] sm:$0xff]  ;;  %v8073_v10 = vld [vmem:[#allocation46_spill] sm:$0xff]  ;;  %v8083_v27 = vld [vmem:[#allocation56_spill] sm:$0xff] }
 0x2a1   :  { %v1848_v50 = vmul.f32 2.0, %v1831_v13  ;;  %v1853_v34 = vmul.f32 %v1851_v15, %v1816_v22  ;;  %v1844_v22 = vand.u32 2147483648, %v6309_v21  ;;  %v1841_v4 = vsel %vm1840_vm14, %v6329_v5, %v1837_v29  ;;  %v8076_v13 = vld [vmem:[#allocation49_spill] sm:$0xff]  ;;  %v8086_v29 = vld [vmem:[#allocation59_spill] sm:$0xff] }
 0x2a2   :  { %1868 = vmatmul.bf16.vlgmr.msra.gmra.mxu0 %v1859_v32  ;;  %1881 = vmatmul.bf16.vlgmr.msra.gmra.mxu1 %v1859_v32  ;;  %vm1843_vm15 = vcmp.eq.f32.partialorder %v1842_v2, 8.507059e+37  ;;  %v8080_v15 = vld [vmem:[#allocation53_spill] sm:$0xff] }
 0x2a3   :  { %v4550_v18 = vadd.f32 -1.0, %v1848_v50  ;;  %1894 = vmatmul.bf16.vlgmr.msra.gmra.mxu2 %v1859_v32  ;;  %1907 = vmatmul.bf16.vlgmr.msra.gmra.mxu3 %v1859_v32  ;;  %v1845_v31 = vor.u32 1.1754944e-38, %v1844_v22  ;;  %v8078_v50 = vld [vmem:[#allocation51_spill] sm:$0xff]  ;;  %v8079_v32 = vld [vmem:[#allocation52_spill] sm:$0xff]  ;;  %v8088_v2 = vld [vmem:[#allocation61_spill] sm:$0xff] }
 0x2a4   :  { %2054 = vmatpush.bf16.msra.mxu0 %v5511_v40  ;;  %2067 = vmatpush.bf16.msra.mxu1 %v5513_v41  ;;  %v8087_v22 = vld [vmem:[#allocation60_spill] sm:$0xff] }
 0x2a5   :  { %v1854_v43 = vmul.f32 %v4550_v18, %v1801_v28  ;;  %2080 = vmatpush.bf16.msra.mxu2 %v5515_v42  ;;  %2093 = vmatpush.bf16.msra.mxu3 %v5517_v46  ;;  %v1846_v25 = vsel %vm1843_vm15, %v1845_v31, %v1841_v4  ;;  %v8081_v18 = vld [vmem:[#allocation54_spill] sm:$0xff]  ;;  %v8082_v28 = vld [vmem:[#allocation55_spill] sm:$0xff] }
 0x2a6   :  { %v8089_v4 = vld [vmem:[#allocation62_spill] sm:$0xff]  ;;  %v8090_v31 = vld [vmem:[#allocation63_spill] sm:$0xff] }
 0x2a7   :  { %v6382_v0 = vadd.f32 %v1854_v43, %v1853_v34  ;;  %v8084_v34 = vld [vmem:[#allocation57_spill] sm:$0xff]  ;;  %v8085_v43 = vld [vmem:[#allocation58_spill] sm:$0xff] }
 0x2a8   :  { %2055 = vmatpush.bf16.msra.mxu0 %v5520_v53  ;;  %2068 = vmatpush.bf16.msra.mxu1 %v5524_v54 }
 0x2a9   :  { %4880 = vtanh.f32 %v6382_v0  ;;  %2081 = vmatpush.bf16.msra.mxu2 %v5526_v55  ;;  %2094 = vmatpush.bf16.msra.mxu3 %v5529_v59 }
 0x2ac   :  { %2056 = vmatpush.bf16.msra.mxu0 %v5532_v1  ;;  %2069 = vmatpush.bf16.msra.mxu1 %v7982_v35 }
 0x2ad   :  { %2082 = vmatpush.bf16.msra.mxu2 %v7983_v61  ;;  %2095 = vmatpush.bf16.msra.mxu3 %v7984_v33 }
 0x2af   :  { %v4881_v20 = vpop.eup %4880 }
 0x2b0   :  { %v1857_v21 = vmul.f32 %v4881_v20, %v1846_v25  ;;  %2057 = vmatpush.bf16.msra.mxu0 %v7985_v7  ;;  %2070 = vmatpush.bf16.msra.mxu1 %v7986_v52  ;;  %v8091_v20 = vld [vmem:[#allocation64_spill] sm:$0xff]  ;;  %v8092_v25 = vld [vmem:[#allocation65_spill] sm:$0xff] }
 0x2b1   :  { %2083 = vmatpush.bf16.msra.mxu2 %v7987_v3  ;;  %2096 = vmatpush.bf16.msra.mxu3 %v7988_v6 }
 0x2b2   :  { %v1858_v23 = vpack.c.bf16 %v1857_v21, %v1857_v21  ;;  %v8093_v21 = vld [vmem:[#allocation66_spill] sm:$0xff] }
 0x2b4   :  { %v1913_v5 = vrot.slane %v1858_v23, 1  ;;  %2058 = vmatpush.bf16.msra.mxu0 %v7989_v26  ;;  %2071 = vmatpush.bf16.msra.mxu1 %v7990_v48  ;;  %v8094_v23 = vld [vmem:[#allocation67_spill] sm:$0xff] }
 0x2b5   :  { %2084 = vmatpush.bf16.msra.mxu2 %v7991_v45  ;;  %2097 = vmatpush.bf16.msra.mxu3 %v7992_v24 }
 0x2b6   :  { %1923 = vmatmul.bf16.vlgmr.msrb.gmra.mxu0 %v1913_v5  ;;  %1936 = vmatmul.bf16.vlgmr.msrb.gmra.mxu1 %v1913_v5 }
 0x2b7   :  { %1949 = vmatmul.bf16.vlgmr.msrb.gmra.mxu2 %v1913_v5  ;;  %1962 = vmatmul.bf16.vlgmr.msrb.gmra.mxu3 %v1913_v5 }
 0x2b8   :  { %2059 = vmatpush.bf16.msra.mxu0 %v5568_v37  ;;  %2072 = vmatpush.bf16.msra.mxu1 %v5572_v38 }
 0x2b9   :  { %2085 = vmatpush.bf16.msra.mxu2 %v5574_v39  ;;  %2098 = vmatpush.bf16.msra.mxu3 %v5577_v47 }
 0x2bc   :  { %2060 = vmatpush.bf16.msra.mxu0 %v5580_v56  ;;  %2073 = vmatpush.bf16.msra.mxu1 %v5584_v57 }
 0x2bd   :  { %2086 = vmatpush.bf16.msra.mxu2 %v5586_v58  ;;  %2099 = vmatpush.bf16.msra.mxu3 %v5589_v63 }
 0x2c0   :  { %2061 = vmatpush.bf16.msra.mxu0 %v5592_v9  ;;  %2074 = vmatpush.bf16.msra.mxu1 %v5596_v11 }
 0x2c1   :  { %2087 = vmatpush.bf16.msra.mxu2 %v5598_v12  ;;  %2100 = vmatpush.bf16.msra.mxu3 %v5601_v14 }
 0x2c4   :  { %2210 = vmatpush.bf16.msrb.mxu0 %v8066_v36  ;;  %2223 = vmatpush.bf16.msrb.mxu1 %v8067_v62 }
 0x2c5   :  { %2236 = vmatpush.bf16.msrb.mxu2 %v8068_v60  ;;  %2249 = vmatpush.bf16.msrb.mxu3 %v8069_v51 }
 0x2c6   :  { %2062 = vmatmul.bf16.vlgmr.msra.gmra.mxu0 %v1913_v5  ;;  %2075 = vmatmul.bf16.vlgmr.msra.gmra.mxu1 %v1913_v5 }
 0x2c7   :  { %2088 = vmatmul.bf16.vlgmr.msra.gmra.mxu2 %v1913_v5  ;;  %2101 = vmatmul.bf16.vlgmr.msra.gmra.mxu3 %v1913_v5  ;;  %v8095_v5 = vld [vmem:[#allocation68_spill] sm:$0xff] }
 0x2c8   :  { %2211 = vmatpush.bf16.msrb.mxu0 %v8070_v44  ;;  %2224 = vmatpush.bf16.msrb.mxu1 %v8071_v49 }
 0x2c9   :  { %2237 = vmatpush.bf16.msrb.mxu2 %v8072_v8  ;;  %2250 = vmatpush.bf16.msrb.mxu3 %v8073_v10  ;;  %v8133_v10 = vld [vmem:[#allocation110_spill] sm:$0xff] }
 0x2cc   :  { %2212 = vmatpush.bf16.msrb.mxu0 %v8074_v19  ;;  %2225 = vmatpush.bf16.msrb.mxu1 %v8075_v16 }
 0x2cd   :  { %2238 = vmatpush.bf16.msrb.mxu2 %v8076_v13  ;;  %2251 = vmatpush.bf16.msrb.mxu3 %v8077_v17 }
 0x2d0   :  { %2213 = vmatpush.bf16.msrb.mxu0 %v8078_v50  ;;  %2226 = vmatpush.bf16.msrb.mxu1 %v8079_v32  ;;  %v8130_v32 = vld [vmem:[#allocation107_spill] sm:$0xff]  ;;  %v8131_v50 = vld [vmem:[#allocation108_spill] sm:$0xff] }
 0x2d1   :  { %2239 = vmatpush.bf16.msrb.mxu2 %v8080_v15  ;;  %2252 = vmatpush.bf16.msrb.mxu3 %v8081_v18 }
 0x2d4   :  { %2214 = vmatpush.bf16.msrb.mxu0 %v8082_v28  ;;  %2227 = vmatpush.bf16.msrb.mxu1 %v8083_v27 }
 0x2d5   :  { %2240 = vmatpush.bf16.msrb.mxu2 %v8084_v34  ;;  %2253 = vmatpush.bf16.msrb.mxu3 %v8085_v43  ;;  %v8096_v43 = vld [vmem:[#allocation71_spill] sm:$0xff] }
 0x2d8   :  { %2215 = vmatpush.bf16.msrb.mxu0 %v8086_v29  ;;  %2228 = vmatpush.bf16.msrb.mxu1 %v8087_v22  ;;  %v8097_v29 = vld [vmem:[#allocation72_spill] sm:$0xff]  ;;  %v8098_v22 = vld [vmem:[#allocation69_spill] sm:$0xff] }
 0x2d9   :  { %2241 = vmatpush.bf16.msrb.mxu2 %v8088_v2  ;;  %2254 = vmatpush.bf16.msrb.mxu3 %v8089_v4  ;;  %v8099_v2 = vld [vmem:[#allocation70_spill] sm:$0xff]  ;;  %v8100_v4 = vld [vmem:[#allocation73_spill] sm:$0xff] }
 0x2dc   :  { %2216 = vmatpush.bf16.msrb.mxu0 %v8090_v31  ;;  %2229 = vmatpush.bf16.msrb.mxu1 %v8091_v20  ;;  %v8101_v31 = vld [vmem:[#allocation74_spill] sm:$0xff]  ;;  %v8102_v20 = vld [vmem:[#allocation75_spill] sm:$0xff] }
 0x2dd   :  { %2242 = vmatpush.bf16.msrb.mxu2 %v8092_v25  ;;  %2255 = vmatpush.bf16.msrb.mxu3 %v8093_v21  ;;  %v8103_v25 = vld [vmem:[#allocation76_spill] sm:$0xff]  ;;  %v8104_v21 = vld [vmem:[#allocation77_spill] sm:$0xff] }
 0x2e0   :  { %2217 = vmatpush.bf16.msrb.mxu0 %v8094_v23  ;;  %2230 = vmatpush.bf16.msrb.mxu1 %v8095_v5  ;;  %v8105_v23 = vld [vmem:[#allocation78_spill] sm:$0xff]  ;;  %v8106_v5 = vld [vmem:[#allocation79_spill] sm:$0xff] }
 0x2e1   :  { %2243 = vmatpush.bf16.msrb.mxu2 %v8098_v22  ;;  %2256 = vmatpush.bf16.msrb.mxu3 %v8099_v2  ;;  %v8109_v22 = vld [vmem:[#allocation82_spill] sm:$0xff]  ;;  %v8110_v2 = vld [vmem:[#allocation83_spill] sm:$0xff] }
 0x2e4   :  { %2267 = vmatpush.bf16.msra.mxu0 %v8096_v43  ;;  %2280 = vmatpush.bf16.msra.mxu1 %v8097_v29  ;;  %v8107_v43 = vld [vmem:[#allocation80_spill] sm:$0xff]  ;;  %v8108_v29 = vld [vmem:[#allocation81_spill] sm:$0xff] }
 0x2e5   :  { %2293 = vmatpush.bf16.msra.mxu2 %v8100_v4  ;;  %2306 = vmatpush.bf16.msra.mxu3 %v8101_v31  ;;  %v8111_v4 = vld [vmem:[#allocation84_spill] sm:$0xff]  ;;  %v8112_v31 = vld [vmem:[#allocation85_spill] sm:$0xff] }
 0x2e8   :  { %2268 = vmatpush.bf16.msra.mxu0 %v8102_v20  ;;  %2281 = vmatpush.bf16.msra.mxu1 %v8103_v25  ;;  %v8113_v20 = vld [vmem:[#allocation86_spill] sm:$0xff]  ;;  %v8114_v25 = vld [vmem:[#allocation87_spill] sm:$0xff] }
 0x2e9   :  { %2294 = vmatpush.bf16.msra.mxu2 %v8104_v21  ;;  %2307 = vmatpush.bf16.msra.mxu3 %v8105_v23  ;;  %v8115_v21 = vld [vmem:[#allocation89_spill] sm:$0xff]  ;;  %v8116_v23 = vld [vmem:[#allocation91_spill] sm:$0xff] }
 0x2ec   :  { %2269 = vmatpush.bf16.msra.mxu0 %v8106_v5  ;;  %2282 = vmatpush.bf16.msra.mxu1 %v8107_v43  ;;  %v8117_v5 = vld [vmem:[#allocation92_spill] sm:$0xff]  ;;  %v8118_v43 = vld [vmem:[#allocation93_spill] sm:$0xff] }
 0x2ed   :  { %2295 = vmatpush.bf16.msra.mxu2 %v8108_v29  ;;  %2308 = vmatpush.bf16.msra.mxu3 %v8109_v22  ;;  %v8119_v29 = vld [vmem:[#allocation94_spill] sm:$0xff]  ;;  %v8120_v22 = vld [vmem:[#allocation95_spill] sm:$0xff] }
 0x2f0   :  { %2270 = vmatpush.bf16.msra.mxu0 %v8110_v2  ;;  %2283 = vmatpush.bf16.msra.mxu1 %v8111_v4  ;;  %v8121_v2 = vld [vmem:[#allocation97_spill] sm:$0xff]  ;;  %v8122_v4 = vld [vmem:[#allocation99_spill] sm:$0xff] }
 0x2f1   :  { %2296 = vmatpush.bf16.msra.mxu2 %v8112_v31  ;;  %2309 = vmatpush.bf16.msra.mxu3 %v8113_v20  ;;  %v8123_v31 = vld [vmem:[#allocation100_spill] sm:$0xff]  ;;  %v8124_v20 = vld [vmem:[#allocation101_spill] sm:$0xff] }
 0x2f4   :  { %2271 = vmatpush.bf16.msra.mxu0 %v8114_v25  ;;  %2284 = vmatpush.bf16.msra.mxu1 %v8115_v21  ;;  %v8125_v25 = vld [vmem:[#allocation102_spill] sm:$0xff]  ;;  %v8126_v21 = vld [vmem:[#allocation103_spill] sm:$0xff] }
 0x2f5   :  { %2297 = vmatpush.bf16.msra.mxu2 %v8116_v23  ;;  %2310 = vmatpush.bf16.msra.mxu3 %v8117_v5  ;;  %v8127_v23 = vld [vmem:[#allocation104_spill] sm:$0xff]  ;;  %v8128_v5 = vld [vmem:[#allocation105_spill] sm:$0xff] }
 0x2f8   :  { %2272 = vmatpush.bf16.msra.mxu0 %v8118_v43  ;;  %2285 = vmatpush.bf16.msra.mxu1 %v8119_v29  ;;  %v8129_v43 = vld [vmem:[#allocation106_spill] sm:$0xff] }
 0x2f9   :  { %2298 = vmatpush.bf16.msra.mxu2 %v8120_v22  ;;  %2311 = vmatpush.bf16.msra.mxu3 %v8121_v2 }
 0x2fc   :  { %2273 = vmatpush.bf16.msra.mxu0 %v8122_v4  ;;  %2286 = vmatpush.bf16.msra.mxu1 %v8123_v31 }
 0x2fd   :  { %2299 = vmatpush.bf16.msra.mxu2 %v8124_v20  ;;  %2312 = vmatpush.bf16.msra.mxu3 %v8125_v25 }
 0x300   :  { %2274 = vmatpush.bf16.msra.mxu0 %v8126_v21  ;;  %2287 = vmatpush.bf16.msra.mxu1 %v8127_v23 }
 0x301   :  { %2300 = vmatpush.bf16.msra.mxu2 %v8128_v5  ;;  %2313 = vmatpush.bf16.msra.mxu3 %v8129_v43 }
 0x31f   :  { %v1869_v29 = vpop.f32.mrf.mxu0  ;;  %v1882_v22 = vpop.f32.mrf.mxu1 }
 0x326   :  { %v1895_v34 = vpop.f32.mrf.mxu2  ;;  %v1908_v2 = vpop.f32.mrf.mxu3 }
 0x327   :  { %v1871_v27 = vpop.f32.mrf.mxu0  ;;  %v1884_v4 = vpop.f32.mrf.mxu1 }
 0x32e   :  { %v1897_v28 = vpop.f32.mrf.mxu2  ;;  %v1910_v31 = vpop.f32.mrf.mxu3 }
 0x32f   :  { %v8132_v28 = vld [vmem:[#allocation109_spill] sm:$0xff] }
 0x333   :  { %v1924_v18 = vpop.f32.mrf.mxu0  ;;  %v1937_v20 = vpop.f32.mrf.mxu1 }
 0x334   :  { %v1925_v15 = vadd.f32 %v1924_v18, %v1869_v29  ;;  %v1938_v25 = vadd.f32 %v1937_v20, %v1882_v22 }
 0x336   :  { %v1967_v21 = vadd.f32 %v1925_v15, %v8130_v32  ;;  %v1968_v23 = vadd.f32 %v1938_v25, %v8131_v50 }
 0x338   :  { %v4551_v17 = vmul.f32 -1.442695, %v1967_v21  ;;  %v4552_v5 = vmul.f32 -1.442695, %v1968_v23  ;;  %v8135_v23 = vld [vmem:[#allocation90_spill] sm:$0xff] }
 0x33a   :  { %4882 = vpow2.f32 %v4551_v17  ;;  %v1950_v43 = vpop.f32.mrf.mxu2  ;;  %v1963_v13 = vpop.f32.mrf.mxu3 }
 0x33b   :  { %4884 = vpow2.f32 %v4552_v5  ;;  %v1951_v16 = vadd.f32 %v1950_v43, %v1895_v34  ;;  %v1964_v19 = vadd.f32 %v1963_v13, %v1908_v2  ;;  %v1926_v27 = vpop.f32.mrf.mxu0  ;;  %v1939_v4 = vpop.f32.mrf.mxu1 }
 0x33d   :  { %v1969_v31 = vadd.f32 %v1951_v16, %v8132_v28  ;;  %v1970_v8 = vadd.f32 %v1964_v19, %v8133_v10 }
 0x33f   :  { %v4553_v18 = vmul.f32 -1.442695, %v1969_v31  ;;  %v4554_v29 = vmul.f32 -1.442695, %v1970_v8  ;;  %v8134_v8 = vld [vmem:[#allocation88_spill] sm:$0xff] }
 0x340   :  { %v4883_v22 = vpop.eup %4882 }
 0x341   :  { %v4885_v15 = vpop.eup %4884  ;;  %v6489_v20 = vadd.f32 1.0, %v4883_v22  ;;  %4886 = vpow2.f32 %v4553_v18 }
 0x342   :  { %v6491_v25 = vadd.f32 1.0, %v4885_v15  ;;  %4888 = vpow2.f32 %v4554_v29  ;;  %v1952_v17 = vpop.f32.mrf.mxu2  ;;  %v1965_v21 = vpop.f32.mrf.mxu3 }
 0x343   :  { %4890 = vrcp.f32 %v6489_v20  ;;  %v2063_v13 = vpop.f32.mrf.mxu0  ;;  %v2076_v16 = vpop.f32.mrf.mxu1  ;;  %vm1992_vm8 = vweird.f32 %v6489_v20 }
 0x344   :  { %4892 = vrcp.f32 %v6491_v25  ;;  %v2110_v34 = vrot.slane %v2063_v13, 5  ;;  %v2111_v19 = vrot.slane %v2076_v16, 5  ;;  %vm2007_vm0 = vweird.f32 %v6491_v25 }
 0x346   :  { %v2118_v2 = vadd.f32 %v2110_v34, %v8134_v8  ;;  %v2119_v5 = vadd.f32 %v2111_v19, %v8135_v23  ;;  %v8136_v23 = vld [vmem:[#allocation98_spill] sm:$0xff] }
 0x347   :  { %v4887_v43 = vpop.eup %4886 }
 0x348   :  { %v4889_v27 = vpop.eup %4888  ;;  %v1985_v4 = vadd.f32 1.0, %v4887_v43  ;;  %v4556_v29 = vmul.f32 -1.442695, %v2118_v2  ;;  %v4557_v15 = vmul.f32 -1.442695, %v2119_v5  ;;  %v8137_v5 = vld [vmem:[#allocation96_spill] sm:$0xff] }
 0x349   :  { %v6497_v31 = vpop.eup %4890  ;;  %v6499_v18 = vadd.f32 1.0, %v4889_v27 }
 0x34a   :  { %v6501_v22 = vpop.eup %4892  ;;  %4894 = vrcp.f32 %v1985_v4  ;;  %v2089_v21 = vpop.f32.mrf.mxu2  ;;  %v1988_v16 = vmul.f32 %v6497_v31, %v6489_v20  ;;  %vm2022_vm3 = vweird.f32 %v1985_v4  ;;  %vm1993_vm4 = vweird.f32 %v6497_v31 }
 0x34b   :  { %v2003_v17 = vmul.f32 %v6501_v22, %v6491_v25  ;;  %v2102_v13 = vpop.f32.mrf.mxu3  ;;  %4896 = vrcp.f32 %v6499_v18  ;;  %v2112_v34 = vrot.slane %v2089_v21, 5  ;;  %v2065_v43 = vpop.f32.mrf.mxu0  ;;  %vm2008_vm2 = vweird.f32 %v6501_v22  ;;  %vm6544_vm9 = vmor %vm1992_vm8, %vm1993_vm4 }
 0x34c   :  { %v2113_v19 = vrot.slane %v2102_v13, 5  ;;  %v2078_v27 = vpop.f32.mrf.mxu1  ;;  %4898 = vpow2.f32 %v4556_v29  ;;  %v1989_v50 = vsub.f32 1.0, %v1988_v16  ;;  %vm6533_vm6 = vmor %vm2007_vm0, %vm2008_vm2  ;;  %vm2037_vm13 = vweird.f32 %v6499_v18 }
 0x34d   :  { %v2004_v2 = vsub.f32 1.0, %v2003_v17  ;;  %4900 = vpow2.f32 %v4557_v15  ;;  %v2120_v8 = vadd.f32 %v2112_v34, %v8136_v23 }
 0x34e   :  { %v2121_v10 = vadd.f32 %v2113_v19, %v8137_v5  ;;  %v1990_v34 = vmul.f32 %v6497_v31, %v1989_v50  ;;  %v2028_v19 = vand.u32 2147483648, %v1985_v4 }
 0x34f   :  { %v4558_v32 = vmul.f32 -1.442695, %v2120_v8  ;;  %v2005_v60 = vmul.f32 %v6501_v22, %v2004_v2  ;;  %v2026_v8 = vand.u32 2147483647, %v1985_v4 }
 0x350   :  { %v4895_v28 = vpop.eup %4894  ;;  %v4559_v49 = vmul.f32 -1.442695, %v2121_v10  ;;  %v1991_v2 = vadd.f32 %v6497_v31, %v1990_v34  ;;  %v1996_v34 = vand.u32 2147483647, %v6489_v20 }
 0x351   :  { %v2018_v44 = vmul.f32 %v4895_v28, %v1985_v4  ;;  %v6510_v51 = vpop.eup %4896  ;;  %4902 = vpow2.f32 %v4558_v32  ;;  %vm2023_vm1 = vweird.f32 %v4895_v28  ;;  %v2006_v32 = vadd.f32 %v6501_v22, %v2005_v60 }
 0x352   :  { %v4899_v21 = vpop.eup %4898  ;;  %v2091_v17 = vpop.f32.mrf.mxu2  ;;  %4904 = vpow2.f32 %v4559_v49  ;;  %v2033_v50 = vmul.f32 %v6510_v51, %v6499_v18  ;;  %v2011_v60 = vand.u32 2147483647, %v6491_v25  ;;  %vm2024_vm5 = vmor %vm2022_vm3, %vm2023_vm1  ;;  %vm2027_vm7 = vcmp.eq.f32.partialorder %v2026_v8, 8.507059e+37 }
 0x353   :  { %v2019_v29 = vsub.f32 1.0, %v2018_v44  ;;  %v2104_v15 = vpop.f32.mrf.mxu3  ;;  %v4901_v13 = vpop.eup %4900  ;;  %v6515_v43 = vadd.f32 1.0, %v4899_v21  ;;  %v2013_v44 = vand.u32 2147483648, %v6491_v25  ;;  %v2029_v21 = vor.u32 1.1754944e-38, %v2028_v19 }
 0x354   :  { %v6517_v16 = vadd.f32 1.0, %v4901_v13  ;;  %v2010_v19 = vsel %vm6533_vm6, %v6501_v22, %v2006_v32  ;;  %vm2012_vm10 = vcmp.eq.f32.partialorder %v2011_v60, 8.507059e+37  ;;  %vm1997_vm11 = vcmp.eq.f32.partialorder %v1996_v34, 8.507059e+37 }
 0x355   :  { %v2020_v10 = vmul.f32 %v4895_v28, %v2019_v29  ;;  %4906 = vrcp.f32 %v6515_v43  ;;  %v1998_v29 = vand.u32 2147483648, %v6489_v20  ;;  %v2014_v5 = vor.u32 1.1754944e-38, %v2013_v44 }
 0x356   :  { %4908 = vrcp.f32 %v6517_v16  ;;  %v1995_v20 = vsel %vm6544_vm9, %v6497_v31, %v1991_v2  ;;  %v2041_v2 = vand.u32 2147483647, %v6499_v18  ;;  %vm2038_vm14 = vweird.f32 %v6510_v51 }
 0x357   :  { %v2021_v27 = vadd.f32 %v4895_v28, %v2020_v10  ;;  %v4903_v49 = vpop.eup %4902  ;;  %v1999_v32 = vor.u32 1.1754944e-38, %v1998_v29  ;;  %vm2158_vm0 = vweird.f32 %v6517_v16  ;;  %vm6590_vm3 = vmor %vm2037_vm13, %vm2038_vm14  ;;  %vm3833_vm13 = vcmask 1041408  }
 0x358   :  { %v6537_v15 = vadd.f32 1.0, %v4903_v49  ;;  %v4905_v13 = vpop.eup %4904  ;;  %v2015_v49 = vsel %vm2012_vm10, %v2014_v5, %v2010_v19  ;;  %v2043_v19 = vand.u32 2147483648, %v6499_v18  ;;  %vm6578_vm15 = vcmp.eq.f32.partialorder %v2041_v2, 8.507059e+37 }
 0x359   :  { %v2025_v17 = vsel %vm2024_vm5, %v4895_v28, %v2021_v27  ;;  %v2034_v28 = vsub.f32 1.0, %v2033_v50  ;;  %v6554_v27 = vadd.f32 1.0, %v4905_v13  ;;  %v2000_v4 = vsel %vm1997_vm11, %v1999_v32, %v1995_v20  ;;  %v8142_v13 = vld [vmem:[#allocation28_spill] sm:$0xff] }
 0x35a   :  { %v2030_v10 = vsel %vm2027_vm7, %v2029_v21, %v2025_v17  ;;  %4910 = vrcp.f32 %v6537_v15  ;;  %v2049_v29 = vmul.f32 %v2015_v49, %v8142_v13  ;;  %v3811_v20 = vrot.slane %v6373_v30, 7 }
 0x35b   :  { %v2047_v23 = vmul.f32 2.0, %v2030_v10  ;;  %v6549_v8 = vpop.eup %4906  ;;  %4912 = vrcp.f32 %v6554_v27  ;;  %v2035_v31 = vmul.f32 %v6510_v51, %v2034_v28  ;;  %v2179_v30 = vand.u32 2147483648, %v6537_v15 }
 0x35c   :  { %v6556_v22 = vpop.eup %4908  ;;  %v2139_v44 = vmul.f32 %v6549_v8, %v6515_v43  ;;  %v2164_v13 = vand.u32 2147483648, %v6517_v16  ;;  %vm2144_vm4 = vweird.f32 %v6549_v8  ;;  %vm2173_vm6 = vweird.f32 %v6537_v15 }
 0x35d   :  { %v4555_v21 = vadd.f32 -1.0, %v2047_v23  ;;  %v2154_v50 = vmul.f32 %v6556_v22, %v6517_v16  ;;  %v2036_v28 = vadd.f32 %v6510_v51, %v2035_v31  ;;  %vm2159_vm1 = vweird.f32 %v6556_v22 }
 0x35e   :  { %v2140_v60 = vsub.f32 1.0, %v2139_v44  ;;  %vm6605_vm5 = vmor %vm2158_vm0, %vm2159_vm1  ;;  %vm2143_vm7 = vweird.f32 %v6515_v43  ;;  %v2165_v2 = vor.u32 1.1754944e-38, %v2164_v13  ;;  %v2201_v13 = vrot.slane %v6382_v0, 7 }
 0x35f   :  { %v2155_v17 = vsub.f32 1.0, %v2154_v50  ;;  %v2050_v5 = vmul.f32 %v4555_v21, %v2000_v4  ;;  %v2044_v50 = vor.u32 1.1754944e-38, %v2043_v19  ;;  %vm6619_vm10 = vmor %vm2143_vm7, %vm2144_vm4  ;;  %vm2188_vm0 = vweird.f32 %v6554_v27 }
 0x360   :  { %v4911_v23 = vpop.eup %4910  ;;  %v2141_v49 = vmul.f32 %v6549_v8, %v2140_v60  ;;  %v2177_v60 = vand.u32 2147483647, %v6537_v15 }
 0x361   :  { %v2156_v34 = vmul.f32 %v6556_v22, %v2155_v17  ;;  %v2169_v10 = vmul.f32 %v4911_v23, %v6537_v15  ;;  %v6569_v25 = vadd.f32 %v2050_v5, %v2049_v29  ;;  %v6575_v32 = vpop.eup %4912  ;;  %vm2174_vm2 = vweird.f32 %v4911_v23  ;;  %v8154_v15 = vld [vmem:[#allocation41_spill] sm:$0xff] }
 0x362   :  { %v2162_v17 = vand.u32 2147483647, %v6517_v16  ;;  %v2184_v29 = vmul.f32 %v6575_v32, %v6554_v27  ;;  %v2040_v5 = vsel %vm6590_vm3, %v6510_v51, %v2036_v28  ;;  %v2142_v19 = vadd.f32 %v6549_v8, %v2141_v49  ;;  %vm2175_vm8 = vmor %vm2173_vm6, %vm2174_vm2 }
 0x363   :  { %8143 = vst [vmem:[#allocation29_spill] sm:$0xff] %v6569_v25  ;;  %v2170_v21 = vsub.f32 1.0, %v2169_v10  ;;  %4914 = vtanh.f32 %v6569_v25  ;;  %v2157_v4 = vadd.f32 %v6556_v22, %v2156_v34  ;;  %v2147_v10 = vand.u32 2147483647, %v6515_v43 }
 0x364   :  { %v2180_v51 = vor.u32 1.1754944e-38, %v2179_v30  ;;  %vm2178_vm9 = vcmp.eq.f32.partialorder %v2177_v60, 8.507059e+37  ;;  %v2146_v30 = vsel %vm6619_vm10, %v6549_v8, %v2142_v19  ;;  %vm2163_vm11 = vcmp.eq.f32.partialorder %v2162_v17, 8.507059e+37 }
 0x365   :  { %v2171_v31 = vmul.f32 %v4911_v23, %v2170_v21  ;;  %v2149_v21 = vand.u32 2147483648, %v6515_v43  ;;  %v2161_v16 = vsel %vm6605_vm5, %v6556_v22, %v2157_v4  ;;  %v2185_v43 = vsub.f32 1.0, %v2184_v29 }
 0x366   :  { %vm2148_vm14 = vcmp.eq.f32.partialorder %v2147_v10, 8.507059e+37  ;;  %v2192_v17 = vand.u32 2147483647, %v6554_v27 }
 0x367   :  { %v2172_v34 = vadd.f32 %v4911_v23, %v2171_v31  ;;  %v2045_v31 = vsel %vm6578_vm15, %v2044_v50, %v2040_v5  ;;  %v2150_v22 = vor.u32 1.1754944e-38, %v2149_v21  ;;  %v8152_v50 = vld [vmem:[#allocation112_spill] sm:$0xff]  ;;  %vm2189_vm15 = vweird.f32 %v6575_v32 }
 0x368   :  { %v3832_v60 = vsel %vm3831_vm12, %v8152_v50, %v3811_v20  ;;  %v2194_v20 = vand.u32 2147483648, %v6554_v27  ;;  %vm2190_vm1 = vmor %vm2188_vm0, %vm2189_vm15  ;;  %vm2193_vm2 = vcmp.eq.f32.partialorder %v2192_v17, 8.507059e+37  ;;  %v8163_v50 = vld [vmem:[#allocation50_spill] sm:$0xff]  ;;  %v8173_v17 = vld [vmem:[#allocation60_spill] sm:$0xff] }
 0x369   :  { %v4915_v28 = vpop.eup %4914  ;;  %v2176_v49 = vsel %vm2175_vm8, %v4911_v23, %v2172_v34  ;;  %v2166_v23 = vsel %vm2163_vm11, %v2165_v2, %v2161_v16  ;;  %v2151_v29 = vsel %vm2148_vm14, %v2150_v22, %v2146_v30  ;;  %v2186_v34 = vmul.f32 %v6575_v32, %v2185_v43  ;;  %v8155_v2 = vld [vmem:[#allocation42_spill] sm:$0xff]  ;;  %v8156_v43 = vld [vmem:[#allocation43_spill] sm:$0xff]  ;;  %v8157_v30 = vld [vmem:[#allocation44_spill] sm:$0xff] }
 0x36a   :  { %v2181_v25 = vsel %vm2178_vm9, %v2180_v51, %v2176_v49  ;;  %v2053_v62 = vmul.f32 %v4915_v28, %v2045_v31  ;;  %v2203_v8 = vmul.f32 %v2201_v13, %v2166_v23  ;;  %v2195_v10 = vor.u32 1.1754944e-38, %v2194_v20  ;;  %v8153_v31 = vld [vmem:[#allocation40_spill] sm:$0xff]  ;;  %v8159_v22 = vld [vmem:[#allocation46_spill] sm:$0xff]  ;;  %v8160_v23 = vld [vmem:[#allocation47_spill] sm:$0xff] }
 0x36b   :  { %v2198_v18 = vmul.f32 2.0, %v2181_v25  ;;  %v2187_v0 = vadd.f32 %v6575_v32, %v2186_v34  ;;  %v8165_v13 = vld [vmem:[#allocation52_spill] sm:$0xff]  ;;  %v8168_v34 = vld [vmem:[#allocation55_spill] sm:$0xff] }
 0x36c   :  { %v2209_v4 = vpack.c.bf16 %v2053_v62, %v2053_v62  ;;  %v3814_v44 = vrot.slane %v2053_v62, 6  ;;  %v8172_v20 = vld [vmem:[#allocation59_spill] sm:$0xff] }
 0x36d   :  { %v4560_v5 = vadd.f32 -1.0, %v2198_v18  ;;  %v2191_v19 = vsel %vm2190_vm1, %v6575_v32, %v2187_v0  ;;  %v8158_v18 = vld [vmem:[#allocation45_spill] sm:$0xff]  ;;  %v8171_v0 = vld [vmem:[#allocation58_spill] sm:$0xff] }
 0x36e   :  { %2218 = vmatmul.bf16.vlgmr.msrb.gmra.mxu0 %v2209_v4  ;;  %v6630_v51 = vsel %vm3833_vm13, %v3832_v60, %v3814_v44  ;;  %2231 = vmatmul.bf16.vlgmr.msrb.gmra.mxu1 %v2209_v4  ;;  %v2196_v28 = vsel %vm2193_vm2, %v2195_v10, %v2191_v19  ;;  %v8162_v44 = vld [vmem:[#allocation49_spill] sm:$0xff]  ;;  %v8164_v60 = vld [vmem:[#allocation51_spill] sm:$0xff]  ;;  %v8175_v10 = vld [vmem:[#allocation62_spill] sm:$0xff] }
 0x36f   :  { %v2204_v25 = vmul.f32 %v4560_v5, %v2151_v29  ;;  %2244 = vmatmul.bf16.vlgmr.msrb.gmra.mxu2 %v2209_v4  ;;  %2257 = vmatmul.bf16.vlgmr.msrb.gmra.mxu3 %v2209_v4  ;;  %v8161_v4 = vld [vmem:[#allocation48_spill] sm:$0xff]  ;;  %v8166_v5 = vld [vmem:[#allocation53_spill] sm:$0xff]  ;;  %v8167_v29 = vld [vmem:[#allocation54_spill] sm:$0xff] }
 0x370   :  { %2406 = vmatpush.bf16.msrb.mxu0 %v5511_v40  ;;  %2419 = vmatpush.bf16.msrb.mxu1 %v5513_v41  ;;  %v8174_v19 = vld [vmem:[#allocation61_spill] sm:$0xff] }
 0x371   :  { %v6634_v62 = vadd.f32 %v2204_v25, %v2203_v8  ;;  %2432 = vmatpush.bf16.msrb.mxu2 %v5515_v42  ;;  %2445 = vmatpush.bf16.msrb.mxu3 %v5517_v46  ;;  %v8169_v8 = vld [vmem:[#allocation56_spill] sm:$0xff]  ;;  %v8170_v25 = vld [vmem:[#allocation57_spill] sm:$0xff] }
 0x373   :  { %4916 = vtanh.f32 %v6634_v62 }
 0x374   :  { %2407 = vmatpush.bf16.msrb.mxu0 %v5520_v53  ;;  %2420 = vmatpush.bf16.msrb.mxu1 %v5524_v54 }
 0x375   :  { %2433 = vmatpush.bf16.msrb.mxu2 %v5526_v55  ;;  %2446 = vmatpush.bf16.msrb.mxu3 %v5529_v59 }
 0x378   :  { %2408 = vmatpush.bf16.msrb.mxu0 %v5532_v1  ;;  %2421 = vmatpush.bf16.msrb.mxu1 %v7982_v35 }
 0x379   :  { %v4917_v21 = vpop.eup %4916  ;;  %2434 = vmatpush.bf16.msrb.mxu2 %v7983_v61  ;;  %2447 = vmatpush.bf16.msrb.mxu3 %v7984_v33 }
 0x37a   :  { %v2207_v27 = vmul.f32 %v4917_v21, %v2196_v28  ;;  %v8176_v21 = vld [vmem:[#allocation63_spill] sm:$0xff]  ;;  %v8177_v28 = vld [vmem:[#allocation64_spill] sm:$0xff] }
 0x37c   :  { %v2208_v16 = vpack.c.bf16 %v2207_v27, %v2207_v27  ;;  %2409 = vmatpush.bf16.msrb.mxu0 %v7985_v7  ;;  %2422 = vmatpush.bf16.msrb.mxu1 %v7986_v52  ;;  %v8178_v27 = vld [vmem:[#allocation65_spill] sm:$0xff] }
 0x37d   :  { %2435 = vmatpush.bf16.msrb.mxu2 %v7987_v3  ;;  %2448 = vmatpush.bf16.msrb.mxu3 %v7988_v6 }
 0x37e   :  { %v2263_v32 = vshrl.u32 %v2208_v16, 16  ;;  %v8179_v16 = vld [vmem:[#allocation66_spill] sm:$0xff] }
 0x380   :  { %v2265_v49 = vrot.slane %v2263_v32, 1  ;;  %2410 = vmatpush.bf16.msrb.mxu0 %v7989_v26  ;;  %2423 = vmatpush.bf16.msrb.mxu1 %v7990_v48  ;;  %v8180_v32 = vld [vmem:[#allocation67_spill] sm:$0xff] }
 0x381   :  { %2436 = vmatpush.bf16.msrb.mxu2 %v7991_v45  ;;  %2449 = vmatpush.bf16.msrb.mxu3 %v7992_v24 }
 0x382   :  { %2275 = vmatmul.bf16.vlgmr.msra.gmra.mxu0 %v2265_v49  ;;  %2288 = vmatmul.bf16.vlgmr.msra.gmra.mxu1 %v2265_v49 }
 0x383   :  { %2301 = vmatmul.bf16.vlgmr.msra.gmra.mxu2 %v2265_v49  ;;  %2314 = vmatmul.bf16.vlgmr.msra.gmra.mxu3 %v2265_v49 }
 0x384   :  { %2411 = vmatpush.bf16.msrb.mxu0 %v5568_v37  ;;  %2424 = vmatpush.bf16.msrb.mxu1 %v5572_v38 }
 0x385   :  { %2437 = vmatpush.bf16.msrb.mxu2 %v5574_v39  ;;  %2450 = vmatpush.bf16.msrb.mxu3 %v5577_v47 }
 0x388   :  { %2412 = vmatpush.bf16.msrb.mxu0 %v5580_v56  ;;  %2425 = vmatpush.bf16.msrb.mxu1 %v5584_v57 }
 0x389   :  { %2438 = vmatpush.bf16.msrb.mxu2 %v5586_v58  ;;  %2451 = vmatpush.bf16.msrb.mxu3 %v5589_v63 }
 0x38c   :  { %2413 = vmatpush.bf16.msrb.mxu0 %v5592_v9  ;;  %2426 = vmatpush.bf16.msrb.mxu1 %v5596_v11 }
 0x38d   :  { %2439 = vmatpush.bf16.msrb.mxu2 %v5598_v12  ;;  %2452 = vmatpush.bf16.msrb.mxu3 %v5601_v14 }
 0x390   :  { %2562 = vmatpush.bf16.msra.mxu0 %v8066_v36  ;;  %2575 = vmatpush.bf16.msra.mxu1 %v8153_v31 }
 0x391   :  { %2588 = vmatpush.bf16.msra.mxu2 %v8154_v15  ;;  %2601 = vmatpush.bf16.msra.mxu3 %v8155_v2 }
 0x392   :  { %2414 = vmatmul.bf16.vlgmr.msrb.gmra.mxu0 %v2265_v49  ;;  %2427 = vmatmul.bf16.vlgmr.msrb.gmra.mxu1 %v2265_v49 }
 0x393   :  { %2440 = vmatmul.bf16.vlgmr.msrb.gmra.mxu2 %v2265_v49  ;;  %2453 = vmatmul.bf16.vlgmr.msrb.gmra.mxu3 %v2265_v49  ;;  %v8181_v49 = vld [vmem:[#allocation68_spill] sm:$0xff] }
 0x394   :  { %2563 = vmatpush.bf16.msra.mxu0 %v8156_v43  ;;  %2576 = vmatpush.bf16.msra.mxu1 %v8157_v30 }
 0x395   :  { %2589 = vmatpush.bf16.msra.mxu2 %v8158_v18  ;;  %2602 = vmatpush.bf16.msra.mxu3 %v8159_v22  ;;  %v8219_v22 = vld [vmem:[#allocation110_spill] sm:$0xff] }
 0x398   :  { %2564 = vmatpush.bf16.msra.mxu0 %v8160_v23  ;;  %2577 = vmatpush.bf16.msra.mxu1 %v8161_v4 }
 0x399   :  { %2590 = vmatpush.bf16.msra.mxu2 %v8162_v44  ;;  %2603 = vmatpush.bf16.msra.mxu3 %v8163_v50 }
 0x39c   :  { %2565 = vmatpush.bf16.msra.mxu0 %v8164_v60  ;;  %2578 = vmatpush.bf16.msra.mxu1 %v8165_v13  ;;  %v8216_v13 = vld [vmem:[#allocation107_spill] sm:$0xff]  ;;  %v8217_v60 = vld [vmem:[#allocation108_spill] sm:$0xff] }
 0x39d   :  { %2591 = vmatpush.bf16.msra.mxu2 %v8166_v5  ;;  %2604 = vmatpush.bf16.msra.mxu3 %v8167_v29 }
 0x3a0   :  { %2566 = vmatpush.bf16.msra.mxu0 %v8168_v34  ;;  %2579 = vmatpush.bf16.msra.mxu1 %v8169_v8 }
 0x3a1   :  { %2592 = vmatpush.bf16.msra.mxu2 %v8170_v25  ;;  %2605 = vmatpush.bf16.msra.mxu3 %v8171_v0  ;;  %v8182_v0 = vld [vmem:[#allocation69_spill] sm:$0xff] }
 0x3a4   :  { %2567 = vmatpush.bf16.msra.mxu0 %v8172_v20  ;;  %2580 = vmatpush.bf16.msra.mxu1 %v8173_v17  ;;  %v8183_v20 = vld [vmem:[#allocation70_spill] sm:$0xff]  ;;  %v8184_v17 = vld [vmem:[#allocation71_spill] sm:$0xff] }
 0x3a5   :  { %2593 = vmatpush.bf16.msra.mxu2 %v8174_v19  ;;  %2606 = vmatpush.bf16.msra.mxu3 %v8175_v10  ;;  %v8185_v19 = vld [vmem:[#allocation72_spill] sm:$0xff]  ;;  %v8186_v10 = vld [vmem:[#allocation73_spill] sm:$0xff] }
 0x3a8   :  { %2568 = vmatpush.bf16.msra.mxu0 %v8176_v21  ;;  %2581 = vmatpush.bf16.msra.mxu1 %v8177_v28  ;;  %v8187_v21 = vld [vmem:[#allocation74_spill] sm:$0xff]  ;;  %v8188_v28 = vld [vmem:[#allocation75_spill] sm:$0xff] }
 0x3a9   :  { %2594 = vmatpush.bf16.msra.mxu2 %v8178_v27  ;;  %2607 = vmatpush.bf16.msra.mxu3 %v8179_v16  ;;  %v8189_v27 = vld [vmem:[#allocation76_spill] sm:$0xff]  ;;  %v8190_v16 = vld [vmem:[#allocation77_spill] sm:$0xff] }
 0x3ac   :  { %2569 = vmatpush.bf16.msra.mxu0 %v8180_v32  ;;  %2582 = vmatpush.bf16.msra.mxu1 %v8181_v49  ;;  %v8191_v32 = vld [vmem:[#allocation78_spill] sm:$0xff]  ;;  %v8192_v49 = vld [vmem:[#allocation79_spill] sm:$0xff] }
 0x3ad   :  { %2595 = vmatpush.bf16.msra.mxu2 %v8182_v0  ;;  %2608 = vmatpush.bf16.msra.mxu3 %v8183_v20  ;;  %v8193_v0 = vld [vmem:[#allocation80_spill] sm:$0xff]  ;;  %v8194_v20 = vld [vmem:[#allocation81_spill] sm:$0xff] }
 0x3b0   :  { %2617 = vmatpush.bf16.msrb.mxu0 %v8184_v17  ;;  %2630 = vmatpush.bf16.msrb.mxu1 %v8185_v19  ;;  %v8195_v17 = vld [vmem:[#allocation82_spill] sm:$0xff]  ;;  %v8196_v19 = vld [vmem:[#allocation83_spill] sm:$0xff] }
 0x3b1   :  { %2643 = vmatpush.bf16.msrb.mxu2 %v8186_v10  ;;  %2656 = vmatpush.bf16.msrb.mxu3 %v8187_v21  ;;  %v8197_v10 = vld [vmem:[#allocation84_spill] sm:$0xff]  ;;  %v8198_v21 = vld [vmem:[#allocation85_spill] sm:$0xff] }
 0x3b4   :  { %2618 = vmatpush.bf16.msrb.mxu0 %v8188_v28  ;;  %2631 = vmatpush.bf16.msrb.mxu1 %v8189_v27  ;;  %v8199_v28 = vld [vmem:[#allocation86_spill] sm:$0xff]  ;;  %v8200_v27 = vld [vmem:[#allocation87_spill] sm:$0xff] }
 0x3b5   :  { %2644 = vmatpush.bf16.msrb.mxu2 %v8190_v16  ;;  %2657 = vmatpush.bf16.msrb.mxu3 %v8191_v32  ;;  %v8201_v16 = vld [vmem:[#allocation89_spill] sm:$0xff]  ;;  %v8202_v32 = vld [vmem:[#allocation91_spill] sm:$0xff] }
 0x3b8   :  { %2619 = vmatpush.bf16.msrb.mxu0 %v8192_v49  ;;  %2632 = vmatpush.bf16.msrb.mxu1 %v8193_v0  ;;  %v8203_v49 = vld [vmem:[#allocation92_spill] sm:$0xff]  ;;  %v8204_v0 = vld [vmem:[#allocation93_spill] sm:$0xff] }
 0x3b9   :  { %2645 = vmatpush.bf16.msrb.mxu2 %v8194_v20  ;;  %2658 = vmatpush.bf16.msrb.mxu3 %v8195_v17  ;;  %v8205_v20 = vld [vmem:[#allocation94_spill] sm:$0xff]  ;;  %v8206_v17 = vld [vmem:[#allocation95_spill] sm:$0xff] }
 0x3bc   :  { %2620 = vmatpush.bf16.msrb.mxu0 %v8196_v19  ;;  %2633 = vmatpush.bf16.msrb.mxu1 %v8197_v10  ;;  %v8207_v19 = vld [vmem:[#allocation97_spill] sm:$0xff]  ;;  %v8208_v10 = vld [vmem:[#allocation99_spill] sm:$0xff] }
 0x3bd   :  { %2646 = vmatpush.bf16.msrb.mxu2 %v8198_v21  ;;  %2659 = vmatpush.bf16.msrb.mxu3 %v8199_v28  ;;  %v8209_v21 = vld [vmem:[#allocation100_spill] sm:$0xff]  ;;  %v8210_v28 = vld [vmem:[#allocation101_spill] sm:$0xff] }
 0x3c0   :  { %2621 = vmatpush.bf16.msrb.mxu0 %v8200_v27  ;;  %2634 = vmatpush.bf16.msrb.mxu1 %v8201_v16  ;;  %v8211_v27 = vld [vmem:[#allocation102_spill] sm:$0xff]  ;;  %v8212_v16 = vld [vmem:[#allocation103_spill] sm:$0xff] }
 0x3c1   :  { %2647 = vmatpush.bf16.msrb.mxu2 %v8202_v32  ;;  %2660 = vmatpush.bf16.msrb.mxu3 %v8203_v49  ;;  %v8213_v32 = vld [vmem:[#allocation104_spill] sm:$0xff]  ;;  %v8214_v49 = vld [vmem:[#allocation105_spill] sm:$0xff] }
 0x3c4   :  { %2622 = vmatpush.bf16.msrb.mxu0 %v8204_v0  ;;  %2635 = vmatpush.bf16.msrb.mxu1 %v8205_v20  ;;  %v8215_v0 = vld [vmem:[#allocation106_spill] sm:$0xff] }
 0x3c5   :  { %2648 = vmatpush.bf16.msrb.mxu2 %v8206_v17  ;;  %2661 = vmatpush.bf16.msrb.mxu3 %v8207_v19 }
 0x3c8   :  { %2623 = vmatpush.bf16.msrb.mxu0 %v8208_v10  ;;  %2636 = vmatpush.bf16.msrb.mxu1 %v8209_v21 }
 0x3c9   :  { %2649 = vmatpush.bf16.msrb.mxu2 %v8210_v28  ;;  %2662 = vmatpush.bf16.msrb.mxu3 %v8211_v27 }
 0x3cc   :  { %2624 = vmatpush.bf16.msrb.mxu0 %v8212_v16  ;;  %2637 = vmatpush.bf16.msrb.mxu1 %v8213_v32 }
 0x3cd   :  { %2650 = vmatpush.bf16.msrb.mxu2 %v8214_v49  ;;  %2663 = vmatpush.bf16.msrb.mxu3 %v8215_v0 }
 0x3eb   :  { %v2219_v20 = vpop.f32.mrf.mxu0  ;;  %v2232_v17 = vpop.f32.mrf.mxu1 }
 0x3f2   :  { %v2245_v25 = vpop.f32.mrf.mxu2  ;;  %v2258_v19 = vpop.f32.mrf.mxu3 }
 0x3f3   :  { %v2221_v8 = vpop.f32.mrf.mxu0  ;;  %v2234_v10 = vpop.f32.mrf.mxu1 }
 0x3fa   :  { %v2247_v34 = vpop.f32.mrf.mxu2  ;;  %v2260_v21 = vpop.f32.mrf.mxu3 }
 0x3fb   :  { %v8218_v34 = vld [vmem:[#allocation109_spill] sm:$0xff] }
 0x3ff   :  { %v2276_v29 = vpop.f32.mrf.mxu0  ;;  %v2289_v28 = vpop.f32.mrf.mxu1 }
 0x400   :  { %v2277_v5 = vadd.f32 %v2276_v29, %v2219_v20  ;;  %v2290_v27 = vadd.f32 %v2289_v28, %v2232_v17 }
 0x402   :  { %v2319_v16 = vadd.f32 %v2277_v5, %v8216_v13  ;;  %v2320_v32 = vadd.f32 %v2290_v27, %v8217_v60 }
 0x404   :  { %v4561_v50 = vmul.f32 -1.442695, %v2319_v16  ;;  %v4562_v49 = vmul.f32 -1.442695, %v2320_v32  ;;  %v8221_v32 = vld [vmem:[#allocation90_spill] sm:$0xff] }
 0x406   :  { %4918 = vpow2.f32 %v4561_v50  ;;  %v2302_v0 = vpop.f32.mrf.mxu2  ;;  %v2315_v44 = vpop.f32.mrf.mxu3 }
 0x407   :  { %4920 = vpow2.f32 %v4562_v49  ;;  %v2303_v4 = vadd.f32 %v2302_v0, %v2245_v25  ;;  %v2316_v23 = vadd.f32 %v2315_v44, %v2258_v19  ;;  %v2278_v8 = vpop.f32.mrf.mxu0  ;;  %v2291_v10 = vpop.f32.mrf.mxu1 }
 0x409   :  { %v2321_v21 = vadd.f32 %v2303_v4, %v8218_v34  ;;  %v2322_v18 = vadd.f32 %v2316_v23, %v8219_v22 }
 0x40b   :  { %v4563_v29 = vmul.f32 -1.442695, %v2321_v21  ;;  %v4564_v20 = vmul.f32 -1.442695, %v2322_v18  ;;  %v8220_v18 = vld [vmem:[#allocation88_spill] sm:$0xff] }
 0x40c   :  { %v4919_v17 = vpop.eup %4918 }
 0x40d   :  { %v4921_v5 = vpop.eup %4920  ;;  %v6741_v28 = vadd.f32 1.0, %v4919_v17  ;;  %4922 = vpow2.f32 %v4563_v29 }
 0x40e   :  { %v6743_v27 = vadd.f32 1.0, %v4921_v5  ;;  %4924 = vpow2.f32 %v4564_v20  ;;  %v2304_v50 = vpop.f32.mrf.mxu2  ;;  %v2317_v16 = vpop.f32.mrf.mxu3 }
 0x40f   :  { %4926 = vrcp.f32 %v6741_v28  ;;  %v2415_v44 = vpop.f32.mrf.mxu0  ;;  %v2428_v25 = vpop.f32.mrf.mxu1  ;;  %vm2344_vm9 = vweird.f32 %v6741_v28 }
 0x410   :  { %4928 = vrcp.f32 %v6743_v27  ;;  %v2462_v4 = vrot.slane %v2415_v44, 4  ;;  %v2463_v23 = vrot.slane %v2428_v25, 4  ;;  %vm2359_vm3 = vweird.f32 %v6743_v27 }
 0x412   :  { %v2470_v19 = vadd.f32 %v2462_v4, %v8220_v18  ;;  %v2471_v49 = vadd.f32 %v2463_v23, %v8221_v32  ;;  %v8222_v18 = vld [vmem:[#allocation98_spill] sm:$0xff] }
 0x413   :  { %v4923_v0 = vpop.eup %4922 }
 0x414   :  { %v4925_v8 = vpop.eup %4924  ;;  %v2337_v10 = vadd.f32 1.0, %v4923_v0  ;;  %v4566_v20 = vmul.f32 -1.442695, %v2470_v19  ;;  %v4567_v5 = vmul.f32 -1.442695, %v2471_v49 }
 0x415   :  { %v6749_v21 = vpop.eup %4926  ;;  %v6751_v29 = vadd.f32 1.0, %v4925_v8 }
 0x416   :  { %v6753_v17 = vpop.eup %4928  ;;  %4930 = vrcp.f32 %v2337_v10  ;;  %v2441_v50 = vpop.f32.mrf.mxu2  ;;  %v2340_v44 = vmul.f32 %v6749_v21, %v6741_v28  ;;  %vm2345_vm6 = vweird.f32 %v6749_v21  ;;  %vm2374_vm8 = vweird.f32 %v2337_v10 }
 0x417   :  { %v2454_v16 = vpop.f32.mrf.mxu3  ;;  %v2355_v25 = vmul.f32 %v6753_v17, %v6743_v27  ;;  %v2417_v4 = vpop.f32.mrf.mxu0  ;;  %4932 = vrcp.f32 %v6751_v29  ;;  %v2464_v19 = vrot.slane %v2441_v50, 4  ;;  %vm2360_vm4 = vweird.f32 %v6753_v17  ;;  %vm6798_vm13 = vmor %vm2344_vm9, %vm2345_vm6 }
 0x418   :  { %v2430_v23 = vpop.f32.mrf.mxu1  ;;  %4934 = vpow2.f32 %v4566_v20  ;;  %v2341_v8 = vsub.f32 1.0, %v2340_v44  ;;  %v2465_v60 = vrot.slane %v2454_v16, 4  ;;  %v2363_v4 = vand.u32 2147483647, %v6743_v27  ;;  %vm6784_vm7 = vmor %vm2359_vm3, %vm2360_vm4 }
 0x419   :  { %v2356_v0 = vsub.f32 1.0, %v2355_v25  ;;  %4936 = vpow2.f32 %v4567_v5  ;;  %v2472_v22 = vadd.f32 %v2464_v19, %v8222_v18  ;;  %v2378_v44 = vand.u32 2147483647, %v2337_v10 }
 0x41a   :  { %v2342_v5 = vmul.f32 %v6749_v21, %v2341_v8  ;;  %v2380_v16 = vand.u32 2147483648, %v2337_v10  ;;  %v2365_v8 = vand.u32 2147483648, %v6743_v27  ;;  %vm2364_vm14 = vcmp.eq.f32.partialorder %v2363_v4, 8.507059e+37 }
 0x41b   :  { %v2357_v49 = vmul.f32 %v6753_v17, %v2356_v0  ;;  %v4568_v23 = vmul.f32 -1.442695, %v2472_v22  ;;  %vm2379_vm11 = vcmp.eq.f32.partialorder %v2378_v44, 8.507059e+37  ;;  %vm2389_vm1 = vweird.f32 %v6751_v29 }
 0x41c   :  { %v4931_v32 = vpop.eup %4930 }
 0x41d   :  { %v2370_v34 = vmul.f32 %v4931_v32, %v2337_v10  ;;  %v6762_v13 = vpop.eup %4932  ;;  %v2358_v19 = vadd.f32 %v6753_v17, %v2357_v49  ;;  %4938 = vpow2.f32 %v4568_v23  ;;  %vm2375_vm5 = vweird.f32 %v4931_v32 }
 0x41e   :  { %v2443_v30 = vpop.f32.mrf.mxu2  ;;  %v4935_v20 = vpop.eup %4934  ;;  %v2343_v49 = vadd.f32 %v6749_v21, %v2342_v5  ;;  %vm2376_vm10 = vmor %vm2374_vm8, %vm2375_vm5  ;;  %v2381_v5 = vor.u32 1.1754944e-38, %v2380_v16  ;;  %vm2390_vm0 = vweird.f32 %v6762_v13 }
 0x41f   :  { %v2456_v25 = vpop.f32.mrf.mxu3  ;;  %v2371_v50 = vsub.f32 1.0, %v2370_v34  ;;  %v4937_v0 = vpop.eup %4936  ;;  %v6769_v18 = vadd.f32 1.0, %v4935_v20  ;;  %v8223_v30 = vld [vmem:[#allocation96_spill] sm:$0xff]  ;;  %v2385_v34 = vmul.f32 %v6762_v13, %v6751_v29  ;;  %v2350_v20 = vand.u32 2147483648, %v6741_v28  ;;  %vm6827_vm2 = vmor %vm2389_vm1, %vm2390_vm0 }
 0x420   :  { %v6771_v2 = vadd.f32 1.0, %v4937_v0  ;;  %v2473_v22 = vadd.f32 %v2465_v60, %v8223_v30  ;;  %v2348_v25 = vand.u32 2147483647, %v6741_v28  ;;  %v2362_v27 = vsel %vm6784_vm7, %v6753_v17, %v2358_v19 }
 0x421   :  { %v2372_v43 = vmul.f32 %v4931_v32, %v2371_v50  ;;  %4940 = vrcp.f32 %v6769_v18  ;;  %v2366_v30 = vor.u32 1.1754944e-38, %v2365_v8  ;;  %v2386_v15 = vsub.f32 1.0, %v2385_v34 }
 0x422   :  { %4942 = vrcp.f32 %v6771_v2  ;;  %v4569_v0 = vmul.f32 -1.442695, %v2473_v22  ;;  %v2347_v16 = vsel %vm6798_vm13, %v6749_v21, %v2343_v49  ;;  %v2351_v44 = vor.u32 1.1754944e-38, %v2350_v20  ;;  %v8228_v49 = vld [vmem:[#allocation29_spill] sm:$0xff] }
 0x423   :  { %v2373_v60 = vadd.f32 %v4931_v32, %v2372_v43  ;;  %v4939_v43 = vpop.eup %4938  ;;  %v2367_v19 = vsel %vm2364_vm14, %v2366_v30, %v2362_v27  ;;  %vm2349_vm15 = vcmp.eq.f32.partialorder %v2348_v25, 8.507059e+37  ;;  %v2387_v8 = vmul.f32 %v6762_v13, %v2386_v15 }
 0x424   :  { %v2488_v17 = vadd.f32 1.0, %v4939_v43  ;;  %4944 = vpow2.f32 %v4569_v0  ;;  %v2352_v4 = vsel %vm2349_vm15, %v2351_v44, %v2347_v16  ;;  %v2395_v30 = vand.u32 2147483648, %v6751_v29 }
 0x425   :  { %v2377_v50 = vsel %vm2376_vm10, %v4931_v32, %v2373_v60  ;;  %v2393_v25 = vand.u32 2147483647, %v6751_v29  ;;  %v2388_v10 = vadd.f32 %v6762_v13, %v2387_v8  ;;  %vm2495_vm3 = vweird.f32 %v6769_v18 }
 0x426   :  { %v2382_v28 = vsel %vm2379_vm11, %v2381_v5, %v2377_v50  ;;  %4946 = vrcp.f32 %v2488_v17  ;;  %v2401_v5 = vmul.f32 %v2367_v19, %v8228_v49  ;;  %v2396_v19 = vor.u32 1.1754944e-38, %v2395_v30 }
 0x427   :  { %v2399_v23 = vmul.f32 2.0, %v2382_v28  ;;  %v6805_v32 = vpop.eup %4940  ;;  %vm6832_vm4 = vcmp.eq.f32.partialorder %v2393_v25, 8.507059e+37  ;;  %v2499_v29 = vand.u32 2147483647, %v6769_v18  ;;  %v2529_v49 = vand.u32 2147483647, %v2488_v17 }
 0x428   :  { %v6807_v22 = vpop.eup %4942  ;;  %v2491_v34 = vmul.f32 %v6805_v32, %v6769_v18  ;;  %vm2510_vm6 = vweird.f32 %v6771_v2  ;;  %vm2496_vm8 = vweird.f32 %v6805_v32  ;;  %v2514_v30 = vand.u32 2147483647, %v6771_v2 }
 0x429   :  { %v4565_v60 = vadd.f32 -1.0, %v2399_v23  ;;  %v2506_v21 = vmul.f32 %v6807_v22, %v6771_v2  ;;  %vm2511_vm5 = vweird.f32 %v6807_v22  ;;  %v2516_v25 = vand.u32 2147483648, %v6771_v2  ;;  %vm6863_vm15 = vmor %vm2495_vm3, %vm2496_vm8 }
 0x42a   :  { %v4945_v20 = vpop.eup %4944  ;;  %v2492_v15 = vsub.f32 1.0, %v2491_v34  ;;  %v2392_v34 = vsel %vm6827_vm2, %v6762_v13, %v2388_v10  ;;  %vm6851_vm9 = vmor %vm2510_vm6, %vm2511_vm5  ;;  %vm2525_vm10 = vweird.f32 %v2488_v17  ;;  %vm2530_vm13 = vcmp.eq.f32.partialorder %v2529_v49, 8.507059e+37 }
 0x42b   :  { %v2402_v50 = vmul.f32 %v4565_v60, %v2352_v4  ;;  %v2507_v0 = vsub.f32 1.0, %v2506_v21  ;;  %v6820_v43 = vadd.f32 1.0, %v4945_v20  ;;  %v2501_v21 = vand.u32 2147483648, %v6769_v18 }
 0x42c   :  { %v4947_v28 = vpop.eup %4946  ;;  %v2493_v4 = vmul.f32 %v6805_v32, %v2492_v15  ;;  %v2397_v13 = vsel %vm6832_vm4, %v2396_v19, %v2392_v34  ;;  %vm3835_vm14 = vcmask 1042432   ;;  %v2517_v34 = vor.u32 1.1754944e-38, %v2516_v25 }
 0x42d   :  { %v6817_v27 = vadd.f32 %v2402_v50, %v2401_v5  ;;  %v2508_v16 = vmul.f32 %v6807_v22, %v2507_v0  ;;  %v2521_v23 = vmul.f32 %v4947_v28, %v2488_v17  ;;  %v2531_v5 = vand.u32 2147483648, %v2488_v17  ;;  %v8242_v17 = vld [vmem:[#allocation45_spill] sm:$0xff] }
 0x42e   :  { %vm2526_vm7 = vweird.f32 %v4947_v28  ;;  %v2494_v10 = vadd.f32 %v6805_v32, %v2493_v4  ;;  %vm2515_vm0 = vcmp.eq.f32.partialorder %v2514_v30, 8.507059e+37  ;;  %vm2500_vm1 = vcmp.eq.f32.partialorder %v2499_v29, 8.507059e+37 }
 0x42f   :  { %8229 = vst [vmem:[#allocation30_spill] sm:$0xff] %v6817_v27  ;;  %4948 = vtanh.f32 %v6817_v27  ;;  %v2522_v8 = vsub.f32 1.0, %v2521_v23  ;;  %v2509_v50 = vadd.f32 %v6807_v22, %v2508_v16  ;;  %vm2527_vm11 = vmor %vm2525_vm10, %vm2526_vm7  ;;  %v2546_v29 = vand.u32 2147483648, %v6820_v43 }
 0x430   :  { %4950 = vrcp.f32 %v6820_v43  ;;  %vm2540_vm3 = vweird.f32 %v6820_v43 }
 0x431   :  { %v2523_v0 = vmul.f32 %v4947_v28, %v2522_v8  ;;  %v2532_v8 = vor.u32 1.1754944e-38, %v2531_v5  ;;  %v2513_v2 = vsel %vm6851_vm9, %v6807_v22, %v2509_v50  ;;  %v2502_v50 = vor.u32 1.1754944e-38, %v2501_v21 }
 0x432   :  { %v2518_v18 = vsel %vm2515_vm0, %v2517_v34, %v2513_v2  ;;  %v2547_v23 = vor.u32 1.1754944e-38, %v2546_v29  ;;  %v8238_v2 = vld [vmem:[#allocation41_spill] sm:$0xff]  ;;  %v8243_v34 = vld [vmem:[#allocation46_spill] sm:$0xff]  ;;  %v8257_v29 = vld [vmem:[#allocation60_spill] sm:$0xff] }
 0x433   :  { %v2524_v16 = vadd.f32 %v4947_v28, %v2523_v0  ;;  %v2498_v0 = vsel %vm6863_vm15, %v6805_v32, %v2494_v10 }
 0x434   :  { %v2503_v32 = vsel %vm2500_vm1, %v2502_v50, %v2498_v0  ;;  %v8246_v0 = vld [vmem:[#allocation49_spill] sm:$0xff]  ;;  %v8248_v50 = vld [vmem:[#allocation51_spill] sm:$0xff] }
 0x435   :  { %v4949_v20 = vpop.eup %4948  ;;  %v2528_v19 = vsel %vm2527_vm11, %v4947_v28, %v2524_v16 }
 0x436   :  { %v4951_v15 = vpop.eup %4950  ;;  %v2405_v44 = vmul.f32 %v4949_v20, %v2397_v13  ;;  %v2533_v49 = vsel %vm2530_vm13, %v2532_v8, %v2528_v19  ;;  %v2553_v20 = vrot.slane %v6634_v62, 7  ;;  %v2544_v13 = vand.u32 2147483647, %v6820_v43  ;;  %v8239_v19 = vld [vmem:[#allocation42_spill] sm:$0xff] }
 0x437   :  { %v2536_v27 = vmul.f32 %v4951_v15, %v6820_v43  ;;  %v2550_v22 = vmul.f32 2.0, %v2533_v49  ;;  %vm2541_vm2 = vweird.f32 %v4951_v15  ;;  %v8244_v49 = vld [vmem:[#allocation47_spill] sm:$0xff] }
 0x438   :  { %v2561_v60 = vpack.c.bf16 %v2405_v44, %v2405_v44  ;;  %v3817_v4 = vrot.slane %v2405_v44, 5  ;;  %vm2542_vm4 = vmor %vm2540_vm3, %vm2541_vm2  ;;  %vm2545_vm5 = vcmp.eq.f32.partialorder %v2544_v13, 8.507059e+37  ;;  %v8258_v13 = vld [vmem:[#allocation61_spill] sm:$0xff] }
 0x439   :  { %v2537_v5 = vsub.f32 1.0, %v2536_v27  ;;  %v4570_v25 = vadd.f32 -1.0, %v2550_v22  ;;  %v8247_v22 = vld [vmem:[#allocation50_spill] sm:$0xff] }
 0x43a   :  { %2570 = vmatmul.bf16.vlgmr.msra.gmra.mxu0 %v2561_v60  ;;  %v6871_v28 = vsel %vm3835_vm14, %v6630_v51, %v3817_v4  ;;  %2583 = vmatmul.bf16.vlgmr.msra.gmra.mxu1 %v2561_v60  ;;  %v2555_v51 = vmul.f32 %v2553_v20, %v2518_v18  ;;  %v8241_v4 = vld [vmem:[#allocation44_spill] sm:$0xff]  ;;  %v8250_v20 = vld [vmem:[#allocation53_spill] sm:$0xff] }
 0x43b   :  { %2596 = vmatmul.bf16.vlgmr.msra.gmra.mxu2 %v2561_v60  ;;  %2609 = vmatmul.bf16.vlgmr.msra.gmra.mxu3 %v2561_v60  ;;  %v2538_v27 = vmul.f32 %v4951_v15, %v2537_v5  ;;  %v2556_v30 = vmul.f32 %v4570_v25, %v2503_v32  ;;  %v8240_v60 = vld [vmem:[#allocation43_spill] sm:$0xff]  ;;  %v8245_v5 = vld [vmem:[#allocation48_spill] sm:$0xff]  ;;  %v8251_v25 = vld [vmem:[#allocation54_spill] sm:$0xff] }
 0x43c   :  { %2756 = vmatpush.bf16.msra.mxu0 %v5511_v40  ;;  %2769 = vmatpush.bf16.msra.mxu1 %v5513_v41  ;;  %v8249_v18 = vld [vmem:[#allocation52_spill] sm:$0xff]  ;;  %v8252_v32 = vld [vmem:[#allocation55_spill] sm:$0xff] }
 0x43d   :  { %2782 = vmatpush.bf16.msra.mxu2 %v5515_v42  ;;  %2795 = vmatpush.bf16.msra.mxu3 %v5517_v46  ;;  %v6878_v21 = vadd.f32 %v2556_v30, %v2555_v51  ;;  %v2539_v62 = vadd.f32 %v4951_v15, %v2538_v27  ;;  %v8253_v27 = vld [vmem:[#allocation56_spill] sm:$0xff]  ;;  %v8254_v51 = vld [vmem:[#allocation57_spill] sm:$0xff]  ;;  %v8255_v30 = vld [vmem:[#allocation58_spill] sm:$0xff] }
 0x43f   :  { %4952 = vtanh.f32 %v6878_v21  ;;  %v2543_v10 = vsel %vm2542_vm4, %v4951_v15, %v2539_v62  ;;  %v8256_v62 = vld [vmem:[#allocation59_spill] sm:$0xff] }
 0x440   :  { %2757 = vmatpush.bf16.msra.mxu0 %v5520_v53  ;;  %2770 = vmatpush.bf16.msra.mxu1 %v5524_v54  ;;  %v2548_v44 = vsel %vm2545_vm5, %v2547_v23, %v2543_v10  ;;  %v8259_v10 = vld [vmem:[#allocation62_spill] sm:$0xff]  ;;  %v8260_v23 = vld [vmem:[#allocation63_spill] sm:$0xff] }
 0x441   :  { %2783 = vmatpush.bf16.msra.mxu2 %v5526_v55  ;;  %2796 = vmatpush.bf16.msra.mxu3 %v5529_v59 }
 0x444   :  { %2758 = vmatpush.bf16.msra.mxu0 %v5532_v1  ;;  %2771 = vmatpush.bf16.msra.mxu1 %v7982_v35 }
 0x445   :  { %2784 = vmatpush.bf16.msra.mxu2 %v7983_v61  ;;  %2797 = vmatpush.bf16.msra.mxu3 %v7984_v33  ;;  %v4953_v16 = vpop.eup %4952 }
 0x446   :  { %v2559_v8 = vmul.f32 %v4953_v16, %v2548_v44  ;;  %v8261_v16 = vld [vmem:[#allocation64_spill] sm:$0xff]  ;;  %v8262_v44 = vld [vmem:[#allocation65_spill] sm:$0xff] }
 0x448   :  { %2759 = vmatpush.bf16.msra.mxu0 %v7985_v7  ;;  %2772 = vmatpush.bf16.msra.mxu1 %v7986_v52  ;;  %v2560_v43 = vpack.c.bf16 %v2559_v8, %v2559_v8  ;;  %v8263_v8 = vld [vmem:[#allocation66_spill] sm:$0xff] }
 0x449   :  { %2785 = vmatpush.bf16.msra.mxu2 %v7987_v3  ;;  %2798 = vmatpush.bf16.msra.mxu3 %v7988_v6 }
 0x44a   :  { %v2615_v15 = vrot.slane %v2560_v43, 2  ;;  %v8264_v43 = vld [vmem:[#allocation67_spill] sm:$0xff] }
 0x44c   :  { %2760 = vmatpush.bf16.msra.mxu0 %v7989_v26  ;;  %2773 = vmatpush.bf16.msra.mxu1 %v7990_v48 }
 0x44d   :  { %2786 = vmatpush.bf16.msra.mxu2 %v7991_v45  ;;  %2799 = vmatpush.bf16.msra.mxu3 %v7992_v24 }
 0x44e   :  { %2625 = vmatmul.bf16.vlgmr.msrb.gmra.mxu0 %v2615_v15  ;;  %2638 = vmatmul.bf16.vlgmr.msrb.gmra.mxu1 %v2615_v15 }
 0x44f   :  { %2651 = vmatmul.bf16.vlgmr.msrb.gmra.mxu2 %v2615_v15  ;;  %2664 = vmatmul.bf16.vlgmr.msrb.gmra.mxu3 %v2615_v15 }
 0x450   :  { %2761 = vmatpush.bf16.msra.mxu0 %v5568_v37  ;;  %2774 = vmatpush.bf16.msra.mxu1 %v5572_v38 }
 0x451   :  { %2787 = vmatpush.bf16.msra.mxu2 %v5574_v39  ;;  %2800 = vmatpush.bf16.msra.mxu3 %v5577_v47 }
 0x454   :  { %2762 = vmatpush.bf16.msra.mxu0 %v5580_v56  ;;  %2775 = vmatpush.bf16.msra.mxu1 %v5584_v57 }
 0x455   :  { %2788 = vmatpush.bf16.msra.mxu2 %v5586_v58  ;;  %2801 = vmatpush.bf16.msra.mxu3 %v5589_v63 }
 0x458   :  { %2763 = vmatpush.bf16.msra.mxu0 %v5592_v9  ;;  %2776 = vmatpush.bf16.msra.mxu1 %v5596_v11 }
 0x459   :  { %2789 = vmatpush.bf16.msra.mxu2 %v5598_v12  ;;  %2802 = vmatpush.bf16.msra.mxu3 %v5601_v14 }
 0x45c   :  { %2912 = vmatpush.bf16.msrb.mxu0 %v8066_v36  ;;  %2925 = vmatpush.bf16.msrb.mxu1 %v8153_v31 }
 0x45d   :  { %2938 = vmatpush.bf16.msrb.mxu2 %v8238_v2  ;;  %2951 = vmatpush.bf16.msrb.mxu3 %v8239_v19 }
 0x45e   :  { %2764 = vmatmul.bf16.vlgmr.msra.gmra.mxu0 %v2615_v15  ;;  %2777 = vmatmul.bf16.vlgmr.msra.gmra.mxu1 %v2615_v15 }
 0x45f   :  { %2790 = vmatmul.bf16.vlgmr.msra.gmra.mxu2 %v2615_v15  ;;  %2803 = vmatmul.bf16.vlgmr.msra.gmra.mxu3 %v2615_v15  ;;  %v8265_v15 = vld [vmem:[#allocation68_spill] sm:$0xff] }
 0x460   :  { %2913 = vmatpush.bf16.msrb.mxu0 %v8240_v60  ;;  %2926 = vmatpush.bf16.msrb.mxu1 %v8241_v4 }
 0x461   :  { %2939 = vmatpush.bf16.msrb.mxu2 %v8242_v17  ;;  %2952 = vmatpush.bf16.msrb.mxu3 %v8243_v34  ;;  %v8303_v34 = vld [vmem:[#allocation110_spill] sm:$0xff] }
 0x464   :  { %2914 = vmatpush.bf16.msrb.mxu0 %v8244_v49  ;;  %2927 = vmatpush.bf16.msrb.mxu1 %v8245_v5 }
 0x465   :  { %2940 = vmatpush.bf16.msrb.mxu2 %v8246_v0  ;;  %2953 = vmatpush.bf16.msrb.mxu3 %v8247_v22 }
 0x468   :  { %2915 = vmatpush.bf16.msrb.mxu0 %v8248_v50  ;;  %2928 = vmatpush.bf16.msrb.mxu1 %v8249_v18  ;;  %v8300_v18 = vld [vmem:[#allocation107_spill] sm:$0xff]  ;;  %v8301_v50 = vld [vmem:[#allocation108_spill] sm:$0xff] }
 0x469   :  { %2941 = vmatpush.bf16.msrb.mxu2 %v8250_v20  ;;  %2954 = vmatpush.bf16.msrb.mxu3 %v8251_v25 }
 0x46c   :  { %2916 = vmatpush.bf16.msrb.mxu0 %v8252_v32  ;;  %2929 = vmatpush.bf16.msrb.mxu1 %v8253_v27 }
 0x46d   :  { %2942 = vmatpush.bf16.msrb.mxu2 %v8254_v51  ;;  %2955 = vmatpush.bf16.msrb.mxu3 %v8255_v30  ;;  %v8266_v30 = vld [vmem:[#allocation69_spill] sm:$0xff] }
 0x470   :  { %2917 = vmatpush.bf16.msrb.mxu0 %v8256_v62  ;;  %2930 = vmatpush.bf16.msrb.mxu1 %v8257_v29  ;;  %v8267_v62 = vld [vmem:[#allocation70_spill] sm:$0xff]  ;;  %v8268_v29 = vld [vmem:[#allocation71_spill] sm:$0xff] }
 0x471   :  { %2943 = vmatpush.bf16.msrb.mxu2 %v8258_v13  ;;  %2956 = vmatpush.bf16.msrb.mxu3 %v8259_v10  ;;  %v8269_v13 = vld [vmem:[#allocation72_spill] sm:$0xff]  ;;  %v8270_v10 = vld [vmem:[#allocation73_spill] sm:$0xff] }
 0x474   :  { %2918 = vmatpush.bf16.msrb.mxu0 %v8260_v23  ;;  %2931 = vmatpush.bf16.msrb.mxu1 %v8261_v16  ;;  %v8271_v23 = vld [vmem:[#allocation74_spill] sm:$0xff]  ;;  %v8272_v16 = vld [vmem:[#allocation75_spill] sm:$0xff] }
 0x475   :  { %2944 = vmatpush.bf16.msrb.mxu2 %v8262_v44  ;;  %2957 = vmatpush.bf16.msrb.mxu3 %v8263_v8  ;;  %v8273_v44 = vld [vmem:[#allocation76_spill] sm:$0xff]  ;;  %v8274_v8 = vld [vmem:[#allocation77_spill] sm:$0xff] }
 0x478   :  { %2919 = vmatpush.bf16.msrb.mxu0 %v8264_v43  ;;  %2932 = vmatpush.bf16.msrb.mxu1 %v8265_v15  ;;  %v8275_v43 = vld [vmem:[#allocation78_spill] sm:$0xff]  ;;  %v8276_v15 = vld [vmem:[#allocation79_spill] sm:$0xff] }
 0x479   :  { %2945 = vmatpush.bf16.msrb.mxu2 %v8266_v30  ;;  %2958 = vmatpush.bf16.msrb.mxu3 %v8267_v62  ;;  %v8277_v30 = vld [vmem:[#allocation80_spill] sm:$0xff]  ;;  %v8278_v62 = vld [vmem:[#allocation81_spill] sm:$0xff] }
 0x47c   :  { %2969 = vmatpush.bf16.msra.mxu0 %v8268_v29  ;;  %2982 = vmatpush.bf16.msra.mxu1 %v8269_v13  ;;  %v8279_v29 = vld [vmem:[#allocation82_spill] sm:$0xff]  ;;  %v8280_v13 = vld [vmem:[#allocation83_spill] sm:$0xff] }
 0x47d   :  { %2995 = vmatpush.bf16.msra.mxu2 %v8270_v10  ;;  %3008 = vmatpush.bf16.msra.mxu3 %v8271_v23  ;;  %v8281_v10 = vld [vmem:[#allocation84_spill] sm:$0xff]  ;;  %v8282_v23 = vld [vmem:[#allocation85_spill] sm:$0xff] }
 0x480   :  { %2970 = vmatpush.bf16.msra.mxu0 %v8272_v16  ;;  %2983 = vmatpush.bf16.msra.mxu1 %v8273_v44  ;;  %v8283_v16 = vld [vmem:[#allocation86_spill] sm:$0xff]  ;;  %v8284_v44 = vld [vmem:[#allocation87_spill] sm:$0xff] }
 0x481   :  { %2996 = vmatpush.bf16.msra.mxu2 %v8274_v8  ;;  %3009 = vmatpush.bf16.msra.mxu3 %v8275_v43  ;;  %v8285_v8 = vld [vmem:[#allocation89_spill] sm:$0xff]  ;;  %v8286_v43 = vld [vmem:[#allocation91_spill] sm:$0xff] }
 0x484   :  { %2971 = vmatpush.bf16.msra.mxu0 %v8276_v15  ;;  %2984 = vmatpush.bf16.msra.mxu1 %v8277_v30  ;;  %v8287_v15 = vld [vmem:[#allocation92_spill] sm:$0xff]  ;;  %v8288_v30 = vld [vmem:[#allocation93_spill] sm:$0xff] }
 0x485   :  { %2997 = vmatpush.bf16.msra.mxu2 %v8278_v62  ;;  %3010 = vmatpush.bf16.msra.mxu3 %v8279_v29  ;;  %v8289_v62 = vld [vmem:[#allocation94_spill] sm:$0xff]  ;;  %v8290_v29 = vld [vmem:[#allocation95_spill] sm:$0xff] }
 0x488   :  { %2972 = vmatpush.bf16.msra.mxu0 %v8280_v13  ;;  %2985 = vmatpush.bf16.msra.mxu1 %v8281_v10  ;;  %v8291_v13 = vld [vmem:[#allocation97_spill] sm:$0xff]  ;;  %v8292_v10 = vld [vmem:[#allocation99_spill] sm:$0xff] }
 0x489   :  { %2998 = vmatpush.bf16.msra.mxu2 %v8282_v23  ;;  %3011 = vmatpush.bf16.msra.mxu3 %v8283_v16  ;;  %v8293_v23 = vld [vmem:[#allocation100_spill] sm:$0xff]  ;;  %v8294_v16 = vld [vmem:[#allocation101_spill] sm:$0xff] }
 0x48c   :  { %2973 = vmatpush.bf16.msra.mxu0 %v8284_v44  ;;  %2986 = vmatpush.bf16.msra.mxu1 %v8285_v8  ;;  %v8295_v44 = vld [vmem:[#allocation102_spill] sm:$0xff]  ;;  %v8296_v8 = vld [vmem:[#allocation103_spill] sm:$0xff] }
 0x48d   :  { %2999 = vmatpush.bf16.msra.mxu2 %v8286_v43  ;;  %3012 = vmatpush.bf16.msra.mxu3 %v8287_v15  ;;  %v8297_v43 = vld [vmem:[#allocation104_spill] sm:$0xff]  ;;  %v8298_v15 = vld [vmem:[#allocation105_spill] sm:$0xff] }
 0x490   :  { %2974 = vmatpush.bf16.msra.mxu0 %v8288_v30  ;;  %2987 = vmatpush.bf16.msra.mxu1 %v8289_v62  ;;  %v8299_v30 = vld [vmem:[#allocation106_spill] sm:$0xff] }
 0x491   :  { %3000 = vmatpush.bf16.msra.mxu2 %v8290_v29  ;;  %3013 = vmatpush.bf16.msra.mxu3 %v8291_v13 }
 0x494   :  { %2975 = vmatpush.bf16.msra.mxu0 %v8292_v10  ;;  %2988 = vmatpush.bf16.msra.mxu1 %v8293_v23 }
 0x495   :  { %3001 = vmatpush.bf16.msra.mxu2 %v8294_v16  ;;  %3014 = vmatpush.bf16.msra.mxu3 %v8295_v44 }
 0x498   :  { %2976 = vmatpush.bf16.msra.mxu0 %v8296_v8  ;;  %2989 = vmatpush.bf16.msra.mxu1 %v8297_v43 }
 0x499   :  { %3002 = vmatpush.bf16.msra.mxu2 %v8298_v15  ;;  %3015 = vmatpush.bf16.msra.mxu3 %v8299_v30 }
 0x4b7   :  { %v2571_v62 = vpop.f32.mrf.mxu0  ;;  %v2584_v29 = vpop.f32.mrf.mxu1 }
 0x4be   :  { %v2597_v51 = vpop.f32.mrf.mxu2  ;;  %v2610_v13 = vpop.f32.mrf.mxu3 }
 0x4bf   :  { %v2573_v27 = vpop.f32.mrf.mxu0  ;;  %v2586_v10 = vpop.f32.mrf.mxu1 }
 0x4c6   :  { %v2599_v32 = vpop.f32.mrf.mxu2  ;;  %v2612_v23 = vpop.f32.mrf.mxu3 }
 0x4c7   :  { %v8302_v32 = vld [vmem:[#allocation109_spill] sm:$0xff] }
 0x4cb   :  { %v2626_v25 = vpop.f32.mrf.mxu0  ;;  %v2639_v16 = vpop.f32.mrf.mxu1 }
 0x4cc   :  { %v2627_v20 = vadd.f32 %v2626_v25, %v2571_v62  ;;  %v2640_v44 = vadd.f32 %v2639_v16, %v2584_v29 }
 0x4ce   :  { %v2669_v8 = vadd.f32 %v2627_v20, %v8300_v18  ;;  %v2670_v43 = vadd.f32 %v2640_v44, %v8301_v50 }
 0x4d0   :  { %v4571_v22 = vmul.f32 -1.442695, %v2669_v8  ;;  %v4572_v15 = vmul.f32 -1.442695, %v2670_v43  ;;  %v8305_v43 = vld [vmem:[#allocation90_spill] sm:$0xff] }
 0x4d2   :  { %4954 = vpow2.f32 %v4571_v22  ;;  %v2652_v30 = vpop.f32.mrf.mxu2  ;;  %v2665_v0 = vpop.f32.mrf.mxu3 }
 0x4d3   :  { %4956 = vpow2.f32 %v4572_v15  ;;  %v2653_v5 = vadd.f32 %v2652_v30, %v2597_v51  ;;  %v2666_v49 = vadd.f32 %v2665_v0, %v2610_v13  ;;  %v2628_v27 = vpop.f32.mrf.mxu0  ;;  %v2641_v10 = vpop.f32.mrf.mxu1 }
 0x4d5   :  { %v2671_v23 = vadd.f32 %v2653_v5, %v8302_v32  ;;  %v2672_v17 = vadd.f32 %v2666_v49, %v8303_v34 }
 0x4d7   :  { %v4573_v25 = vmul.f32 -1.442695, %v2671_v23  ;;  %v4574_v62 = vmul.f32 -1.442695, %v2672_v17  ;;  %v8304_v17 = vld [vmem:[#allocation88_spill] sm:$0xff] }
 0x4d8   :  { %v4955_v29 = vpop.eup %4954 }
 0x4d9   :  { %v4957_v20 = vpop.eup %4956  ;;  %v6980_v16 = vadd.f32 1.0, %v4955_v29  ;;  %4958 = vpow2.f32 %v4573_v25 }
 0x4da   :  { %v6982_v44 = vadd.f32 1.0, %v4957_v20  ;;  %4960 = vpow2.f32 %v4574_v62  ;;  %v2654_v22 = vpop.f32.mrf.mxu2  ;;  %v2667_v8 = vpop.f32.mrf.mxu3 }
 0x4db   :  { %4962 = vrcp.f32 %v6980_v16  ;;  %v2765_v0 = vpop.f32.mrf.mxu0  ;;  %v2778_v51 = vpop.f32.mrf.mxu1  ;;  %vm2694_vm13 = vweird.f32 %v6980_v16 }
 0x4dc   :  { %4964 = vrcp.f32 %v6982_v44  ;;  %v2812_v5 = vrot.slane %v2765_v0, 3  ;;  %v2813_v49 = vrot.slane %v2778_v51, 3  ;;  %vm2709_vm6 = vweird.f32 %v6982_v44 }
 0x4de   :  { %v2820_v13 = vadd.f32 %v2812_v5, %v8304_v17  ;;  %v2821_v15 = vadd.f32 %v2813_v49, %v8305_v43  ;;  %v8306_v17 = vld [vmem:[#allocation98_spill] sm:$0xff] }
 0x4df   :  { %v4959_v30 = vpop.eup %4958 }
 0x4e0   :  { %v4961_v27 = vpop.eup %4960  ;;  %v2687_v10 = vadd.f32 1.0, %v4959_v30  ;;  %v4576_v62 = vmul.f32 -1.442695, %v2820_v13  ;;  %v4577_v20 = vmul.f32 -1.442695, %v2821_v15 }
 0x4e1   :  { %v6988_v23 = vpop.eup %4962  ;;  %v6990_v25 = vadd.f32 1.0, %v4961_v27 }
 0x4e2   :  { %v6992_v29 = vpop.eup %4964  ;;  %4966 = vrcp.f32 %v2687_v10  ;;  %v2791_v22 = vpop.f32.mrf.mxu2  ;;  %v2690_v0 = vmul.f32 %v6988_v23, %v6980_v16  ;;  %vm2695_vm9 = vweird.f32 %v6988_v23  ;;  %vm2724_vm11 = vweird.f32 %v2687_v10 }
 0x4e3   :  { %v2804_v8 = vpop.f32.mrf.mxu3  ;;  %v2705_v51 = vmul.f32 %v6992_v29, %v6982_v44  ;;  %v2767_v5 = vpop.f32.mrf.mxu0  ;;  %4968 = vrcp.f32 %v6990_v25  ;;  %v2814_v13 = vrot.slane %v2791_v22, 3  ;;  %vm2710_vm7 = vweird.f32 %v6992_v29  ;;  %vm7037_vm0 = vmor %vm2694_vm13, %vm2695_vm9 }
 0x4e4   :  { %v2780_v49 = vpop.f32.mrf.mxu1  ;;  %4970 = vpow2.f32 %v4576_v62  ;;  %v2691_v27 = vsub.f32 1.0, %v2690_v0  ;;  %v2815_v50 = vrot.slane %v2804_v8, 3  ;;  %v2713_v5 = vand.u32 2147483647, %v6982_v44  ;;  %vm7023_vm10 = vmor %vm2709_vm6, %vm2710_vm7 }
 0x4e5   :  { %v2706_v30 = vsub.f32 1.0, %v2705_v51  ;;  %4972 = vpow2.f32 %v4577_v20  ;;  %v2822_v34 = vadd.f32 %v2814_v13, %v8306_v17  ;;  %v2728_v0 = vand.u32 2147483647, %v2687_v10 }
 0x4e6   :  { %v2692_v20 = vmul.f32 %v6988_v23, %v2691_v27  ;;  %v2730_v8 = vand.u32 2147483648, %v2687_v10  ;;  %v2715_v27 = vand.u32 2147483648, %v6982_v44  ;;  %vm2714_vm1 = vcmp.eq.f32.partialorder %v2713_v5, 8.507059e+37 }
 0x4e7   :  { %v2707_v15 = vmul.f32 %v6992_v29, %v2706_v30  ;;  %v4578_v49 = vmul.f32 -1.442695, %v2822_v34  ;;  %vm2729_vm15 = vcmp.eq.f32.partialorder %v2728_v0, 8.507059e+37  ;;  %vm2739_vm4 = vweird.f32 %v6990_v25 }
 0x4e8   :  { %v4967_v43 = vpop.eup %4966 }
 0x4e9   :  { %v2720_v32 = vmul.f32 %v4967_v43, %v2687_v10  ;;  %v7001_v18 = vpop.eup %4968  ;;  %v2708_v13 = vadd.f32 %v6992_v29, %v2707_v15  ;;  %4974 = vpow2.f32 %v4578_v49  ;;  %vm2725_vm8 = vweird.f32 %v4967_v43 }
 0x4ea   :  { %v2793_v4 = vpop.f32.mrf.mxu2  ;;  %v4971_v62 = vpop.eup %4970  ;;  %v2693_v15 = vadd.f32 %v6988_v23, %v2692_v20  ;;  %vm2726_vm14 = vmor %vm2724_vm11, %vm2725_vm8  ;;  %v2731_v20 = vor.u32 1.1754944e-38, %v2730_v8  ;;  %vm2740_vm3 = vweird.f32 %v7001_v18 }
 0x4eb   :  { %v2806_v51 = vpop.f32.mrf.mxu3  ;;  %v2721_v22 = vsub.f32 1.0, %v2720_v32  ;;  %v4973_v30 = vpop.eup %4972  ;;  %v7008_v17 = vadd.f32 1.0, %v4971_v62  ;;  %v8307_v4 = vld [vmem:[#allocation96_spill] sm:$0xff]  ;;  %v2735_v32 = vmul.f32 %v7001_v18, %v6990_v25  ;;  %v2700_v62 = vand.u32 2147483648, %v6980_v16  ;;  %vm7066_vm5 = vmor %vm2739_vm4, %vm2740_vm3 }
 0x4ec   :  { %v7010_v19 = vadd.f32 1.0, %v4973_v30  ;;  %v2823_v34 = vadd.f32 %v2815_v50, %v8307_v4  ;;  %v2698_v51 = vand.u32 2147483647, %v6980_v16  ;;  %v2712_v44 = vsel %vm7023_vm10, %v6992_v29, %v2708_v13 }
 0x4ed   :  { %v2722_v60 = vmul.f32 %v4967_v43, %v2721_v22  ;;  %4976 = vrcp.f32 %v7008_v17  ;;  %v2716_v4 = vor.u32 1.1754944e-38, %v2715_v27  ;;  %v2736_v2 = vsub.f32 1.0, %v2735_v32 }
 0x4ee   :  { %4978 = vrcp.f32 %v7010_v19  ;;  %v4579_v30 = vmul.f32 -1.442695, %v2823_v34  ;;  %v2697_v8 = vsel %vm7037_vm0, %v6988_v23, %v2693_v15  ;;  %v2701_v0 = vor.u32 1.1754944e-38, %v2700_v62  ;;  %v8312_v15 = vld [vmem:[#allocation30_spill] sm:$0xff] }
 0x4ef   :  { %v2723_v50 = vadd.f32 %v4967_v43, %v2722_v60  ;;  %v4975_v60 = vpop.eup %4974  ;;  %v2717_v13 = vsel %vm2714_vm1, %v2716_v4, %v2712_v44  ;;  %vm2699_vm2 = vcmp.eq.f32.partialorder %v2698_v51, 8.507059e+37  ;;  %v2737_v27 = vmul.f32 %v7001_v18, %v2736_v2 }
 0x4f0   :  { %v2838_v29 = vadd.f32 1.0, %v4975_v60  ;;  %4980 = vpow2.f32 %v4579_v30  ;;  %v2702_v5 = vsel %vm2699_vm2, %v2701_v0, %v2697_v8  ;;  %v2745_v4 = vand.u32 2147483648, %v6990_v25 }
 0x4f1   :  { %v2727_v22 = vsel %vm2726_vm14, %v4967_v43, %v2723_v50  ;;  %v2743_v51 = vand.u32 2147483647, %v6990_v25  ;;  %v2738_v10 = vadd.f32 %v7001_v18, %v2737_v27  ;;  %vm2845_vm6 = vweird.f32 %v7008_v17 }
 0x4f2   :  { %v2732_v16 = vsel %vm2729_vm15, %v2731_v20, %v2727_v22  ;;  %4982 = vrcp.f32 %v2838_v29  ;;  %v2751_v20 = vmul.f32 %v2717_v13, %v8312_v15  ;;  %v2746_v13 = vor.u32 1.1754944e-38, %v2745_v4 }
 0x4f3   :  { %v2749_v49 = vmul.f32 2.0, %v2732_v16  ;;  %v7044_v43 = vpop.eup %4976  ;;  %vm7071_vm7 = vcmp.eq.f32.partialorder %v2743_v51, 8.507059e+37  ;;  %v2849_v25 = vand.u32 2147483647, %v7008_v17  ;;  %v2879_v15 = vand.u32 2147483647, %v2838_v29 }
 0x4f4   :  { %v7046_v34 = vpop.eup %4978  ;;  %v2841_v32 = vmul.f32 %v7044_v43, %v7008_v17  ;;  %vm2860_vm9 = vweird.f32 %v7010_v19  ;;  %vm2846_vm11 = vweird.f32 %v7044_v43  ;;  %v2864_v4 = vand.u32 2147483647, %v7010_v19 }
 0x4f5   :  { %v4575_v50 = vadd.f32 -1.0, %v2749_v49  ;;  %v2856_v23 = vmul.f32 %v7046_v34, %v7010_v19  ;;  %vm2861_vm8 = vweird.f32 %v7046_v34  ;;  %v2866_v51 = vand.u32 2147483648, %v7010_v19  ;;  %vm7102_vm2 = vmor %vm2845_vm6, %vm2846_vm11 }
 0x4f6   :  { %v4981_v62 = vpop.eup %4980  ;;  %v2842_v2 = vsub.f32 1.0, %v2841_v32  ;;  %v2742_v32 = vsel %vm7066_vm5, %v7001_v18, %v2738_v10  ;;  %vm7090_vm13 = vmor %vm2860_vm9, %vm2861_vm8  ;;  %vm2875_vm14 = vweird.f32 %v2838_v29  ;;  %vm2880_vm0 = vcmp.eq.f32.partialorder %v2879_v15, 8.507059e+37 }
 0x4f7   :  { %v2752_v22 = vmul.f32 %v4575_v50, %v2702_v5  ;;  %v2857_v30 = vsub.f32 1.0, %v2856_v23  ;;  %v7059_v60 = vadd.f32 1.0, %v4981_v62  ;;  %v2851_v23 = vand.u32 2147483648, %v7008_v17 }
 0x4f8   :  { %v4983_v16 = vpop.eup %4982  ;;  %v2843_v5 = vmul.f32 %v7044_v43, %v2842_v2  ;;  %v2747_v18 = vsel %vm7071_vm7, %v2746_v13, %v2742_v32  ;;  %vm3837_vm1 = vcmask 1043456   ;;  %v2867_v32 = vor.u32 1.1754944e-38, %v2866_v51 }
 0x4f9   :  { %v7056_v44 = vadd.f32 %v2752_v22, %v2751_v20  ;;  %v2858_v8 = vmul.f32 %v7046_v34, %v2857_v30  ;;  %v2871_v49 = vmul.f32 %v4983_v16, %v2838_v29  ;;  %v2881_v20 = vand.u32 2147483648, %v2838_v29  ;;  %v8325_v29 = vld [vmem:[#allocation44_spill] sm:$0xff] }
 0x4fa   :  { %vm2876_vm10 = vweird.f32 %v4983_v16  ;;  %v2844_v10 = vadd.f32 %v7044_v43, %v2843_v5  ;;  %vm2865_vm3 = vcmp.eq.f32.partialorder %v2864_v4, 8.507059e+37  ;;  %vm2850_vm4 = vcmp.eq.f32.partialorder %v2849_v25, 8.507059e+37 }
 0x4fb   :  { %8313 = vst [vmem:[#allocation31_spill] sm:$0xff] %v7056_v44  ;;  %4984 = vtanh.f32 %v7056_v44  ;;  %v2872_v27 = vsub.f32 1.0, %v2871_v49  ;;  %v2859_v22 = vadd.f32 %v7046_v34, %v2858_v8  ;;  %vm2877_vm15 = vmor %vm2875_vm14, %vm2876_vm10  ;;  %v2896_v25 = vand.u32 2147483648, %v7059_v60 }
 0x4fc   :  { %4986 = vrcp.f32 %v7059_v60  ;;  %vm2890_vm6 = vweird.f32 %v7059_v60 }
 0x4fd   :  { %v2873_v30 = vmul.f32 %v4983_v16, %v2872_v27  ;;  %v2882_v27 = vor.u32 1.1754944e-38, %v2881_v20  ;;  %v2863_v19 = vsel %vm7090_vm13, %v7046_v34, %v2859_v22  ;;  %v2852_v22 = vor.u32 1.1754944e-38, %v2851_v23 }
 0x4fe   :  { %v2868_v17 = vsel %vm2865_vm3, %v2867_v32, %v2863_v19  ;;  %v2897_v49 = vor.u32 1.1754944e-38, %v2896_v25  ;;  %v8326_v32 = vld [vmem:[#allocation45_spill] sm:$0xff]  ;;  %v8340_v25 = vld [vmem:[#allocation59_spill] sm:$0xff] }
 0x4ff   :  { %v2874_v8 = vadd.f32 %v4983_v16, %v2873_v30  ;;  %v2848_v30 = vsel %vm7102_vm2, %v7044_v43, %v2844_v10 }
 0x500   :  { %v2853_v43 = vsel %vm2850_vm4, %v2852_v22, %v2848_v30  ;;  %v8329_v30 = vld [vmem:[#allocation48_spill] sm:$0xff]  ;;  %v8331_v22 = vld [vmem:[#allocation50_spill] sm:$0xff] }
 0x501   :  { %v4985_v62 = vpop.eup %4984  ;;  %v2878_v13 = vsel %vm2877_vm15, %v4983_v16, %v2874_v8 }
 0x502   :  { %v4987_v2 = vpop.eup %4986  ;;  %v2755_v0 = vmul.f32 %v4985_v62, %v2747_v18  ;;  %v2883_v15 = vsel %vm2880_vm0, %v2882_v27, %v2878_v13  ;;  %v2903_v62 = vrot.slane %v6878_v21, 7  ;;  %v2894_v18 = vand.u32 2147483647, %v7059_v60  ;;  %v8322_v13 = vld [vmem:[#allocation41_spill] sm:$0xff] }
 0x503   :  { %v2886_v44 = vmul.f32 %v4987_v2, %v7059_v60  ;;  %v2900_v34 = vmul.f32 2.0, %v2883_v15  ;;  %vm2891_vm5 = vweird.f32 %v4987_v2  ;;  %v8327_v15 = vld [vmem:[#allocation46_spill] sm:$0xff] }
 0x504   :  { %v2911_v50 = vpack.c.bf16 %v2755_v0, %v2755_v0  ;;  %v3820_v5 = vrot.slane %v2755_v0, 4  ;;  %vm2892_vm7 = vmor %vm2890_vm6, %vm2891_vm5  ;;  %vm2895_vm8 = vcmp.eq.f32.partialorder %v2894_v18, 8.507059e+37  ;;  %v8341_v18 = vld [vmem:[#allocation60_spill] sm:$0xff] }
 0x505   :  { %v2887_v20 = vsub.f32 1.0, %v2886_v44  ;;  %v4580_v51 = vadd.f32 -1.0, %v2900_v34  ;;  %v8330_v34 = vld [vmem:[#allocation49_spill] sm:$0xff] }
 0x506   :  { %2920 = vmatmul.bf16.vlgmr.msrb.gmra.mxu0 %v2911_v50  ;;  %2933 = vmatmul.bf16.vlgmr.msrb.gmra.mxu1 %v2911_v50  ;;  %v7110_v16 = vsel %vm3837_vm1, %v6871_v28, %v3820_v5  ;;  %v2905_v28 = vmul.f32 %v2903_v62, %v2868_v17  ;;  %v8324_v5 = vld [vmem:[#allocation43_spill] sm:$0xff]  ;;  %v8333_v62 = vld [vmem:[#allocation52_spill] sm:$0xff] }
 0x507   :  { %2946 = vmatmul.bf16.vlgmr.msrb.gmra.mxu2 %v2911_v50  ;;  %2959 = vmatmul.bf16.vlgmr.msrb.gmra.mxu3 %v2911_v50  ;;  %v2888_v44 = vmul.f32 %v4987_v2, %v2887_v20  ;;  %v2906_v4 = vmul.f32 %v4580_v51, %v2853_v43  ;;  %v8323_v50 = vld [vmem:[#allocation42_spill] sm:$0xff]  ;;  %v8328_v20 = vld [vmem:[#allocation47_spill] sm:$0xff]  ;;  %v8334_v51 = vld [vmem:[#allocation53_spill] sm:$0xff] }
 0x508   :  { %3108 = vmatpush.bf16.msrb.mxu0 %v5511_v40  ;;  %3121 = vmatpush.bf16.msrb.mxu1 %v5513_v41  ;;  %v8332_v17 = vld [vmem:[#allocation51_spill] sm:$0xff]  ;;  %v8335_v43 = vld [vmem:[#allocation54_spill] sm:$0xff] }
 0x509   :  { %3134 = vmatpush.bf16.msrb.mxu2 %v5515_v42  ;;  %3147 = vmatpush.bf16.msrb.mxu3 %v5517_v46  ;;  %v7117_v23 = vadd.f32 %v2906_v4, %v2905_v28  ;;  %v2889_v21 = vadd.f32 %v4987_v2, %v2888_v44  ;;  %v8336_v44 = vld [vmem:[#allocation55_spill] sm:$0xff]  ;;  %v8337_v28 = vld [vmem:[#allocation56_spill] sm:$0xff]  ;;  %v8338_v4 = vld [vmem:[#allocation57_spill] sm:$0xff] }
 0x50b   :  { %4988 = vtanh.f32 %v7117_v23  ;;  %v2893_v10 = vsel %vm2892_vm7, %v4987_v2, %v2889_v21  ;;  %v8339_v21 = vld [vmem:[#allocation58_spill] sm:$0xff] }
 0x50c   :  { %3109 = vmatpush.bf16.msrb.mxu0 %v5520_v53  ;;  %3122 = vmatpush.bf16.msrb.mxu1 %v5524_v54  ;;  %v2898_v0 = vsel %vm2895_vm8, %v2897_v49, %v2893_v10  ;;  %v8342_v10 = vld [vmem:[#allocation61_spill] sm:$0xff]  ;;  %v8343_v49 = vld [vmem:[#allocation62_spill] sm:$0xff] }
 0x50d   :  { %3135 = vmatpush.bf16.msrb.mxu2 %v5526_v55  ;;  %3148 = vmatpush.bf16.msrb.mxu3 %v5529_v59 }
 0x510   :  { %3110 = vmatpush.bf16.msrb.mxu0 %v5532_v1  ;;  %3123 = vmatpush.bf16.msrb.mxu1 %v7982_v35 }
 0x511   :  { %3136 = vmatpush.bf16.msrb.mxu2 %v7983_v61  ;;  %3149 = vmatpush.bf16.msrb.mxu3 %v7984_v33  ;;  %v4989_v8 = vpop.eup %4988 }
 0x512   :  { %v2909_v27 = vmul.f32 %v4989_v8, %v2898_v0  ;;  %v8344_v8 = vld [vmem:[#allocation63_spill] sm:$0xff]  ;;  %v8345_v0 = vld [vmem:[#allocation64_spill] sm:$0xff] }
 0x514   :  { %3111 = vmatpush.bf16.msrb.mxu0 %v7985_v7  ;;  %3124 = vmatpush.bf16.msrb.mxu1 %v7986_v52  ;;  %v2910_v60 = vpack.c.bf16 %v2909_v27, %v2909_v27  ;;  %v8346_v27 = vld [vmem:[#allocation65_spill] sm:$0xff] }
 0x515   :  { %3137 = vmatpush.bf16.msrb.mxu2 %v7987_v3  ;;  %3150 = vmatpush.bf16.msrb.mxu3 %v7988_v6 }
 0x516   :  { %v2965_v2 = vshrl.u32 %v2910_v60, 16  ;;  %v8347_v60 = vld [vmem:[#allocation66_spill] sm:$0xff] }
 0x518   :  { %3112 = vmatpush.bf16.msrb.mxu0 %v7989_v26  ;;  %3125 = vmatpush.bf16.msrb.mxu1 %v7990_v48  ;;  %v2967_v19 = vrot.slane %v2965_v2, 2  ;;  %v8348_v2 = vld [vmem:[#allocation67_spill] sm:$0xff] }
 0x519   :  { %3138 = vmatpush.bf16.msrb.mxu2 %v7991_v45  ;;  %3151 = vmatpush.bf16.msrb.mxu3 %v7992_v24 }
 0x51a   :  { %2977 = vmatmul.bf16.vlgmr.msra.gmra.mxu0 %v2967_v19  ;;  %2990 = vmatmul.bf16.vlgmr.msra.gmra.mxu1 %v2967_v19 }
 0x51b   :  { %3003 = vmatmul.bf16.vlgmr.msra.gmra.mxu2 %v2967_v19  ;;  %3016 = vmatmul.bf16.vlgmr.msra.gmra.mxu3 %v2967_v19 }
 0x51c   :  { %3113 = vmatpush.bf16.msrb.mxu0 %v5568_v37  ;;  %3126 = vmatpush.bf16.msrb.mxu1 %v5572_v38 }
 0x51d   :  { %3139 = vmatpush.bf16.msrb.mxu2 %v5574_v39  ;;  %3152 = vmatpush.bf16.msrb.mxu3 %v5577_v47 }
 0x520   :  { %3114 = vmatpush.bf16.msrb.mxu0 %v5580_v56  ;;  %3127 = vmatpush.bf16.msrb.mxu1 %v5584_v57 }
 0x521   :  { %3140 = vmatpush.bf16.msrb.mxu2 %v5586_v58  ;;  %3153 = vmatpush.bf16.msrb.mxu3 %v5589_v63 }
 0x524   :  { %3115 = vmatpush.bf16.msrb.mxu0 %v5592_v9  ;;  %3128 = vmatpush.bf16.msrb.mxu1 %v5596_v11 }
 0x525   :  { %3141 = vmatpush.bf16.msrb.mxu2 %v5598_v12  ;;  %3154 = vmatpush.bf16.msrb.mxu3 %v5601_v14 }
 0x528   :  { %3264 = vmatpush.bf16.msra.mxu0 %v8066_v36  ;;  %3277 = vmatpush.bf16.msra.mxu1 %v8153_v31 }
 0x529   :  { %3290 = vmatpush.bf16.msra.mxu2 %v8322_v13  ;;  %3303 = vmatpush.bf16.msra.mxu3 %v8323_v50 }
 0x52a   :  { %3116 = vmatmul.bf16.vlgmr.msrb.gmra.mxu0 %v2967_v19  ;;  %3129 = vmatmul.bf16.vlgmr.msrb.gmra.mxu1 %v2967_v19 }
 0x52b   :  { %3142 = vmatmul.bf16.vlgmr.msrb.gmra.mxu2 %v2967_v19  ;;  %3155 = vmatmul.bf16.vlgmr.msrb.gmra.mxu3 %v2967_v19  ;;  %v8349_v19 = vld [vmem:[#allocation68_spill] sm:$0xff] }
 0x52c   :  { %3265 = vmatpush.bf16.msra.mxu0 %v8324_v5  ;;  %3278 = vmatpush.bf16.msra.mxu1 %v8325_v29 }
 0x52d   :  { %3291 = vmatpush.bf16.msra.mxu2 %v8326_v32  ;;  %3304 = vmatpush.bf16.msra.mxu3 %v8327_v15  ;;  %v8387_v15 = vld [vmem:[#allocation110_spill] sm:$0xff] }
 0x530   :  { %3266 = vmatpush.bf16.msra.mxu0 %v8328_v20  ;;  %3279 = vmatpush.bf16.msra.mxu1 %v8329_v30 }
 0x531   :  { %3292 = vmatpush.bf16.msra.mxu2 %v8330_v34  ;;  %3305 = vmatpush.bf16.msra.mxu3 %v8331_v22 }
 0x534   :  { %3267 = vmatpush.bf16.msra.mxu0 %v8332_v17  ;;  %3280 = vmatpush.bf16.msra.mxu1 %v8333_v62  ;;  %v8384_v62 = vld [vmem:[#allocation107_spill] sm:$0xff]  ;;  %v8385_v17 = vld [vmem:[#allocation108_spill] sm:$0xff] }
 0x535   :  { %3293 = vmatpush.bf16.msra.mxu2 %v8334_v51  ;;  %3306 = vmatpush.bf16.msra.mxu3 %v8335_v43 }
 0x538   :  { %3268 = vmatpush.bf16.msra.mxu0 %v8336_v44  ;;  %3281 = vmatpush.bf16.msra.mxu1 %v8337_v28 }
 0x539   :  { %3294 = vmatpush.bf16.msra.mxu2 %v8338_v4  ;;  %3307 = vmatpush.bf16.msra.mxu3 %v8339_v21  ;;  %v8350_v21 = vld [vmem:[#allocation69_spill] sm:$0xff] }
 0x53c   :  { %3269 = vmatpush.bf16.msra.mxu0 %v8340_v25  ;;  %3282 = vmatpush.bf16.msra.mxu1 %v8341_v18  ;;  %v8351_v25 = vld [vmem:[#allocation70_spill] sm:$0xff]  ;;  %v8352_v18 = vld [vmem:[#allocation71_spill] sm:$0xff] }
 0x53d   :  { %3295 = vmatpush.bf16.msra.mxu2 %v8342_v10  ;;  %3308 = vmatpush.bf16.msra.mxu3 %v8343_v49  ;;  %v8353_v10 = vld [vmem:[#allocation72_spill] sm:$0xff]  ;;  %v8354_v49 = vld [vmem:[#allocation73_spill] sm:$0xff] }
 0x540   :  { %3270 = vmatpush.bf16.msra.mxu0 %v8344_v8  ;;  %3283 = vmatpush.bf16.msra.mxu1 %v8345_v0  ;;  %v8355_v8 = vld [vmem:[#allocation74_spill] sm:$0xff]  ;;  %v8356_v0 = vld [vmem:[#allocation75_spill] sm:$0xff] }
 0x541   :  { %3296 = vmatpush.bf16.msra.mxu2 %v8346_v27  ;;  %3309 = vmatpush.bf16.msra.mxu3 %v8347_v60  ;;  %v8357_v27 = vld [vmem:[#allocation76_spill] sm:$0xff]  ;;  %v8358_v60 = vld [vmem:[#allocation77_spill] sm:$0xff] }
 0x544   :  { %3271 = vmatpush.bf16.msra.mxu0 %v8348_v2  ;;  %3284 = vmatpush.bf16.msra.mxu1 %v8349_v19  ;;  %v8359_v2 = vld [vmem:[#allocation78_spill] sm:$0xff]  ;;  %v8360_v19 = vld [vmem:[#allocation79_spill] sm:$0xff] }
 0x545   :  { %3297 = vmatpush.bf16.msra.mxu2 %v8350_v21  ;;  %3310 = vmatpush.bf16.msra.mxu3 %v8351_v25  ;;  %v8361_v21 = vld [vmem:[#allocation80_spill] sm:$0xff]  ;;  %v8362_v25 = vld [vmem:[#allocation81_spill] sm:$0xff] }
 0x548   :  { %3319 = vmatpush.bf16.msrb.mxu0 %v8352_v18  ;;  %3332 = vmatpush.bf16.msrb.mxu1 %v8353_v10  ;;  %v8363_v18 = vld [vmem:[#allocation82_spill] sm:$0xff]  ;;  %v8364_v10 = vld [vmem:[#allocation83_spill] sm:$0xff] }
 0x549   :  { %3345 = vmatpush.bf16.msrb.mxu2 %v8354_v49  ;;  %3358 = vmatpush.bf16.msrb.mxu3 %v8355_v8  ;;  %v8365_v49 = vld [vmem:[#allocation84_spill] sm:$0xff]  ;;  %v8366_v8 = vld [vmem:[#allocation85_spill] sm:$0xff] }
 0x54c   :  { %3320 = vmatpush.bf16.msrb.mxu0 %v8356_v0  ;;  %3333 = vmatpush.bf16.msrb.mxu1 %v8357_v27  ;;  %v8367_v0 = vld [vmem:[#allocation86_spill] sm:$0xff]  ;;  %v8368_v27 = vld [vmem:[#allocation87_spill] sm:$0xff] }
 0x54d   :  { %3346 = vmatpush.bf16.msrb.mxu2 %v8358_v60  ;;  %3359 = vmatpush.bf16.msrb.mxu3 %v8359_v2  ;;  %v8369_v60 = vld [vmem:[#allocation89_spill] sm:$0xff]  ;;  %v8370_v2 = vld [vmem:[#allocation91_spill] sm:$0xff] }
 0x550   :  { %3321 = vmatpush.bf16.msrb.mxu0 %v8360_v19  ;;  %3334 = vmatpush.bf16.msrb.mxu1 %v8361_v21  ;;  %v8371_v19 = vld [vmem:[#allocation92_spill] sm:$0xff]  ;;  %v8372_v21 = vld [vmem:[#allocation93_spill] sm:$0xff] }
 0x551   :  { %3347 = vmatpush.bf16.msrb.mxu2 %v8362_v25  ;;  %3360 = vmatpush.bf16.msrb.mxu3 %v8363_v18  ;;  %v8373_v25 = vld [vmem:[#allocation94_spill] sm:$0xff]  ;;  %v8374_v18 = vld [vmem:[#allocation95_spill] sm:$0xff] }
 0x554   :  { %3322 = vmatpush.bf16.msrb.mxu0 %v8364_v10  ;;  %3335 = vmatpush.bf16.msrb.mxu1 %v8365_v49  ;;  %v8375_v10 = vld [vmem:[#allocation97_spill] sm:$0xff]  ;;  %v8376_v49 = vld [vmem:[#allocation99_spill] sm:$0xff] }
 0x555   :  { %3348 = vmatpush.bf16.msrb.mxu2 %v8366_v8  ;;  %3361 = vmatpush.bf16.msrb.mxu3 %v8367_v0  ;;  %v8377_v8 = vld [vmem:[#allocation100_spill] sm:$0xff]  ;;  %v8378_v0 = vld [vmem:[#allocation101_spill] sm:$0xff] }
 0x558   :  { %3323 = vmatpush.bf16.msrb.mxu0 %v8368_v27  ;;  %3336 = vmatpush.bf16.msrb.mxu1 %v8369_v60  ;;  %v8379_v27 = vld [vmem:[#allocation102_spill] sm:$0xff]  ;;  %v8380_v60 = vld [vmem:[#allocation103_spill] sm:$0xff] }
 0x559   :  { %3349 = vmatpush.bf16.msrb.mxu2 %v8370_v2  ;;  %3362 = vmatpush.bf16.msrb.mxu3 %v8371_v19  ;;  %v8381_v2 = vld [vmem:[#allocation104_spill] sm:$0xff]  ;;  %v8382_v19 = vld [vmem:[#allocation105_spill] sm:$0xff] }
 0x55c   :  { %3324 = vmatpush.bf16.msrb.mxu0 %v8372_v21  ;;  %3337 = vmatpush.bf16.msrb.mxu1 %v8373_v25  ;;  %v8383_v21 = vld [vmem:[#allocation106_spill] sm:$0xff] }
 0x55d   :  { %3350 = vmatpush.bf16.msrb.mxu2 %v8374_v18  ;;  %3363 = vmatpush.bf16.msrb.mxu3 %v8375_v10 }
 0x560   :  { %3325 = vmatpush.bf16.msrb.mxu0 %v8376_v49  ;;  %3338 = vmatpush.bf16.msrb.mxu1 %v8377_v8 }
 0x561   :  { %3351 = vmatpush.bf16.msrb.mxu2 %v8378_v0  ;;  %3364 = vmatpush.bf16.msrb.mxu3 %v8379_v27 }
 0x564   :  { %3326 = vmatpush.bf16.msrb.mxu0 %v8380_v60  ;;  %3339 = vmatpush.bf16.msrb.mxu1 %v8381_v2 }
 0x565   :  { %3352 = vmatpush.bf16.msrb.mxu2 %v8382_v19  ;;  %3365 = vmatpush.bf16.msrb.mxu3 %v8383_v21 }
 0x583   :  { %v2921_v25 = vpop.f32.mrf.mxu0  ;;  %v2934_v18 = vpop.f32.mrf.mxu1 }
 0x58a   :  { %v2947_v4 = vpop.f32.mrf.mxu2  ;;  %v2960_v10 = vpop.f32.mrf.mxu3 }
 0x58b   :  { %v2923_v28 = vpop.f32.mrf.mxu0  ;;  %v2936_v49 = vpop.f32.mrf.mxu1 }
 0x592   :  { %v2949_v44 = vpop.f32.mrf.mxu2  ;;  %v2962_v8 = vpop.f32.mrf.mxu3 }
 0x593   :  { %v8386_v44 = vld [vmem:[#allocation109_spill] sm:$0xff] }
 0x597   :  { %v2978_v43 = vpop.f32.mrf.mxu0  ;;  %v2991_v0 = vpop.f32.mrf.mxu1 }
 0x598   :  { %v2979_v51 = vadd.f32 %v2978_v43, %v2921_v25  ;;  %v2992_v27 = vadd.f32 %v2991_v0, %v2934_v18 }
 0x59a   :  { %v3021_v60 = vadd.f32 %v2979_v51, %v8384_v62  ;;  %v3022_v2 = vadd.f32 %v2992_v27, %v8385_v17 }
 0x59c   :  { %v4581_v22 = vmul.f32 -1.442695, %v3021_v60  ;;  %v4582_v19 = vmul.f32 -1.442695, %v3022_v2  ;;  %v8389_v2 = vld [vmem:[#allocation90_spill] sm:$0xff] }
 0x59e   :  { %4990 = vpow2.f32 %v4581_v22  ;;  %v3004_v21 = vpop.f32.mrf.mxu2  ;;  %v3017_v34 = vpop.f32.mrf.mxu3 }
 0x59f   :  { %4992 = vpow2.f32 %v4582_v19  ;;  %v3005_v30 = vadd.f32 %v3004_v21, %v2947_v4  ;;  %v3018_v20 = vadd.f32 %v3017_v34, %v2960_v10  ;;  %v2980_v28 = vpop.f32.mrf.mxu0  ;;  %v2993_v49 = vpop.f32.mrf.mxu1 }
 0x5a1   :  { %v3023_v8 = vadd.f32 %v3005_v30, %v8386_v44  ;;  %v3024_v32 = vadd.f32 %v3018_v20, %v8387_v15 }
 0x5a3   :  { %v4583_v43 = vmul.f32 -1.442695, %v3023_v8  ;;  %v4584_v25 = vmul.f32 -1.442695, %v3024_v32  ;;  %v8388_v32 = vld [vmem:[#allocation88_spill] sm:$0xff] }
 0x5a4   :  { %v4991_v18 = vpop.eup %4990 }
 0x5a5   :  { %v4993_v51 = vpop.eup %4992  ;;  %v7219_v0 = vadd.f32 1.0, %v4991_v18  ;;  %4994 = vpow2.f32 %v4583_v43 }
 0x5a6   :  { %v7221_v27 = vadd.f32 1.0, %v4993_v51  ;;  %4996 = vpow2.f32 %v4584_v25  ;;  %v3006_v22 = vpop.f32.mrf.mxu2  ;;  %v3019_v60 = vpop.f32.mrf.mxu3 }
 0x5a7   :  { %4998 = vrcp.f32 %v7219_v0  ;;  %v3117_v34 = vpop.f32.mrf.mxu0  ;;  %v3130_v4 = vpop.f32.mrf.mxu1  ;;  %vm3046_vm0 = vweird.f32 %v7219_v0 }
 0x5a8   :  { %5000 = vrcp.f32 %v7221_v27  ;;  %v3164_v30 = vrot.slane %v3117_v34, 2  ;;  %v3165_v20 = vrot.slane %v3130_v4, 2  ;;  %vm3061_vm9 = vweird.f32 %v7221_v27 }
 0x5aa   :  { %v3172_v10 = vadd.f32 %v3164_v30, %v8388_v32  ;;  %v3173_v19 = vadd.f32 %v3165_v20, %v8389_v2  ;;  %v8390_v32 = vld [vmem:[#allocation98_spill] sm:$0xff] }
 0x5ab   :  { %v4995_v21 = vpop.eup %4994 }
 0x5ac   :  { %v4997_v28 = vpop.eup %4996  ;;  %v3039_v49 = vadd.f32 1.0, %v4995_v21  ;;  %v4586_v25 = vmul.f32 -1.442695, %v3172_v10  ;;  %v4587_v51 = vmul.f32 -1.442695, %v3173_v19 }
 0x5ad   :  { %v7227_v8 = vpop.eup %4998  ;;  %v7229_v43 = vadd.f32 1.0, %v4997_v28 }
 0x5ae   :  { %v7231_v18 = vpop.eup %5000  ;;  %5002 = vrcp.f32 %v3039_v49  ;;  %v3143_v22 = vpop.f32.mrf.mxu2  ;;  %v3042_v34 = vmul.f32 %v7227_v8, %v7219_v0  ;;  %vm3047_vm13 = vweird.f32 %v7227_v8  ;;  %vm3076_vm15 = vweird.f32 %v3039_v49 }
 0x5af   :  { %v3156_v60 = vpop.f32.mrf.mxu3  ;;  %v3057_v4 = vmul.f32 %v7231_v18, %v7221_v27  ;;  %v3119_v30 = vpop.f32.mrf.mxu0  ;;  %5004 = vrcp.f32 %v7229_v43  ;;  %v3166_v10 = vrot.slane %v3143_v22, 2  ;;  %vm3062_vm10 = vweird.f32 %v7231_v18  ;;  %vm7276_vm3 = vmor %vm3046_vm0, %vm3047_vm13 }
 0x5b0   :  { %v3132_v20 = vpop.f32.mrf.mxu1  ;;  %5006 = vpow2.f32 %v4586_v25  ;;  %v3043_v28 = vsub.f32 1.0, %v3042_v34  ;;  %v3167_v17 = vrot.slane %v3156_v60, 2  ;;  %v3065_v30 = vand.u32 2147483647, %v7221_v27  ;;  %vm7262_vm14 = vmor %vm3061_vm9, %vm3062_vm10 }
 0x5b1   :  { %v3058_v21 = vsub.f32 1.0, %v3057_v4  ;;  %5008 = vpow2.f32 %v4587_v51  ;;  %v3174_v15 = vadd.f32 %v3166_v10, %v8390_v32  ;;  %v3080_v34 = vand.u32 2147483647, %v3039_v49 }
 0x5b2   :  { %v3044_v51 = vmul.f32 %v7227_v8, %v3043_v28  ;;  %v3082_v60 = vand.u32 2147483648, %v3039_v49  ;;  %v3067_v28 = vand.u32 2147483648, %v7221_v27  ;;  %vm3066_vm4 = vcmp.eq.f32.partialorder %v3065_v30, 8.507059e+37 }
 0x5b3   :  { %v3059_v19 = vmul.f32 %v7231_v18, %v3058_v21  ;;  %v4588_v20 = vmul.f32 -1.442695, %v3174_v15  ;;  %vm3081_vm2 = vcmp.eq.f32.partialorder %v3080_v34, 8.507059e+37  ;;  %vm3091_vm7 = vweird.f32 %v7229_v43 }
 0x5b4   :  { %v5003_v2 = vpop.eup %5002 }
 0x5b5   :  { %v3072_v44 = vmul.f32 %v5003_v2, %v3039_v49  ;;  %v7240_v62 = vpop.eup %5004  ;;  %v3060_v10 = vadd.f32 %v7231_v18, %v3059_v19  ;;  %5010 = vpow2.f32 %v4588_v20  ;;  %vm3077_vm11 = vweird.f32 %v5003_v2 }
 0x5b6   :  { %v3145_v29 = vpop.f32.mrf.mxu2  ;;  %v5007_v25 = vpop.eup %5006  ;;  %v3045_v19 = vadd.f32 %v7227_v8, %v3044_v51  ;;  %vm3078_vm1 = vmor %vm3076_vm15, %vm3077_vm11  ;;  %v3083_v51 = vor.u32 1.1754944e-38, %v3082_v60  ;;  %vm3092_vm6 = vweird.f32 %v7240_v62 }
 0x5b7   :  { %v3158_v4 = vpop.f32.mrf.mxu3  ;;  %v3073_v22 = vsub.f32 1.0, %v3072_v44  ;;  %v5009_v21 = vpop.eup %5008  ;;  %v7247_v32 = vadd.f32 1.0, %v5007_v25  ;;  %v8391_v29 = vld [vmem:[#allocation96_spill] sm:$0xff]  ;;  %v3087_v44 = vmul.f32 %v7240_v62, %v7229_v43  ;;  %v3052_v25 = vand.u32 2147483648, %v7219_v0  ;;  %vm7305_vm8 = vmor %vm3091_vm7, %vm3092_vm6 }
 0x5b8   :  { %v7249_v50 = vadd.f32 1.0, %v5009_v21  ;;  %v3175_v15 = vadd.f32 %v3167_v17, %v8391_v29  ;;  %v3050_v4 = vand.u32 2147483647, %v7219_v0  ;;  %v3064_v27 = vsel %vm7262_vm14, %v7231_v18, %v3060_v10 }
 0x5b9   :  { %v3074_v5 = vmul.f32 %v5003_v2, %v3073_v22  ;;  %5012 = vrcp.f32 %v7247_v32  ;;  %v3068_v29 = vor.u32 1.1754944e-38, %v3067_v28  ;;  %v3088_v13 = vsub.f32 1.0, %v3087_v44 }
 0x5ba   :  { %5014 = vrcp.f32 %v7249_v50  ;;  %v4589_v21 = vmul.f32 -1.442695, %v3175_v15  ;;  %v3049_v60 = vsel %vm7276_vm3, %v7227_v8, %v3045_v19  ;;  %v3053_v34 = vor.u32 1.1754944e-38, %v3052_v25  ;;  %v8396_v19 = vld [vmem:[#allocation31_spill] sm:$0xff] }
 0x5bb   :  { %v3075_v17 = vadd.f32 %v5003_v2, %v3074_v5  ;;  %v5011_v5 = vpop.eup %5010  ;;  %v3069_v10 = vsel %vm3066_vm4, %v3068_v29, %v3064_v27  ;;  %vm3051_vm5 = vcmp.eq.f32.partialorder %v3050_v4, 8.507059e+37  ;;  %v3089_v28 = vmul.f32 %v7240_v62, %v3088_v13 }
 0x5bc   :  { %v3190_v18 = vadd.f32 1.0, %v5011_v5  ;;  %5016 = vpow2.f32 %v4589_v21  ;;  %v3054_v30 = vsel %vm3051_vm5, %v3053_v34, %v3049_v60  ;;  %v3097_v29 = vand.u32 2147483648, %v7229_v43 }
 0x5bd   :  { %v3079_v22 = vsel %vm3078_vm1, %v5003_v2, %v3075_v17  ;;  %v3095_v4 = vand.u32 2147483647, %v7229_v43  ;;  %v3090_v49 = vadd.f32 %v7240_v62, %v3089_v28  ;;  %vm3197_vm9 = vweird.f32 %v7247_v32 }
 0x5be   :  { %v3084_v0 = vsel %vm3081_vm2, %v3083_v51, %v3079_v22  ;;  %5018 = vrcp.f32 %v3190_v18  ;;  %v3103_v51 = vmul.f32 %v3069_v10, %v8396_v19  ;;  %v3098_v10 = vor.u32 1.1754944e-38, %v3097_v29 }
 0x5bf   :  { %v3101_v20 = vmul.f32 2.0, %v3084_v0  ;;  %v7283_v2 = vpop.eup %5012  ;;  %vm7310_vm10 = vcmp.eq.f32.partialorder %v3095_v4, 8.507059e+37  ;;  %v3201_v43 = vand.u32 2147483647, %v7247_v32  ;;  %v3231_v19 = vand.u32 2147483647, %v3190_v18 }
 0x5c0   :  { %v7285_v15 = vpop.eup %5014  ;;  %v3193_v44 = vmul.f32 %v7283_v2, %v7247_v32  ;;  %vm3212_vm13 = vweird.f32 %v7249_v50  ;;  %vm3198_vm15 = vweird.f32 %v7283_v2  ;;  %v3216_v29 = vand.u32 2147483647, %v7249_v50 }
 0x5c1   :  { %v4585_v17 = vadd.f32 -1.0, %v3101_v20  ;;  %v3208_v8 = vmul.f32 %v7285_v15, %v7249_v50  ;;  %vm3213_vm11 = vweird.f32 %v7285_v15  ;;  %v3218_v4 = vand.u32 2147483648, %v7249_v50  ;;  %vm7341_vm5 = vmor %vm3197_vm9, %vm3198_vm15 }
 0x5c2   :  { %v5017_v25 = vpop.eup %5016  ;;  %v3194_v13 = vsub.f32 1.0, %v3193_v44  ;;  %v3094_v44 = vsel %vm7305_vm8, %v7240_v62, %v3090_v49  ;;  %vm7329_vm0 = vmor %vm3212_vm13, %vm3213_vm11  ;;  %vm3227_vm1 = vweird.f32 %v3190_v18  ;;  %vm3232_vm3 = vcmp.eq.f32.partialorder %v3231_v19, 8.507059e+37 }
 0x5c3   :  { %v3104_v22 = vmul.f32 %v4585_v17, %v3054_v30  ;;  %v3209_v21 = vsub.f32 1.0, %v3208_v8  ;;  %v7298_v5 = vadd.f32 1.0, %v5017_v25  ;;  %v3203_v8 = vand.u32 2147483648, %v7247_v32 }
 0x5c4   :  { %v5019_v0 = vpop.eup %5018  ;;  %v3195_v30 = vmul.f32 %v7283_v2, %v3194_v13  ;;  %v3099_v62 = vsel %vm7310_vm10, %v3098_v10, %v3094_v44  ;;  %vm3839_vm4 = vcmask 1044480   ;;  %v3219_v44 = vor.u32 1.1754944e-38, %v3218_v4 }
 0x5c5   :  { %v7295_v27 = vadd.f32 %v3104_v22, %v3103_v51  ;;  %v3210_v60 = vmul.f32 %v7285_v15, %v3209_v21  ;;  %v3223_v20 = vmul.f32 %v5019_v0, %v3190_v18  ;;  %v3233_v51 = vand.u32 2147483648, %v3190_v18  ;;  %v8444_v18 = vld [vmem:[#allocation79_spill] sm:$0xff] }
 0x5c6   :  { %vm3228_vm14 = vweird.f32 %v5019_v0  ;;  %v3196_v49 = vadd.f32 %v7283_v2, %v3195_v30  ;;  %vm3217_vm6 = vcmp.eq.f32.partialorder %v3216_v29, 8.507059e+37  ;;  %vm3202_vm7 = vcmp.eq.f32.partialorder %v3201_v43, 8.507059e+37  ;;  %v8432_v43 = vld [vmem:[#allocation67_spill] sm:$0xff] }
 0x5c7   :  { %8397 = vst [vmem:[#allocation32_spill] sm:$0xff] %v7295_v27  ;;  %5020 = vtanh.f32 %v7295_v27  ;;  %v3224_v28 = vsub.f32 1.0, %v3223_v20  ;;  %v3211_v22 = vadd.f32 %v7285_v15, %v3210_v60  ;;  %vm3229_vm2 = vmor %vm3227_vm1, %vm3228_vm14  ;;  %vm3242_vm9 = vweird.f32 %v7298_v5  ;;  %v8436_v20 = vld [vmem:[#allocation71_spill] sm:$0xff] }
 0x5c8   :  { %5022 = vrcp.f32 %v7298_v5 }
 0x5c9   :  { %v3225_v21 = vmul.f32 %v5019_v0, %v3224_v28  ;;  %v3234_v28 = vor.u32 1.1754944e-38, %v3233_v51  ;;  %v3215_v50 = vsel %vm7329_vm0, %v7285_v15, %v3211_v22  ;;  %v3204_v22 = vor.u32 1.1754944e-38, %v3203_v8 }
 0x5ca   :  { %v3220_v32 = vsel %vm3217_vm6, %v3219_v44, %v3215_v50  ;;  %v8440_v50 = vld [vmem:[#allocation75_spill] sm:$0xff]  ;;  %v8445_v44 = vld [vmem:[#allocation80_spill] sm:$0xff] }
 0x5cb   :  { %v3226_v60 = vadd.f32 %v5019_v0, %v3225_v21  ;;  %v3200_v21 = vsel %vm7341_vm5, %v7283_v2, %v3196_v49  ;;  %v8435_v49 = vld [vmem:[#allocation70_spill] sm:$0xff] }
 0x5cc   :  { %v3205_v2 = vsel %vm3202_vm7, %v3204_v22, %v3200_v21  ;;  %v8448_v21 = vld [vmem:[#allocation83_spill] sm:$0xff]  ;;  %v8450_v22 = vld [vmem:[#allocation85_spill] sm:$0xff] }
 0x5cd   :  { %v5021_v25 = vpop.eup %5020  ;;  %v3230_v10 = vsel %vm3229_vm2, %v5019_v0, %v3226_v60  ;;  %v8437_v60 = vld [vmem:[#allocation72_spill] sm:$0xff] }
 0x5ce   :  { %v5023_v13 = vpop.eup %5022  ;;  %v3107_v34 = vmul.f32 %v5021_v25, %v3099_v62  ;;  %v3235_v19 = vsel %vm3232_vm3, %v3234_v28, %v3230_v10  ;;  %v3255_v25 = vrot.slane %v7117_v23, 7  ;;  %v8433_v62 = vld [vmem:[#allocation68_spill] sm:$0xff]  ;;  %v8439_v28 = vld [vmem:[#allocation74_spill] sm:$0xff] }
 0x5cf   :  { %v3238_v27 = vmul.f32 %v5023_v13, %v7298_v5  ;;  %v3252_v15 = vmul.f32 2.0, %v3235_v19  ;;  %vm3243_vm8 = vweird.f32 %v5023_v13  ;;  %v8441_v10 = vld [vmem:[#allocation76_spill] sm:$0xff]  ;;  %v8446_v19 = vld [vmem:[#allocation81_spill] sm:$0xff] }
 0x5d0   :  { %v3263_v17 = vpack.c.bf16 %v3107_v34, %v3107_v34  ;;  %v3823_v30 = vrot.slane %v3107_v34, 3  ;;  %vm3244_vm10 = vmor %vm3242_vm9, %vm3243_vm8  ;;  %v8438_v34 = vld [vmem:[#allocation73_spill] sm:$0xff] }
 0x5d1   :  { %v3239_v51 = vsub.f32 1.0, %v3238_v27  ;;  %v4590_v4 = vadd.f32 -1.0, %v3252_v15  ;;  %v8449_v15 = vld [vmem:[#allocation84_spill] sm:$0xff] }
 0x5d2   :  { %3272 = vmatmul.bf16.vlgmr.msra.gmra.mxu0 %v3263_v17  ;;  %3285 = vmatmul.bf16.vlgmr.msra.gmra.mxu1 %v3263_v17  ;;  %v7349_v0 = vsel %vm3839_vm4, %v7110_v16, %v3823_v30  ;;  %v3257_v16 = vmul.f32 %v3255_v25, %v3220_v32  ;;  %v8443_v30 = vld [vmem:[#allocation78_spill] sm:$0xff]  ;;  %v8452_v25 = vld [vmem:[#allocation87_spill] sm:$0xff] }
 0x5d3   :  { %3298 = vmatmul.bf16.vlgmr.msra.gmra.mxu2 %v3263_v17  ;;  %3311 = vmatmul.bf16.vlgmr.msra.gmra.mxu3 %v3263_v17  ;;  %v3240_v27 = vmul.f32 %v5023_v13, %v3239_v51  ;;  %v3258_v29 = vmul.f32 %v4590_v4, %v3205_v2  ;;  %v8442_v17 = vld [vmem:[#allocation77_spill] sm:$0xff]  ;;  %v8447_v51 = vld [vmem:[#allocation82_spill] sm:$0xff]  ;;  %v8454_v2 = vld [vmem:[#allocation91_spill] sm:$0xff] }
 0x5d4   :  { %3458 = vmatpush.bf16.msra.mxu0 %v5511_v40  ;;  %3471 = vmatpush.bf16.msra.mxu1 %v5513_v41  ;;  %v3248_v40 = vand.u32 2147483648, %v7298_v5  ;;  %v3246_v41 = vand.u32 2147483647, %v7298_v5  ;;  %v8431_v5 = vld [vmem:[#allocation66_spill] sm:$0xff]  ;;  %v8453_v4 = vld [vmem:[#allocation89_spill] sm:$0xff] }
 0x5d5   :  { %3484 = vmatpush.bf16.msra.mxu2 %v5515_v42  ;;  %3497 = vmatpush.bf16.msra.mxu3 %v5517_v46  ;;  %v7356_v8 = vadd.f32 %v3258_v29, %v3257_v16  ;;  %v3241_v23 = vadd.f32 %v5023_v13, %v3240_v27  ;;  %v8451_v32 = vld [vmem:[#allocation86_spill] sm:$0xff]  ;;  %v8455_v27 = vld [vmem:[#allocation92_spill] sm:$0xff]  ;;  %v8456_v16 = vld [vmem:[#allocation93_spill] sm:$0xff] }
 0x5d6   :  { %v3249_v46 = vor.u32 1.1754944e-38, %v3248_v40  ;;  %vm3247_vm11 = vcmp.eq.f32.partialorder %v3246_v41, 8.507059e+37  ;;  %v8457_v29 = vld [vmem:[#allocation94_spill] sm:$0xff]  ;;  %v8459_v40 = vld [vmem:[#allocation97_spill] sm:$0xff]  ;;  %v8460_v41 = vld [vmem:[#allocation99_spill] sm:$0xff] }
 0x5d7   :  { %5024 = vtanh.f32 %v7356_v8  ;;  %v3245_v42 = vsel %vm3244_vm10, %v5023_v13, %v3241_v23  ;;  %v8434_v13 = vld [vmem:[#allocation69_spill] sm:$0xff]  ;;  %v8458_v23 = vld [vmem:[#allocation95_spill] sm:$0xff] }
 0x5d8   :  { %3459 = vmatpush.bf16.msra.mxu0 %v5520_v53  ;;  %3472 = vmatpush.bf16.msra.mxu1 %v5524_v54  ;;  %v3250_v54 = vsel %vm3247_vm11, %v3249_v46, %v3245_v42  ;;  %v8461_v42 = vld [vmem:[#allocation100_spill] sm:$0xff]  ;;  %v8462_v46 = vld [vmem:[#allocation101_spill] sm:$0xff] }
 0x5d9   :  { %3485 = vmatpush.bf16.msra.mxu2 %v5526_v55  ;;  %3498 = vmatpush.bf16.msra.mxu3 %v5529_v59 }
 0x5dc   :  { %3460 = vmatpush.bf16.msra.mxu0 %v5532_v1  ;;  %3473 = vmatpush.bf16.msra.mxu1 %v7982_v35  ;;  %v8418_v35 = vld [vmem:[#allocation53_spill] sm:$0xff] }
 0x5dd   :  { %3486 = vmatpush.bf16.msra.mxu2 %v7983_v61  ;;  %3499 = vmatpush.bf16.msra.mxu3 %v7984_v33  ;;  %v5025_v53 = vpop.eup %5024  ;;  %v8419_v61 = vld [vmem:[#allocation54_spill] sm:$0xff]  ;;  %v8420_v33 = vld [vmem:[#allocation55_spill] sm:$0xff] }
 0x5de   :  { %v3261_v55 = vmul.f32 %v5025_v53, %v3250_v54  ;;  %v8463_v53 = vld [vmem:[#allocation102_spill] sm:$0xff]  ;;  %v8464_v54 = vld [vmem:[#allocation103_spill] sm:$0xff] }
 0x5e0   :  { %3461 = vmatpush.bf16.msra.mxu0 %v7985_v7  ;;  %3474 = vmatpush.bf16.msra.mxu1 %v7986_v52  ;;  %v3262_v59 = vpack.c.bf16 %v3261_v55, %v3261_v55  ;;  %v8421_v7 = vld [vmem:[#allocation56_spill] sm:$0xff]  ;;  %v8422_v52 = vld [vmem:[#allocation57_spill] sm:$0xff] }
 0x5e1   :  { %3487 = vmatpush.bf16.msra.mxu2 %v7987_v3  ;;  %3500 = vmatpush.bf16.msra.mxu3 %v7988_v6  ;;  %v8423_v3 = vld [vmem:[#allocation58_spill] sm:$0xff]  ;;  %v8424_v6 = vld [vmem:[#allocation59_spill] sm:$0xff]  ;;  %v8465_v55 = vld [vmem:[#allocation104_spill] sm:$0xff] }
 0x5e2   :  { %v3317_v1 = vrot.slane %v3262_v59, 3  ;;  %v8466_v59 = vld [vmem:[#allocation105_spill] sm:$0xff] }
 0x5e4   :  { %3462 = vmatpush.bf16.msra.mxu0 %v7989_v26  ;;  %3475 = vmatpush.bf16.msra.mxu1 %v7990_v48  ;;  %v8425_v26 = vld [vmem:[#allocation60_spill] sm:$0xff]  ;;  %v8426_v48 = vld [vmem:[#allocation61_spill] sm:$0xff] }
 0x5e5   :  { %3488 = vmatpush.bf16.msra.mxu2 %v7991_v45  ;;  %3501 = vmatpush.bf16.msra.mxu3 %v7992_v24  ;;  %v8427_v45 = vld [vmem:[#allocation62_spill] sm:$0xff]  ;;  %v8428_v24 = vld [vmem:[#allocation63_spill] sm:$0xff] }
 0x5e6   :  { %3327 = vmatmul.bf16.vlgmr.msrb.gmra.mxu0 %v3317_v1  ;;  %3340 = vmatmul.bf16.vlgmr.msrb.gmra.mxu1 %v3317_v1 }
 0x5e7   :  { %3353 = vmatmul.bf16.vlgmr.msrb.gmra.mxu2 %v3317_v1  ;;  %3366 = vmatmul.bf16.vlgmr.msrb.gmra.mxu3 %v3317_v1 }
 0x5e8   :  { %3463 = vmatpush.bf16.msra.mxu0 %v5568_v37  ;;  %3476 = vmatpush.bf16.msra.mxu1 %v5572_v38  ;;  %v8406_v37 = vld [vmem:[#allocation41_spill] sm:$0xff]  ;;  %v8407_v38 = vld [vmem:[#allocation42_spill] sm:$0xff] }
 0x5e9   :  { %3489 = vmatpush.bf16.msra.mxu2 %v5574_v39  ;;  %3502 = vmatpush.bf16.msra.mxu3 %v5577_v47  ;;  %v8408_v39 = vld [vmem:[#allocation43_spill] sm:$0xff]  ;;  %v8409_v47 = vld [vmem:[#allocation44_spill] sm:$0xff] }
 0x5ec   :  { %3464 = vmatpush.bf16.msra.mxu0 %v5580_v56  ;;  %3477 = vmatpush.bf16.msra.mxu1 %v5584_v57  ;;  %v8410_v56 = vld [vmem:[#allocation45_spill] sm:$0xff]  ;;  %v8411_v57 = vld [vmem:[#allocation46_spill] sm:$0xff] }
 0x5ed   :  { %3490 = vmatpush.bf16.msra.mxu2 %v5586_v58  ;;  %3503 = vmatpush.bf16.msra.mxu3 %v5589_v63  ;;  %v8412_v58 = vld [vmem:[#allocation47_spill] sm:$0xff]  ;;  %v8413_v63 = vld [vmem:[#allocation48_spill] sm:$0xff] }
 0x5f0   :  { %3465 = vmatpush.bf16.msra.mxu0 %v5592_v9  ;;  %3478 = vmatpush.bf16.msra.mxu1 %v5596_v11  ;;  %v8414_v9 = vld [vmem:[#allocation49_spill] sm:$0xff]  ;;  %v8415_v11 = vld [vmem:[#allocation50_spill] sm:$0xff] }
 0x5f1   :  { %3491 = vmatpush.bf16.msra.mxu2 %v5598_v12  ;;  %3504 = vmatpush.bf16.msra.mxu3 %v5601_v14  ;;  %v8416_v12 = vld [vmem:[#allocation51_spill] sm:$0xff]  ;;  %v8417_v14 = vld [vmem:[#allocation52_spill] sm:$0xff] }
 0x5f4   :  { %3614 = vmatpush.bf16.msrb.mxu0 %v8066_v36  ;;  %3627 = vmatpush.bf16.msrb.mxu1 %v8153_v31  ;;  %v8429_v36 = vld [vmem:[#allocation64_spill] sm:$0xff]  ;;  %v8430_v31 = vld [vmem:[#allocation65_spill] sm:$0xff] }
 0x5f5   :  { %3640 = vmatpush.bf16.msrb.mxu2 %v8406_v37  ;;  %3653 = vmatpush.bf16.msrb.mxu3 %v8407_v38 }
 0x5f6   :  { %3466 = vmatmul.bf16.vlgmr.msra.gmra.mxu0 %v3317_v1  ;;  %3479 = vmatmul.bf16.vlgmr.msra.gmra.mxu1 %v3317_v1 }
 0x5f7   :  { %3492 = vmatmul.bf16.vlgmr.msra.gmra.mxu2 %v3317_v1  ;;  %3505 = vmatmul.bf16.vlgmr.msra.gmra.mxu3 %v3317_v1  ;;  %v8467_v1 = vld [vmem:[#allocation106_spill] sm:$0xff] }
 0x5f8   :  { %3615 = vmatpush.bf16.msrb.mxu0 %v8408_v39  ;;  %3628 = vmatpush.bf16.msrb.mxu1 %v8409_v47 }
 0x5f9   :  { %3641 = vmatpush.bf16.msrb.mxu2 %v8410_v56  ;;  %3654 = vmatpush.bf16.msrb.mxu3 %v8411_v57 }
 0x5fc   :  { %3616 = vmatpush.bf16.msrb.mxu0 %v8412_v58  ;;  %3629 = vmatpush.bf16.msrb.mxu1 %v8413_v63 }
 0x5fd   :  { %3642 = vmatpush.bf16.msrb.mxu2 %v8414_v9  ;;  %3655 = vmatpush.bf16.msrb.mxu3 %v8415_v11 }
 0x600   :  { %3617 = vmatpush.bf16.msrb.mxu0 %v8416_v12  ;;  %3630 = vmatpush.bf16.msrb.mxu1 %v8417_v14 }
 0x601   :  { %3643 = vmatpush.bf16.msrb.mxu2 %v8418_v35  ;;  %3656 = vmatpush.bf16.msrb.mxu3 %v8419_v61  ;;  %v8468_v35 = vld [vmem:[#allocation107_spill] sm:$0xff] }
 0x604   :  { %3618 = vmatpush.bf16.msrb.mxu0 %v8420_v33  ;;  %3631 = vmatpush.bf16.msrb.mxu1 %v8421_v7  ;;  %v8469_v33 = vld [vmem:[#allocation108_spill] sm:$0xff] }
 0x605   :  { %3644 = vmatpush.bf16.msrb.mxu2 %v8422_v52  ;;  %3657 = vmatpush.bf16.msrb.mxu3 %v8423_v3 }
 0x608   :  { %3619 = vmatpush.bf16.msrb.mxu0 %v8424_v6  ;;  %3632 = vmatpush.bf16.msrb.mxu1 %v8425_v26 }
 0x609   :  { %3645 = vmatpush.bf16.msrb.mxu2 %v8426_v48  ;;  %3658 = vmatpush.bf16.msrb.mxu3 %v8427_v45 }
 0x60c   :  { %3620 = vmatpush.bf16.msrb.mxu0 %v8428_v24  ;;  %3633 = vmatpush.bf16.msrb.mxu1 %v8429_v36 }
 0x60d   :  { %3646 = vmatpush.bf16.msrb.mxu2 %v8430_v31  ;;  %3659 = vmatpush.bf16.msrb.mxu3 %v8431_v5  ;;  %v8470_v31 = vld [vmem:[#allocation109_spill] sm:$0xff] }
 0x610   :  { %3621 = vmatpush.bf16.msrb.mxu0 %v8432_v43  ;;  %3634 = vmatpush.bf16.msrb.mxu1 %v8433_v62  ;;  %v8471_v43 = vld [vmem:[#allocation110_spill] sm:$0xff] }
 0x611   :  { %3647 = vmatpush.bf16.msrb.mxu2 %v8434_v13  ;;  %3660 = vmatpush.bf16.msrb.mxu3 %v8435_v49 }
 0x614   :  { %3671 = vmatpush.bf16.msra.mxu0 %v8436_v20  ;;  %3684 = vmatpush.bf16.msra.mxu1 %v8437_v60 }
 0x615   :  { %3697 = vmatpush.bf16.msra.mxu2 %v8438_v34  ;;  %3710 = vmatpush.bf16.msra.mxu3 %v8439_v28 }
 0x618   :  { %3672 = vmatpush.bf16.msra.mxu0 %v8440_v50  ;;  %3685 = vmatpush.bf16.msra.mxu1 %v8441_v10 }
 0x619   :  { %3698 = vmatpush.bf16.msra.mxu2 %v8442_v17  ;;  %3711 = vmatpush.bf16.msra.mxu3 %v8443_v30 }
 0x61c   :  { %3673 = vmatpush.bf16.msra.mxu0 %v8444_v18  ;;  %3686 = vmatpush.bf16.msra.mxu1 %v8445_v44 }
 0x61d   :  { %3699 = vmatpush.bf16.msra.mxu2 %v8446_v19  ;;  %3712 = vmatpush.bf16.msra.mxu3 %v8447_v51  ;;  %v8472_v51 = vld [vmem:[#allocation88_spill] sm:$0xff] }
 0x620   :  { %3674 = vmatpush.bf16.msra.mxu0 %v8448_v21  ;;  %3687 = vmatpush.bf16.msra.mxu1 %v8449_v15  ;;  %v8473_v15 = vld [vmem:[#allocation90_spill] sm:$0xff] }
 0x621   :  { %3700 = vmatpush.bf16.msra.mxu2 %v8450_v22  ;;  %3713 = vmatpush.bf16.msra.mxu3 %v8451_v32 }
 0x624   :  { %3675 = vmatpush.bf16.msra.mxu0 %v8452_v25  ;;  %3688 = vmatpush.bf16.msra.mxu1 %v8453_v4 }
 0x625   :  { %3701 = vmatpush.bf16.msra.mxu2 %v8454_v2  ;;  %3714 = vmatpush.bf16.msra.mxu3 %v8455_v27 }
 0x628   :  { %3676 = vmatpush.bf16.msra.mxu0 %v8456_v16  ;;  %3689 = vmatpush.bf16.msra.mxu1 %v8457_v29 }
 0x629   :  { %3702 = vmatpush.bf16.msra.mxu2 %v8458_v23  ;;  %3715 = vmatpush.bf16.msra.mxu3 %v8459_v40 }
 0x62c   :  { %3677 = vmatpush.bf16.msra.mxu0 %v8460_v41  ;;  %3690 = vmatpush.bf16.msra.mxu1 %v8461_v42 }
 0x62d   :  { %3703 = vmatpush.bf16.msra.mxu2 %v8462_v46  ;;  %3716 = vmatpush.bf16.msra.mxu3 %v8463_v53 }
 0x630   :  { %3678 = vmatpush.bf16.msra.mxu0 %v8464_v54  ;;  %3691 = vmatpush.bf16.msra.mxu1 %v8465_v55 }
 0x631   :  { %3704 = vmatpush.bf16.msra.mxu2 %v8466_v59  ;;  %3717 = vmatpush.bf16.msra.mxu3 %v8467_v1 }
 0x64f   :  { %v3273_v37 = vpop.f32.mrf.mxu0  ;;  %v3286_v38 = vpop.f32.mrf.mxu1 }
 0x656   :  { %v3299_v39 = vpop.f32.mrf.mxu2  ;;  %v3312_v47 = vpop.f32.mrf.mxu3 }
 0x657   :  { %v3275_v56 = vpop.f32.mrf.mxu0  ;;  %v3288_v57 = vpop.f32.mrf.mxu1 }
 0x65e   :  { %v3301_v58 = vpop.f32.mrf.mxu2  ;;  %v3314_v63 = vpop.f32.mrf.mxu3 }
 0x663   :  { %v3328_v9 = vpop.f32.mrf.mxu0  ;;  %v3341_v11 = vpop.f32.mrf.mxu1 }
 0x664   :  { %v3329_v12 = vadd.f32 %v3328_v9, %v3273_v37  ;;  %v3342_v14 = vadd.f32 %v3341_v11, %v3286_v38  ;;  %v8474_v38 = vld [vmem:[#allocation98_spill] sm:$0xff] }
 0x666   :  { %v3371_v61 = vadd.f32 %v3329_v12, %v8468_v35  ;;  %v3372_v7 = vadd.f32 %v3342_v14, %v8469_v33 }
 0x668   :  { %v4591_v52 = vmul.f32 -1.442695, %v3371_v61  ;;  %v4592_v3 = vmul.f32 -1.442695, %v3372_v7 }
 0x66a   :  { %5026 = vpow2.f32 %v4591_v52  ;;  %v3354_v6 = vpop.f32.mrf.mxu2  ;;  %v3367_v26 = vpop.f32.mrf.mxu3 }
 0x66b   :  { %5028 = vpow2.f32 %v4592_v3  ;;  %v3355_v48 = vadd.f32 %v3354_v6, %v3299_v39  ;;  %v3368_v45 = vadd.f32 %v3367_v26, %v3312_v47  ;;  %v3330_v24 = vpop.f32.mrf.mxu0  ;;  %v3343_v36 = vpop.f32.mrf.mxu1 }
 0x66c   :  { %v8475_v24 = vld [vmem:[#allocation96_spill] sm:$0xff] }
 0x66d   :  { %v3373_v5 = vadd.f32 %v3355_v48, %v8470_v31  ;;  %v3374_v62 = vadd.f32 %v3368_v45, %v8471_v43 }
 0x66f   :  { %v4593_v13 = vmul.f32 -1.442695, %v3373_v5  ;;  %v4594_v49 = vmul.f32 -1.442695, %v3374_v62 }
 0x670   :  { %v5027_v20 = vpop.eup %5026 }
 0x671   :  { %v5029_v60 = vpop.eup %5028  ;;  %v7458_v34 = vadd.f32 1.0, %v5027_v20  ;;  %5030 = vpow2.f32 %v4593_v13 }
 0x672   :  { %v7460_v28 = vadd.f32 1.0, %v5029_v60  ;;  %5032 = vpow2.f32 %v4594_v49  ;;  %v3356_v50 = vpop.f32.mrf.mxu2  ;;  %v3369_v10 = vpop.f32.mrf.mxu3 }
 0x673   :  { %5034 = vrcp.f32 %v7458_v34  ;;  %v3467_v17 = vpop.f32.mrf.mxu0  ;;  %v3480_v30 = vpop.f32.mrf.mxu1  ;;  %vm3396_vm3 = vweird.f32 %v7458_v34  ;;  %v3400_v60 = vand.u32 2147483647, %v7458_v34  ;;  %v3402_v50 = vand.u32 2147483648, %v7458_v34 }
 0x674   :  { %5036 = vrcp.f32 %v7460_v28  ;;  %v3514_v18 = vrot.slane %v3467_v17, 1  ;;  %v3515_v44 = vrot.slane %v3480_v30, 1  ;;  %vm3411_vm13 = vweird.f32 %v7460_v28 }
 0x675   :  { %v3415_v58 = vand.u32 2147483647, %v7460_v28  ;;  %v3417_v5 = vand.u32 2147483648, %v7460_v28  ;;  %vm3401_vm8 = vcmp.eq.f32.partialorder %v3400_v60, 8.507059e+37 }
 0x676   :  { %v3522_v21 = vadd.f32 %v3514_v18, %v8472_v51  ;;  %v3523_v22 = vadd.f32 %v3515_v44, %v8473_v15 }
 0x677   :  { %v5031_v19 = vpop.eup %5030  ;;  %vm3416_vm7 = vcmp.eq.f32.partialorder %v3415_v58, 8.507059e+37 }
 0x678   :  { %v5033_v32 = vpop.eup %5032  ;;  %v3389_v25 = vadd.f32 1.0, %v5031_v19  ;;  %v4596_v27 = vmul.f32 -1.442695, %v3522_v21  ;;  %v4597_v29 = vmul.f32 -1.442695, %v3523_v22  ;;  %v3418_v19 = vor.u32 1.1754944e-38, %v3417_v5 }
 0x679   :  { %v7466_v4 = vpop.eup %5034  ;;  %v7468_v2 = vadd.f32 1.0, %v5033_v32 }
 0x67a   :  { %v7470_v16 = vpop.eup %5036  ;;  %5038 = vrcp.f32 %v3389_v25  ;;  %v3493_v23 = vpop.f32.mrf.mxu2  ;;  %v3392_v41 = vmul.f32 %v7466_v4, %v7458_v34  ;;  %v3430_v7 = vand.u32 2147483647, %v3389_v25  ;;  %v3432_v6 = vand.u32 2147483648, %v3389_v25 }
 0x67b   :  { %v3506_v40 = vpop.f32.mrf.mxu3  ;;  %v3407_v42 = vmul.f32 %v7470_v16, %v7460_v28  ;;  %v3469_v46 = vpop.f32.mrf.mxu0  ;;  %5040 = vrcp.f32 %v7468_v2  ;;  %v3516_v55 = vrot.slane %v3493_v23, 1  ;;  %vm3412_vm14 = vweird.f32 %v7470_v16 }
 0x67c   :  { %v3482_v53 = vpop.f32.mrf.mxu1  ;;  %5042 = vpow2.f32 %v4596_v27  ;;  %v3393_v59 = vsub.f32 1.0, %v3392_v41  ;;  %v3517_v56 = vrot.slane %v3506_v40, 1  ;;  %vm3397_vm0 = vweird.f32 %v7466_v4  ;;  %vm7501_vm1 = vmor %vm3411_vm13, %vm3412_vm14 }
 0x67d   :  { %v3408_v54 = vsub.f32 1.0, %v3407_v42  ;;  %5044 = vpow2.f32 %v4597_v29  ;;  %v3524_v39 = vadd.f32 %v3516_v55, %v8474_v38  ;;  %vm3426_vm2 = vweird.f32 %v3389_v25  ;;  %vm7515_vm6 = vmor %vm3396_vm3, %vm3397_vm0  ;;  %v8480_v42 = vld [vmem:[#allocation32_spill] sm:$0xff] }
 0x67e   :  { %v3394_v14 = vmul.f32 %v7466_v4, %v3393_v59  ;;  %v3525_v36 = vadd.f32 %v3517_v56, %v8475_v24  ;;  %v3433_v10 = vor.u32 1.1754944e-38, %v3432_v6  ;;  %vm3431_vm5 = vcmp.eq.f32.partialorder %v3430_v7, 8.507059e+37 }
 0x67f   :  { %v3409_v37 = vmul.f32 %v7470_v16, %v3408_v54  ;;  %v4598_v63 = vmul.f32 -1.442695, %v3524_v39  ;;  %v3447_v59 = vand.u32 2147483648, %v7468_v2  ;;  %vm3441_vm10 = vweird.f32 %v7468_v2 }
 0x680   :  { %v5039_v1 = vpop.eup %5038  ;;  %v3395_v13 = vadd.f32 %v7466_v4, %v3394_v14  ;;  %v4599_v30 = vmul.f32 -1.442695, %v3525_v36 }
 0x681   :  { %v3422_v47 = vmul.f32 %v5039_v1, %v3389_v25  ;;  %v7479_v57 = vpop.eup %5040  ;;  %v3410_v3 = vadd.f32 %v7470_v16, %v3409_v37  ;;  %5046 = vpow2.f32 %v4598_v63  ;;  %vm3427_vm15 = vweird.f32 %v5039_v1 }
 0x682   :  { %v3495_v9 = vpop.f32.mrf.mxu2  ;;  %v5043_v12 = vpop.eup %5042  ;;  %v3437_v62 = vmul.f32 %v7479_v57, %v7468_v2  ;;  %vm3428_vm4 = vmor %vm3426_vm2, %vm3427_vm15  ;;  %v3399_v21 = vsel %vm7515_vm6, %v7466_v4, %v3395_v13  ;;  %v3403_v25 = vor.u32 1.1754944e-38, %v3402_v50  ;;  %vm3442_vm9 = vweird.f32 %v7479_v57 }
 0x683   :  { %v3508_v11 = vpop.f32.mrf.mxu3  ;;  %v3423_v61 = vsub.f32 1.0, %v3422_v47  ;;  %v5045_v52 = vpop.eup %5044  ;;  %v7486_v26 = vadd.f32 1.0, %v5043_v12  ;;  %v3414_v28 = vsel %vm7501_vm1, %v7470_v16, %v3410_v3  ;;  %vm7544_vm11 = vmor %vm3441_vm10, %vm3442_vm9 }
 0x684   :  { %v7488_v45 = vadd.f32 1.0, %v5045_v52  ;;  %v3438_v51 = vsub.f32 1.0, %v3437_v62  ;;  %v3419_v27 = vsel %vm3416_vm7, %v3418_v19, %v3414_v28  ;;  %v3404_v23 = vsel %vm3401_vm8, %v3403_v25, %v3399_v21 }
 0x685   :  { %v3424_v48 = vmul.f32 %v5039_v1, %v3423_v61  ;;  %5048 = vrcp.f32 %v7486_v26  ;;  %v3453_v46 = vmul.f32 %v3419_v27, %v8480_v42  ;;  %v3448_v11 = vor.u32 1.1754944e-38, %v3447_v59 }
 0x686   :  { %5050 = vrcp.f32 %v7488_v45  ;;  %v3439_v40 = vmul.f32 %v7479_v57, %v3438_v51  ;;  %vm3547_vm13 = vweird.f32 %v7486_v26  ;;  %v3553_v52 = vand.u32 2147483648, %v7486_v26 }
 0x687   :  { %v3425_v20 = vadd.f32 %v5039_v1, %v3424_v48  ;;  %v5047_v18 = vpop.eup %5046  ;;  %5052 = vpow2.f32 %v4599_v30  ;;  %vm3562_vm0 = vweird.f32 %v7488_v45  ;;  %v3566_v5 = vand.u32 2147483647, %v7488_v45 }
 0x688   :  { %v3540_v22 = vadd.f32 1.0, %v5047_v18  ;;  %v3440_v47 = vadd.f32 %v7479_v57, %v3439_v40  ;;  %v3568_v62 = vand.u32 2147483648, %v7488_v45  ;;  %vm3841_vm7 = vcmask 1045504  }
 0x689   :  { %v3429_v17 = vsel %vm3428_vm4, %v5039_v1, %v3425_v20  ;;  %v3445_v1 = vand.u32 2147483647, %v7468_v2  ;;  %v3551_v2 = vand.u32 2147483647, %v7486_v26  ;;  %vm3567_vm9 = vcmp.eq.f32.partialorder %v3566_v5, 8.507059e+37  ;;  %v4773_v20 = vld [vmem:[#allocation16 + $0x30] sm:$0xff] }
 0x68a   :  { %v3434_v34 = vsel %vm3431_vm5, %v3433_v10, %v3429_v17  ;;  %5054 = vrcp.f32 %v3540_v22  ;;  %v3444_v7 = vsel %vm7544_vm11, %v7479_v57, %v3440_v47  ;;  %v3581_v3 = vand.u32 2147483647, %v3540_v22 }
 0x68b   :  { %v3451_v15 = vmul.f32 2.0, %v3434_v34  ;;  %v7522_v32 = vpop.eup %5048  ;;  %vm7549_vm14 = vcmp.eq.f32.partialorder %v3445_v1, 8.507059e+37  ;;  %v3583_v6 = vand.u32 2147483648, %v3540_v22  ;;  %vm3577_vm4 = vweird.f32 %v3540_v22 }
 0x68c   :  { %v7524_v16 = vpop.eup %5050  ;;  %v3543_v41 = vmul.f32 %v7522_v32, %v7486_v26  ;;  %vm3548_vm2 = vweird.f32 %v7522_v32  ;;  %v3449_v57 = vsel %vm7549_vm14, %v3448_v11, %v3444_v7  ;;  %vm3582_vm6 = vcmp.eq.f32.partialorder %v3581_v3, 8.507059e+37 }
 0x68d   :  { %v4595_v29 = vadd.f32 -1.0, %v3451_v15  ;;  %v3558_v4 = vmul.f32 %v7524_v16, %v7488_v45  ;;  %v5053_v55 = vpop.eup %5052  ;;  %vm3563_vm15 = vweird.f32 %v7524_v16  ;;  %v3584_v10 = vor.u32 1.1754944e-38, %v3583_v6  ;;  %vm7580_vm8 = vmor %vm3547_vm13, %vm3548_vm2  ;;  %v4774_v6 = vld [vmem:[#allocation16 + $0x38] sm:$0xff] }
 0x68e   :  { %v3544_v38 = vsub.f32 1.0, %v3543_v41  ;;  %v7537_v39 = vadd.f32 1.0, %v5053_v55  ;;  %vm7568_vm3 = vmor %vm3562_vm0, %vm3563_vm15  ;;  %v3569_v19 = vor.u32 1.1754944e-38, %v3568_v62  ;;  %v3554_v25 = vor.u32 1.1754944e-38, %v3553_v52 }
 0x68f   :  { %v3454_v53 = vmul.f32 %v4595_v29, %v3404_v23  ;;  %v3559_v54 = vsub.f32 1.0, %v3558_v4  ;;  %vm3552_vm10 = vcmp.eq.f32.partialorder %v3551_v2, 8.507059e+37  ;;  %v3605_v27 = vrot.slane %v7356_v8, 7 }
 0x690   :  { %v5055_v56 = vpop.eup %5054  ;;  %v3545_v14 = vmul.f32 %v7522_v32, %v3544_v38  ;;  %v3598_v42 = vand.u32 2147483648, %v7537_v39  ;;  %vm3592_vm13 = vweird.f32 %v7537_v39 }
 0x691   :  { %v7534_v37 = vadd.f32 %v3454_v53, %v3453_v46  ;;  %v3560_v58 = vmul.f32 %v7524_v16, %v3559_v54  ;;  %v3573_v63 = vmul.f32 %v5055_v56, %v3540_v22  ;;  %vm3578_vm1 = vweird.f32 %v5055_v56 }
 0x692   :  { %v3546_v49 = vadd.f32 %v7522_v32, %v3545_v14  ;;  %vm3579_vm5 = vmor %vm3577_vm4, %vm3578_vm1  ;;  %v3599_v8 = vor.u32 1.1754944e-38, %v3598_v42 }
 0x693   :  { %5056 = vtanh.f32 %v7534_v37  ;;  %v3574_v61 = vsub.f32 1.0, %v3573_v63  ;;  %v3561_v48 = vadd.f32 %v7524_v16, %v3560_v58 }
 0x694   :  { %5058 = vrcp.f32 %v7537_v39  ;;  %v3550_v21 = vsel %vm7580_vm8, %v7522_v32, %v3546_v49 }
 0x695   :  { %v3575_v24 = vmul.f32 %v5055_v56, %v3574_v61  ;;  %v3565_v45 = vsel %vm7568_vm3, %v7524_v16, %v3561_v48  ;;  %v3555_v29 = vsel %vm3552_vm10, %v3554_v25, %v3550_v21  ;;  %v4769_v25 = vld [vmem:[#allocation16 + $0x10] sm:$0xff] }
 0x696   :  { %v3570_v26 = vsel %vm3567_vm9, %v3569_v19, %v3565_v45 }
 0x697   :  { %v3576_v60 = vadd.f32 %v5055_v56, %v3575_v24  ;;  %v3607_v40 = vmul.f32 %v3605_v27, %v3570_v26 }
 0x699   :  { %v5057_v36 = vpop.eup %5056  ;;  %v3580_v17 = vsel %vm3579_vm5, %v5055_v56, %v3576_v60 }
 0x69a   :  { %v5059_v13 = vpop.eup %5058  ;;  %v3457_v50 = vmul.f32 %v5057_v36, %v3449_v57  ;;  %v3585_v34 = vsel %vm3582_vm6, %v3584_v10, %v3580_v17  ;;  %v4772_v10 = vld [vmem:[#allocation16 + $0x28] sm:$0xff] }
 0x69b   :  { %v3588_v28 = vmul.f32 %v5059_v13, %v7537_v39  ;;  %v3602_v15 = vmul.f32 2.0, %v3585_v34  ;;  %vm3593_vm11 = vweird.f32 %v5059_v13 }
 0x69c   :  { %v3613_v30 = vpack.c.bf16 %v3457_v50, %v3457_v50  ;;  %v3826_v18 = vrot.slane %v3457_v50, 2  ;;  %vm3594_vm14 = vmor %vm3592_vm13, %vm3593_vm11 }
 0x69d   :  { %v3589_v51 = vsub.f32 1.0, %v3588_v28  ;;  %v4600_v16 = vadd.f32 -1.0, %v3602_v15 }
 0x69e   :  { %3622 = vmatmul.bf16.vlgmr.msrb.gmra.mxu0 %v3613_v30  ;;  %3635 = vmatmul.bf16.vlgmr.msrb.gmra.mxu1 %v3613_v30  ;;  %v7588_v22 = vsel %vm3841_vm7, %v7349_v0, %v3826_v18  ;;  %v3596_v0 = vand.u32 2147483647, %v7537_v39 }
 0x69f   :  { %3648 = vmatmul.bf16.vlgmr.msrb.gmra.mxu2 %v3613_v30  ;;  %3661 = vmatmul.bf16.vlgmr.msrb.gmra.mxu3 %v3613_v30  ;;  %v3590_v23 = vmul.f32 %v5059_v13, %v3589_v51  ;;  %v3608_v41 = vmul.f32 %v4600_v16, %v3555_v29  ;;  %v4771_v30 = vld [vmem:[#allocation16 + $0x20] sm:$0xff] }
 0x6a0   :  { %vm3597_vm15 = vcmp.eq.f32.partialorder %v3596_v0, 8.507059e+37  ;;  %3914 = vmatpush.bf16.msrb.mxu0 %v4774_v6  ;;  %v4767_v0 = vld [vmem:[#allocation16] sm:$0xff] }
 0x6a1   :  { %v7591_v32 = vadd.f32 %v3608_v41, %v3607_v40  ;;  %v3591_v4 = vadd.f32 %v5059_v13, %v3590_v23  ;;  %v4768_v23 = vld [vmem:[#allocation16 + $0x8] sm:$0xff] }
 0x6a3   :  { %5060 = vtanh.f32 %v7591_v32  ;;  %v3595_v46 = vsel %vm3594_vm14, %v5059_v13, %v3591_v4 }
 0x6a4   :  { %v3600_v54 = vsel %vm3597_vm15, %v3599_v8, %v3595_v46  ;;  %3915 = vmatpush.bf16.msrb.mxu0 %v4773_v20 }
 0x6a8   :  { %3916 = vmatpush.bf16.msrb.mxu0 %v4772_v10 }
 0x6a9   :  { %v5061_v53 = vpop.eup %5060 }
 0x6aa   :  { %v7597_v55 = vmul.f32 %v5061_v53, %v3600_v54 }
 0x6ac   :  { %v3612_v59 = vpack.c.bf16 %v7597_v55, %v7597_v55  ;;  %3917 = vmatpush.bf16.msrb.mxu0 %v4771_v30 }
 0x6ae   :  { %v3667_v1 = vshrl.u32 %v3612_v59, 16 }
 0x6b0   :  { %v3669_v38 = vrot.slane %v3667_v1, 3 }
 0x6b2   :  { %3679 = vmatmul.bf16.vlgmr.msra.gmra.mxu0 %v3669_v38  ;;  %3692 = vmatmul.bf16.vlgmr.msra.gmra.mxu1 %v3669_v38 }
 0x6b3   :  { %3705 = vmatmul.bf16.vlgmr.msra.gmra.mxu2 %v3669_v38  ;;  %3718 = vmatmul.bf16.vlgmr.msra.gmra.mxu3 %v3669_v38 }
 0x71b   :  { %v3623_v47 = vpop.f32.mrf.mxu0  ;;  %v3636_v56 = vpop.f32.mrf.mxu1 }
 0x722   :  { %v3649_v39 = vpop.f32.mrf.mxu2  ;;  %v3662_v58 = vpop.f32.mrf.mxu3 }
 0x723   :  { %v3625_v63 = vpop.f32.mrf.mxu0  ;;  %v3638_v9 = vpop.f32.mrf.mxu1 }
 0x72a   :  { %v3651_v11 = vpop.f32.mrf.mxu2  ;;  %v3664_v12 = vpop.f32.mrf.mxu3 }
 0x72f   :  { %v3680_v14 = vpop.f32.mrf.mxu0  ;;  %v3693_v2 = vpop.f32.mrf.mxu1 }
 0x730   :  { %v3681_v61 = vadd.f32 %v3680_v14, %v3623_v47  ;;  %v3694_v7 = vadd.f32 %v3693_v2, %v3636_v56 }
 0x732   :  { %v3723_v52 = vadd.f32 %v3681_v61, %v8468_v35  ;;  %v3724_v3 = vadd.f32 %v3694_v7, %v8469_v33 }
 0x734   :  { %v4601_v48 = vmul.f32 -1.442695, %v3723_v52  ;;  %v4602_v24 = vmul.f32 -1.442695, %v3724_v3 }
 0x736   :  { %5062 = vpow2.f32 %v4601_v48  ;;  %v3706_v36 = vpop.f32.mrf.mxu2  ;;  %v3719_v5 = vpop.f32.mrf.mxu3 }
 0x737   :  { %5064 = vpow2.f32 %v4602_v24  ;;  %v3707_v62 = vadd.f32 %v3706_v36, %v3649_v39  ;;  %v3720_v57 = vadd.f32 %v3719_v5, %v3662_v58  ;;  %v3682_v13 = vpop.f32.mrf.mxu0  ;;  %v3695_v49 = vpop.f32.mrf.mxu1 }
 0x739   :  { %v3725_v60 = vadd.f32 %v3707_v62, %v8470_v31  ;;  %v3726_v50 = vadd.f32 %v3720_v57, %v8471_v43  ;;  %v4770_v31 = vld [vmem:[#allocation16 + $0x18] sm:$0xff] }
 0x73a   :  { %3918 = vmatpush.bf16.msrb.mxu0 %v4770_v31 }
 0x73b   :  { %v4603_v35 = vmul.f32 -1.442695, %v3725_v60  ;;  %v4604_v33 = vmul.f32 -1.442695, %v3726_v50 }
 0x73c   :  { %v5063_v28 = vpop.eup %5062 }
 0x73d   :  { %v5065_v45 = vpop.eup %5064  ;;  %v7605_v17 = vadd.f32 1.0, %v5063_v28  ;;  %5066 = vpow2.f32 %v4603_v35  ;;  %v3955_v35 = vrot.slane %v7591_v32, 7 }
 0x73e   :  { %v3740_v18 = vadd.f32 1.0, %v5065_v45  ;;  %5068 = vpow2.f32 %v4604_v33  ;;  %v3708_v44 = vpop.f32.mrf.mxu2  ;;  %v3721_v19 = vpop.f32.mrf.mxu3  ;;  %3919 = vmatpush.bf16.msrb.mxu0 %v4769_v25 }
 0x73f   :  { %5070 = vrcp.f32 %v7605_v17  ;;  %vm3748_vm6 = vweird.f32 %v7605_v17  ;;  %v3754_v11 = vand.u32 2147483648, %v7605_v17  ;;  %v3752_v14 = vand.u32 2147483647, %v7605_v17 }
 0x740   :  { %5072 = vrcp.f32 %v3740_v18  ;;  %vm3763_vm2 = vweird.f32 %v3740_v18  ;;  %v3767_v47 = vand.u32 2147483647, %v3740_v18  ;;  %v3769_v56 = vand.u32 2147483648, %v3740_v18 }
 0x741   :  { %v3755_v24 = vor.u32 1.1754944e-38, %v3754_v11  ;;  %vm3753_vm11 = vcmp.eq.f32.partialorder %v3752_v14, 8.507059e+37  ;;  %v3948_v19 = vrot.slane %v7597_v55, 7 }
 0x742   :  { %3920 = vmatpush.bf16.msrb.mxu0 %v4768_v23  ;;  %v3770_v7 = vor.u32 1.1754944e-38, %v3769_v56  ;;  %vm3768_vm10 = vcmp.eq.f32.partialorder %v3767_v47, 8.507059e+37 }
 0x743   :  { %v5067_v43 = vpop.eup %5066 }
 0x744   :  { %v5069_v34 = vpop.eup %5068  ;;  %v3741_v51 = vadd.f32 1.0, %v5067_v43 }
 0x745   :  { %v5071_v21 = vpop.eup %5070  ;;  %v7608_v15 = vadd.f32 1.0, %v5069_v34 }
 0x746   :  { %v5073_v26 = vpop.eup %5072  ;;  %5074 = vrcp.f32 %v3741_v51  ;;  %v3744_v27 = vmul.f32 %v5071_v21, %v7605_v17  ;;  %v3784_v54 = vand.u32 2147483648, %v3741_v51  ;;  %v3782_v38 = vand.u32 2147483647, %v3741_v51  ;;  %3921 = vmatpush.bf16.msrb.mxu0 %v4767_v0 }
 0x747   :  { %v3759_v16 = vmul.f32 %v5073_v26, %v3740_v18  ;;  %5076 = vrcp.f32 %v7608_v15  ;;  %vm3764_vm0 = vweird.f32 %v5073_v26  ;;  %vm3749_vm3 = vweird.f32 %v5071_v21 }
 0x748   :  { %v3745_v40 = vsub.f32 1.0, %v3744_v27  ;;  %vm7613_vm4 = vmor %vm3763_vm2, %vm3764_vm0  ;;  %vm3778_vm5 = vweird.f32 %v3741_v51  ;;  %v3785_v12 = vor.u32 1.1754944e-38, %v3784_v54  ;;  %vm3783_vm8 = vcmp.eq.f32.partialorder %v3782_v38, 8.507059e+37 }
 0x749   :  { %v3760_v29 = vsub.f32 1.0, %v3759_v16  ;;  %vm3750_vm9 = vmor %vm3748_vm6, %vm3749_vm3  ;;  %v3799_v50 = vand.u32 2147483648, %v7608_v15  ;;  %vm3793_vm14 = vweird.f32 %v7608_v15  ;;  %v3797_v10 = vand.u32 2147483647, %v7608_v15 }
 0x74a   :  { %v3746_v8 = vmul.f32 %v5071_v21, %v3745_v40 }
 0x74b   :  { %v3761_v4 = vmul.f32 %v5073_v26, %v3760_v29  ;;  %vm3798_vm0 = vcmp.eq.f32.partialorder %v3797_v10, 8.507059e+37 }
 0x74c   :  { %v5075_v41 = vpop.eup %5074  ;;  %v3747_v58 = vadd.f32 %v5071_v21, %v3746_v8 }
 0x74d   :  { %v3774_v42 = vmul.f32 %v5075_v41, %v3741_v51  ;;  %v5077_v46 = vpop.eup %5076  ;;  %v3762_v59 = vadd.f32 %v5073_v26, %v3761_v4  ;;  %vm3779_vm1 = vweird.f32 %v5075_v41 }
 0x74e   :  { %v3789_v39 = vmul.f32 %v5077_v46, %v7608_v15  ;;  %vm3780_vm7 = vmor %vm3778_vm5, %vm3779_vm1  ;;  %v3751_v6 = vsel %vm3750_vm9, %v5071_v21, %v3747_v58  ;;  %vm3794_vm13 = vweird.f32 %v5077_v46  ;;  %vm3843_vm1 = vcmask 1046528  }
 0x74f   :  { %v3775_v53 = vsub.f32 1.0, %v3774_v42  ;;  %v3766_v2 = vsel %vm7613_vm4, %v5073_v26, %v3762_v59  ;;  %v3756_v62 = vsel %vm3753_vm11, %v3755_v24, %v3751_v6  ;;  %vm3795_vm15 = vmor %vm3793_vm14, %vm3794_vm13 }
 0x750   :  { %v3790_v3 = vsub.f32 1.0, %v3789_v39  ;;  %v3771_v36 = vsel %vm3768_vm10, %v3770_v7, %v3766_v2 }
 0x751   :  { %v3776_v1 = vmul.f32 %v5075_v41, %v3775_v53  ;;  %v3805_v13 = vmul.f32 %v3771_v36, %v7534_v37  ;;  %v3800_v37 = vor.u32 1.1754944e-38, %v3799_v50 }
 0x752   :  { %v3791_v57 = vmul.f32 %v5077_v46, %v3790_v3 }
 0x753   :  { %v3777_v9 = vadd.f32 %v5075_v41, %v3776_v1 }
 0x754   :  { %v3792_v60 = vadd.f32 %v5077_v46, %v3791_v57 }
 0x755   :  { %v3781_v61 = vsel %vm3780_vm7, %v5075_v41, %v3777_v9 }
 0x756   :  { %v3786_v52 = vsel %vm3783_vm8, %v3785_v12, %v3781_v61  ;;  %v3796_v45 = vsel %vm3795_vm15, %v5077_v46, %v3792_v60 }
 0x757   :  { %v3803_v48 = vmul.f32 2.0, %v3786_v52  ;;  %v3801_v30 = vsel %vm3798_vm0, %v3800_v37, %v3796_v45 }
 0x759   :  { %v4605_v5 = vadd.f32 -1.0, %v3803_v48 }
 0x75b   :  { %v3806_v49 = vmul.f32 %v4605_v5, %v3756_v62 }
 0x75d   :  { %v3807_v20 = vadd.f32 %v3806_v49, %v3805_v13 }
 0x75f   :  { %5078 = vtanh.f32 %v3807_v20  ;;  %v3958_v33 = vrot.slane %v3807_v20, 7 }
 0x761   :  { %v3960_v28 = vsel %vm3831_vm12, %v3955_v35, %v3958_v33 }
 0x762   :  { %3961 = vst [vmem:[#allocation20] sm:$0x3] %v3960_v28 }
 0x765   :  { %v5079_v17 = vpop.eup %5078 }
 0x766   :  { %v3809_v18 = vmul.f32 %v5079_v17, %v3801_v30 }
 0x768   :  { %v3829_v44 = vrot.slane %v3809_v18, 1  ;;  %v3950_v32 = vrot.slane %v3809_v18, 7 }
 0x76a   :  { %v3844_v31 = vsel %vm3843_vm1, %v7588_v22, %v3829_v44  ;;  %v3952_v43 = vsel %vm3831_vm12, %v3948_v19, %v3950_v32  ;;  %v4791_v22 = vld [vmem:[%s7653_s10] ss:$0 sm:$0xff]  ;;  %s3969_s10 = sshll.u32 %s7654_s11, 4  ;;  %s3970_s10 = int_to_ptr.hbm [resolvable:$true] %s3969_s10 }
 0x76b   :  { %v3845_v34 = vpack.c.bf16 %v3844_v31, %v3844_v31  ;;  %3953 = vst [vmem:[#allocation18] sm:$0x3] %v3952_v43 }
 0x76c   :  { %3983 = dma.vmem_to_hbm [thread:$0]  %s3979_s16, 32, %s3981_s14, [#allocation19]  }
 0x76d   :  { %3922 = vmatmul.bf16.vlgmr.msrb.gmra.mxu0 %v3845_v34  ;;  %3994 = dma.vmem_to_hbm [thread:$0]  %s3990_s17, 32, %s3992_s21, [#allocation19]  }
 0x7ea   :  { %v3923_v55 = vpop.f32.mrf.mxu0 }
 0x7eb   :  { %v3924_v51 = vadd.f32 %v4791_v22, %v3923_v55 }
 0x7ed   :  { %v4638_v21 = vmul.f32 -1.442695, %v3924_v51 }
 0x7ef   :  { %5080 = vpow2.f32 %v4638_v21 }
 0x7f2   :  { %v3925_v15 = vpop.f32.mrf.mxu0 }
 0x7f5   :  { %v5081_v25 = vpop.eup %5080 }
 0x7f6   :  { %v3930_v26 = vadd.f32 1.0, %v5081_v25 }
 0x7f8   :  { %5082 = vrcp.f32 %v3930_v26  ;;  %v3942_v23 = vand.u32 2147483648, %v3930_v26  ;;  %v3940_v41 = vand.u32 2147483647, %v3930_v26  ;;  %vm3936_vm2 = vweird.f32 %v3930_v26 }
 0x7fa   :  { %v3943_v42 = vor.u32 1.1754944e-38, %v3942_v23  ;;  %vm3941_vm4 = vcmp.eq.f32.partialorder %v3940_v41, 8.507059e+37 }
 0x7fe   :  { %v5083_v27 = vpop.eup %5082 }
 0x7ff   :  { %v3932_v16 = vmul.f32 %v5083_v27, %v3930_v26  ;;  %vm3937_vm12 = vweird.f32 %v5083_v27 }
 0x800   :  { %vm3938_vm3 = vmor %vm3936_vm2, %vm3937_vm12 }
 0x801   :  { %v3933_v29 = vsub.f32 1.0, %v3932_v16 }
 0x803   :  { %v3934_v40 = vmul.f32 %v5083_v27, %v3933_v29 }
 0x805   :  { %v3935_v4 = vadd.f32 %v5083_v27, %v3934_v40 }
 0x807   :  { %v3939_v0 = vsel %vm3938_vm3, %v5083_v27, %v3935_v4 }
 0x808   :  { %v3944_v46 = vsel %vm3941_vm4, %v3943_v42, %v3939_v0 }
 0x809   :  { %3946 = vst [vmem:[#allocation17] sm:$0xff] %v3944_v46 }
 0x80a   :  { %3972 = dma.vmem_to_hbm [thread:$0]  %s3968_s13, 128, %s3970_s10, [#allocation4]  }
 0x80b   :  { %5382 = dma.done.wait [#allocation4], 128  }
 0x80c   :  { %5383 = vsyncadd [#allocation4], 4294967168 }
 0x80d   :  { %5384 = dma.done.wait [#allocation19], 64  }
 0x80e   :  { %5385 = vsyncadd [#allocation19], 4294967232 }
 0x80f   :  { %4007 = vsyncpa [#allocation3], 1 }
 0x810   :  { %4008 = vsyncpa [#allocation6], 1 }
 0x811   :  { %4009 = vsyncpa [#allocation9], 1 }
 0x812   :  { %4010 = vsyncpa [#allocation12], 1 }
 0x813   :  { %4011 = vsyncpa [#allocation15], 1 }
 0x814   :  { %4012 = vsyncpa [#allocation4], 1 }
 0x815   :  { %4013 = vsyncpa [#allocation19], 1 }

</bundles_post_ra>
